<compile_context>
chip_gen: v7x
topology: tpu7x:2x2x1
jax: 0.10.0
libtpu: 0.0.40
codegen_flags: <defaults>
</compile_context>

<pallas_src>
import functools

import jax
import jax.numpy as jnp
from jax.experimental import pallas as pl
from jax.experimental.pallas import tpu as pltpu

EPS = 1e-5  # nn.LayerNorm default


def _layer_norm(z, gamma, beta):
    mu = jnp.mean(z, axis=-1, keepdims=True)
    var = jnp.mean((z - mu) ** 2, axis=-1, keepdims=True)
    return (z - mu) * jax.lax.rsqrt(var + EPS) * gamma + beta


def transformer_classifier_kernel(
    x_ref,                       # (Bt, S, D_in)
    emb_w_ref, emb_b_ref,        # (D_in, E), (1, E)
    wq_ref, bq_ref,              # (E, E),    (1, E)
    wk_ref, bk_ref,              # (E, E),    (1, E)
    wv_ref, bv_ref,              # (E, E),    (1, E)
    wo_ref, bo_ref,              # (E, E),    (1, E)
    ln1_g_ref, ln1_b_ref,        # (1, E),    (1, E)
    ff1_w_ref, ff1_b_ref,        # (E, F),    (1, F)
    ff2_w_ref, ff2_b_ref,        # (F, E),    (1, E)
    ln2_g_ref, ln2_b_ref,        # (1, E),    (1, E)
    fc_w_ref, fc_b_ref,          # (E, Cp),   (1, Cp)   (Cp = lane-padded classes)
    out_ref,                     # (Bt, Cp)
    *, num_heads,
):
    Bt, S, D_in = x_ref.shape
    E = emb_w_ref.shape[1]
    H = num_heads
    Dh = E // H
    N = Bt * S
    scale = 1.0 / float(Dh) ** 0.5

    def dense(a, w_ref, b_ref):
        # Weights are already (in, out): no transpose in the kernel.
        return jnp.dot(a, w_ref[...], preferred_element_type=jnp.float32) + b_ref[...]

    # ---- Embedding ---------------------------------------------------------
    xf = x_ref[...].reshape(N, D_in)                # flatten batch-block x seq
    h = dense(xf, emb_w_ref, emb_b_ref)             # (N, E)

    # ---- Multi-head self-attention ----------------------------------------
    q = dense(h, wq_ref, bq_ref)                    # (N, E)
    k = dense(h, wk_ref, bk_ref)
    v = dense(h, wv_ref, bv_ref)

    def to_heads(t):
        # (N, E) -> (H * Bt, S, Dh); head h occupies rows [h*Bt, (h+1)*Bt).
        parts = [t[:, hh * Dh:(hh + 1) * Dh] for hh in range(H)]   # H x (N, Dh)
        stacked = jnp.concatenate(parts, axis=0)                   # (H*N, Dh)
        return stacked.reshape(H * Bt, S, Dh)

    qh = to_heads(q)
    kh = to_heads(k)
    vh = to_heads(v)

    # One batched matmul over the fused (head, batch) axis.
    s = jnp.einsum("bqd,bkd->bqk", qh, kh,
                   preferred_element_type=jnp.float32) * scale     # (H*Bt, S, S)
    s = s - jnp.max(s, axis=-1, keepdims=True)
    p = jnp.exp(s)
    p = p * pl.reciprocal(jnp.sum(p, axis=-1, keepdims=True), approx=True)
    ctx = jnp.einsum("bqk,bkd->bqd", p, vh,
                     preferred_element_type=jnp.float32)           # (H*Bt, S, Dh)

    ctx_flat = ctx.reshape(H * N, Dh)
    attn = jnp.concatenate([ctx_flat[hh * N:(hh + 1) * N] for hh in range(H)],
                           axis=-1)                                # (N, E)
    attn = dense(attn, wo_ref, bo_ref)

    # ---- Residual + LayerNorm 1 -------------------------------------------
    x1 = _layer_norm(h + attn, ln1_g_ref[...], ln1_b_ref[...])

    # ---- Feed-forward: Linear -> ReLU -> Linear ----------------------------
    ff = jnp.maximum(dense(x1, ff1_w_ref, ff1_b_ref), 0.0)
    ff = dense(ff, ff2_w_ref, ff2_b_ref)

    # ---- Residual + LayerNorm 2 -------------------------------------------
    x2 = _layer_norm(x1 + ff, ln2_g_ref[...], ln2_b_ref[...])

    # ---- AdaptiveAvgPool1d(1) over the sequence + classifier head ----------
    pooled = jnp.mean(x2.reshape(Bt, S, E), axis=1)                # (Bt, E)
    out_ref[...] = dense(pooled, fc_w_ref, fc_b_ref)               # (Bt, Cp)


def _pick_block_b(B):
    # Prefer >= 8 rows per store (sublane-dense) while keeping grid >= 2 when
    # possible (v7x megacore); fall back to the whole batch as a single block.
    for bt in (8, 16):
        if B % bt == 0:
            return bt
    return B


def transformer_classifier(x, params, *, num_heads, block_b=None):
    """x: (B, S, D_in) float32 -> logits (B, C) float32."""
    B, S, D_in = x.shape
    E = params["emb_w"].shape[0]
    F = params["ff1_w"].shape[0]
    C = params["fc_w"].shape[0]
    assert E % num_heads == 0, "emb_dim must be divisible by num_heads"

    if block_b is None:
        block_b = _pick_block_b(B)
    assert B % block_b == 0

    # Lane-dense classifier output: pad classes to a multiple of 128.
    C_pad = max(128, -(-C // 128) * 128)

    # ---- Host-side weight preparation (done once, outside the kernel) ------
    w_in = params["in_proj_w"]                       # (3E, E) PyTorch layout
    b_in = params["in_proj_b"].reshape(1, 3 * E)
    fc_wT = jnp.pad(params["fc_w"].T, ((0, 0), (0, C_pad - C)))
    fc_b = jnp.pad(params["fc_b"].reshape(1, C), ((0, 0), (0, C_pad - C)))

    param_list = [
        params["emb_w"].T, params["emb_b"].reshape(1, E),
        w_in[:E].T, b_in[:, :E],                     # Q
        w_in[E:2 * E].T, b_in[:, E:2 * E],           # K
        w_in[2 * E:].T, b_in[:, 2 * E:],             # V
        params["out_proj_w"].T, params["out_proj_b"].reshape(1, E),
        params["ln1_g"].reshape(1, E), params["ln1_b"].reshape(1, E),
        params["ff1_w"].T, params["ff1_b"].reshape(1, F),
        params["ff2_w"].T, params["ff2_b"].reshape(1, E),
        params["ln2_g"].reshape(1, E), params["ln2_b"].reshape(1, E),
        fc_wT, fc_b,
    ]

    def resident(a):
        # Whole array resident in VMEM; same block index every grid step.
        return pl.BlockSpec(a.shape, lambda b: (0,) * a.ndim)

    in_specs = [pl.BlockSpec((block_b, S, D_in), lambda b: (b, 0, 0))] + [
        resident(p) for p in param_list
    ]
    out_spec = pl.BlockSpec((block_b, C_pad), lambda b: (b, 0))

    # Advisory cost estimate for the whole call.
    N = B * S
    Dh = E // num_heads
    flops = (2 * N * (D_in * E + 4 * E * E + 2 * E * F)
             + 4 * B * num_heads * S * S * Dh
             + 2 * B * E * C_pad)
    bytes_accessed = (x.size * x.dtype.itemsize
                      + sum(int(p.size) * p.dtype.itemsize for p in param_list)
                      + B * C_pad * 4)
    cost = pl.CostEstimate(flops=int(flops),
                           transcendentals=int(B * num_heads * S * S),
                           bytes_accessed=int(bytes_accessed))

    kernel = functools.partial(transformer_classifier_kernel, num_heads=num_heads)

    out = pl.pallas_call(
        kernel,
        out_shape=jax.ShapeDtypeStruct((B, C_pad), jnp.float32),
        grid=(B // block_b,),
        in_specs=in_specs,
        out_specs=out_spec,
        compiler_params=pltpu.CompilerParams(dimension_semantics=("parallel",)),
        cost_estimate=cost,
    )(x, *param_list)
    return out[:, :C]


def init_params(key, input_dim, emb_dim, num_heads, ff_hidden, num_classes):
    ks = jax.random.split(key, 8)

    def lin_w(k, out_f, in_f):
        return (jax.random.normal(k, (out_f, in_f), jnp.float32)
                * (1.0 / jnp.sqrt(jnp.float32(in_f))))

    E, F, C = emb_dim, ff_hidden, num_classes
    params = {
        "emb_w": lin_w(ks[0], E, input_dim),
        "emb_b": jnp.zeros((1, E), jnp.float32) + 0.01,
        "in_proj_w": lin_w(ks[1], 3 * E, E),
        "in_proj_b": jnp.zeros((1, 3 * E), jnp.float32),
        "out_proj_w": lin_w(ks[2], E, E),
        "out_proj_b": jnp.zeros((1, E), jnp.float32),
        "ln1_g": jnp.ones((1, E), jnp.float32),
        "ln1_b": jnp.zeros((1, E), jnp.float32),
        "ff1_w": lin_w(ks[3], F, E),
        "ff1_b": jnp.zeros((1, F), jnp.float32) + 0.02,
        "ff2_w": lin_w(ks[4], E, F),
        "ff2_b": jnp.zeros((1, E), jnp.float32),
        "ln2_g": jnp.ones((1, E), jnp.float32),
        "ln2_b": jnp.zeros((1, E), jnp.float32),
        "fc_w": lin_w(ks[5], C, E),
        "fc_b": jnp.zeros((1, C), jnp.float32) + 0.03,
    }
    return params


def reference_forward(x, params, *, num_heads):
    """Pure-JAX reference mirroring the PyTorch forward (eval mode)."""
    E = params["emb_w"].shape[0]
    Dh = E // num_heads
    h = x @ params["emb_w"].T + params["emb_b"]
    qkv = h @ params["in_proj_w"].T + params["in_proj_b"]
    q, k, v = qkv[..., :E], qkv[..., E:2 * E], qkv[..., 2 * E:]

    def split_heads(t):  # (B,S,E) -> (B,H,S,Dh)
        B, S, _ = t.shape
        return t.reshape(B, S, num_heads, Dh).transpose(0, 2, 1, 3)

    qh, kh, vh = split_heads(q), split_heads(k), split_heads(v)
    s = jnp.einsum("bhqd,bhkd->bhqk", qh, kh) / jnp.sqrt(jnp.float32(Dh))
    p = jax.nn.softmax(s, axis=-1)
    o = jnp.einsum("bhqk,bhkd->bhqd", p, vh).transpose(0, 2, 1, 3).reshape(
        x.shape[0], x.shape[1], E)
    attn = o @ params["out_proj_w"].T + params["out_proj_b"]

    def ln(z, g, b):
        mu = jnp.mean(z, axis=-1, keepdims=True)
        var = jnp.mean((z - mu) ** 2, axis=-1, keepdims=True)
        return (z - mu) * jax.lax.rsqrt(var + EPS) * g + b

    x1 = ln(h + attn, params["ln1_g"], params["ln1_b"])
    ff = jax.nn.relu(x1 @ params["ff1_w"].T + params["ff1_b"]) @ params["ff2_w"].T + params["ff2_b"]
    x2 = ln(x1 + ff, params["ln2_g"], params["ln2_b"])
    pooled = jnp.mean(x2, axis=1)
    return pooled @ params["fc_w"].T + params["fc_b"]


if __name__ == "__main__":
    # Small shapes consistent with the module defaults
    # (input_dim=7, emb_dim=64, heads=4, ff_hidden=128, num_classes=4).
    # B=16 / block_b=8 -> grid of 2 parallel steps; S=16 keeps reshapes tile-aligned.
    B, S, D_in = 16, 16, 7
    E, H, F, C = 64, 4, 128, 4

    key = jax.random.PRNGKey(0)
    kx, kp = jax.random.split(key)
    x = jax.random.normal(kx, (B, S, D_in), jnp.float32)
    params = init_params(kp, D_in, E, H, F, C)

    logits = transformer_classifier(x, params, num_heads=H)
    logits = jax.block_until_ready(logits)

    ref = reference_forward(x, params, num_heads=H)
    assert logits.shape == (B, C)
    assert jnp.allclose(logits, ref, atol=5e-3, rtol=5e-3), (logits, ref)

    print("KERNEL_OK")
</pallas_src>

<mosaic_0001>
module attributes {stable_mosaic.version = 11 : i64} {
  func.func @transformer_classifier_kernel(%arg0: i32, %arg1: memref<8x16x7xf32, #tpu.memory_space<vmem>>, %arg2: memref<7x64xf32, #tpu.memory_space<vmem>>, %arg3: memref<1x64xf32, #tpu.memory_space<vmem>>, %arg4: memref<64x64xf32, #tpu.memory_space<vmem>>, %arg5: memref<1x64xf32, #tpu.memory_space<vmem>>, %arg6: memref<64x64xf32, #tpu.memory_space<vmem>>, %arg7: memref<1x64xf32, #tpu.memory_space<vmem>>, %arg8: memref<64x64xf32, #tpu.memory_space<vmem>>, %arg9: memref<1x64xf32, #tpu.memory_space<vmem>>, %arg10: memref<64x64xf32, #tpu.memory_space<vmem>>, %arg11: memref<1x64xf32, #tpu.memory_space<vmem>>, %arg12: memref<1x64xf32, #tpu.memory_space<vmem>>, %arg13: memref<1x64xf32, #tpu.memory_space<vmem>>, %arg14: memref<64x128xf32, #tpu.memory_space<vmem>>, %arg15: memref<1x128xf32, #tpu.memory_space<vmem>>, %arg16: memref<128x64xf32, #tpu.memory_space<vmem>>, %arg17: memref<1x64xf32, #tpu.memory_space<vmem>>, %arg18: memref<1x64xf32, #tpu.memory_space<vmem>>, %arg19: memref<1x64xf32, #tpu.memory_space<vmem>>, %arg20: memref<64x128xf32, #tpu.memory_space<vmem>>, %arg21: memref<1x128xf32, #tpu.memory_space<vmem>>, %arg22: memref<8x128xf32, #tpu.memory_space<vmem>>) attributes {dimension_semantics = [#tpu.dimension_semantics<parallel>], iteration_bounds = array<i64: 2>, scalar_prefetch = 0 : i64, scratch_operands = 0 : i64, tpu.core_type = #tpu.core_type<tc>, window_params = [{transform_indices = @transform_0, window_bounds = array<i64: 8, 16, 7>}, {pipeline_mode = #tpu.pipeline_mode<synchronous>, transform_indices = @transform_1, window_bounds = array<i64: 7, 64>}, {pipeline_mode = #tpu.pipeline_mode<synchronous>, transform_indices = @transform_2, window_bounds = array<i64: 1, 64>}, {pipeline_mode = #tpu.pipeline_mode<synchronous>, transform_indices = @transform_3, window_bounds = array<i64: 64, 64>}, {pipeline_mode = #tpu.pipeline_mode<synchronous>, transform_indices = @transform_4, window_bounds = array<i64: 1, 64>}, {pipeline_mode = #tpu.pipeline_mode<synchronous>, transform_indices = @transform_5, window_bounds = array<i64: 64, 64>}, {pipeline_mode = #tpu.pipeline_mode<synchronous>, transform_indices = @transform_6, window_bounds = array<i64: 1, 64>}, {pipeline_mode = #tpu.pipeline_mode<synchronous>, transform_indices = @transform_7, window_bounds = array<i64: 64, 64>}, {pipeline_mode = #tpu.pipeline_mode<synchronous>, transform_indices = @transform_8, window_bounds = array<i64: 1, 64>}, {pipeline_mode = #tpu.pipeline_mode<synchronous>, transform_indices = @transform_9, window_bounds = array<i64: 64, 64>}, {pipeline_mode = #tpu.pipeline_mode<synchronous>, transform_indices = @transform_10, window_bounds = array<i64: 1, 64>}, {pipeline_mode = #tpu.pipeline_mode<synchronous>, transform_indices = @transform_11, window_bounds = array<i64: 1, 64>}, {pipeline_mode = #tpu.pipeline_mode<synchronous>, transform_indices = @transform_12, window_bounds = array<i64: 1, 64>}, {pipeline_mode = #tpu.pipeline_mode<synchronous>, transform_indices = @transform_13, window_bounds = array<i64: 64, 128>}, {pipeline_mode = #tpu.pipeline_mode<synchronous>, transform_indices = @transform_14, window_bounds = array<i64: 1, 128>}, {pipeline_mode = #tpu.pipeline_mode<synchronous>, transform_indices = @transform_15, window_bounds = array<i64: 128, 64>}, {pipeline_mode = #tpu.pipeline_mode<synchronous>, transform_indices = @transform_16, window_bounds = array<i64: 1, 64>}, {pipeline_mode = #tpu.pipeline_mode<synchronous>, transform_indices = @transform_17, window_bounds = array<i64: 1, 64>}, {pipeline_mode = #tpu.pipeline_mode<synchronous>, transform_indices = @transform_18, window_bounds = array<i64: 1, 64>}, {pipeline_mode = #tpu.pipeline_mode<synchronous>, transform_indices = @transform_19, window_bounds = array<i64: 64, 128>}, {pipeline_mode = #tpu.pipeline_mode<synchronous>, transform_indices = @transform_20, window_bounds = array<i64: 1, 128>}, {transform_indices = @transform_21, window_bounds = array<i64: 8, 128>}]} {
    %c0 = arith.constant 0 : index
    %c0_0 = arith.constant 0 : index
    %c0_1 = arith.constant 0 : index
    %0 = vector.load %arg1[%c0, %c0_0, %c0_1] : memref<8x16x7xf32, #tpu.memory_space<vmem>>, vector<8x16x7xf32>
    %1 = vector.shape_cast %0 : vector<8x16x7xf32> to vector<128x7xf32>
    %c0_2 = arith.constant 0 : index
    %c0_3 = arith.constant 0 : index
    %2 = vector.load %arg2[%c0_2, %c0_3] : memref<7x64xf32, #tpu.memory_space<vmem>>, vector<7x64xf32>
    %cst = arith.constant dense<0.000000e+00> : vector<128x64xf32>
    %3 = tpu.matmul %1, %2, %cst {dimension_numbers = #tpu.dot_dimension_numbers<[1], [0], [0], [1], [0, 0, 1, 1], [], []>} : vector<128x7xf32>, vector<7x64xf32>, vector<128x64xf32> -> vector<128x64xf32>
    %c0_4 = arith.constant 0 : index
    %c0_5 = arith.constant 0 : index
    %4 = vector.load %arg3[%c0_4, %c0_5] : memref<1x64xf32, #tpu.memory_space<vmem>>, vector<1x64xf32>
    %5 = vector.broadcast %4 : vector<1x64xf32> to vector<128x64xf32>
    %6 = arith.addf %3, %5 : vector<128x64xf32>
    %c0_6 = arith.constant 0 : index
    %c0_7 = arith.constant 0 : index
    %7 = vector.load %arg4[%c0_6, %c0_7] : memref<64x64xf32, #tpu.memory_space<vmem>>, vector<64x64xf32>
    %cst_8 = arith.constant dense<0.000000e+00> : vector<128x64xf32>
    %8 = tpu.matmul %6, %7, %cst_8 {dimension_numbers = #tpu.dot_dimension_numbers<[1], [0], [0], [1], [0, 0, 1, 1], [], []>} : vector<128x64xf32>, vector<64x64xf32>, vector<128x64xf32> -> vector<128x64xf32>
    %c0_9 = arith.constant 0 : index
    %c0_10 = arith.constant 0 : index
    %9 = vector.load %arg5[%c0_9, %c0_10] : memref<1x64xf32, #tpu.memory_space<vmem>>, vector<1x64xf32>
    %10 = vector.broadcast %9 : vector<1x64xf32> to vector<128x64xf32>
    %11 = arith.addf %8, %10 : vector<128x64xf32>
    %c0_11 = arith.constant 0 : index
    %c0_12 = arith.constant 0 : index
    %12 = vector.load %arg6[%c0_11, %c0_12] : memref<64x64xf32, #tpu.memory_space<vmem>>, vector<64x64xf32>
    %cst_13 = arith.constant dense<0.000000e+00> : vector<128x64xf32>
    %13 = tpu.matmul %6, %12, %cst_13 {dimension_numbers = #tpu.dot_dimension_numbers<[1], [0], [0], [1], [0, 0, 1, 1], [], []>} : vector<128x64xf32>, vector<64x64xf32>, vector<128x64xf32> -> vector<128x64xf32>
    %c0_14 = arith.constant 0 : index
    %c0_15 = arith.constant 0 : index
    %14 = vector.load %arg7[%c0_14, %c0_15] : memref<1x64xf32, #tpu.memory_space<vmem>>, vector<1x64xf32>
    %15 = vector.broadcast %14 : vector<1x64xf32> to vector<128x64xf32>
    %16 = arith.addf %13, %15 : vector<128x64xf32>
    %c0_16 = arith.constant 0 : index
    %c0_17 = arith.constant 0 : index
    %17 = vector.load %arg8[%c0_16, %c0_17] : memref<64x64xf32, #tpu.memory_space<vmem>>, vector<64x64xf32>
    %cst_18 = arith.constant dense<0.000000e+00> : vector<128x64xf32>
    %18 = tpu.matmul %6, %17, %cst_18 {dimension_numbers = #tpu.dot_dimension_numbers<[1], [0], [0], [1], [0, 0, 1, 1], [], []>} : vector<128x64xf32>, vector<64x64xf32>, vector<128x64xf32> -> vector<128x64xf32>
    %c0_19 = arith.constant 0 : index
    %c0_20 = arith.constant 0 : index
    %19 = vector.load %arg9[%c0_19, %c0_20] : memref<1x64xf32, #tpu.memory_space<vmem>>, vector<1x64xf32>
    %20 = vector.broadcast %19 : vector<1x64xf32> to vector<128x64xf32>
    %21 = arith.addf %18, %20 : vector<128x64xf32>
    %22 = vector.extract_strided_slice %11 {offsets = [0, 0], sizes = [128, 16], strides = [1, 1]} : vector<128x64xf32> to vector<128x16xf32>
    %23 = vector.extract_strided_slice %11 {offsets = [0, 16], sizes = [128, 16], strides = [1, 1]} : vector<128x64xf32> to vector<128x16xf32>
    %24 = vector.extract_strided_slice %11 {offsets = [0, 32], sizes = [128, 16], strides = [1, 1]} : vector<128x64xf32> to vector<128x16xf32>
    %25 = vector.extract_strided_slice %11 {offsets = [0, 48], sizes = [128, 16], strides = [1, 1]} : vector<128x64xf32> to vector<128x16xf32>
    %26 = tpu.concatenate %22, %23, %24, %25 in 0 : vector<128x16xf32>, vector<128x16xf32>, vector<128x16xf32>, vector<128x16xf32> -> vector<512x16xf32>
    %27 = vector.shape_cast %26 : vector<512x16xf32> to vector<32x16x16xf32>
    %28 = vector.extract_strided_slice %16 {offsets = [0, 0], sizes = [128, 16], strides = [1, 1]} : vector<128x64xf32> to vector<128x16xf32>
    %29 = vector.extract_strided_slice %16 {offsets = [0, 16], sizes = [128, 16], strides = [1, 1]} : vector<128x64xf32> to vector<128x16xf32>
    %30 = vector.extract_strided_slice %16 {offsets = [0, 32], sizes = [128, 16], strides = [1, 1]} : vector<128x64xf32> to vector<128x16xf32>
    %31 = vector.extract_strided_slice %16 {offsets = [0, 48], sizes = [128, 16], strides = [1, 1]} : vector<128x64xf32> to vector<128x16xf32>
    %32 = tpu.concatenate %28, %29, %30, %31 in 0 : vector<128x16xf32>, vector<128x16xf32>, vector<128x16xf32>, vector<128x16xf32> -> vector<512x16xf32>
    %33 = vector.shape_cast %32 : vector<512x16xf32> to vector<32x16x16xf32>
    %34 = vector.extract_strided_slice %21 {offsets = [0, 0], sizes = [128, 16], strides = [1, 1]} : vector<128x64xf32> to vector<128x16xf32>
    %35 = vector.extract_strided_slice %21 {offsets = [0, 16], sizes = [128, 16], strides = [1, 1]} : vector<128x64xf32> to vector<128x16xf32>
    %36 = vector.extract_strided_slice %21 {offsets = [0, 32], sizes = [128, 16], strides = [1, 1]} : vector<128x64xf32> to vector<128x16xf32>
    %37 = vector.extract_strided_slice %21 {offsets = [0, 48], sizes = [128, 16], strides = [1, 1]} : vector<128x64xf32> to vector<128x16xf32>
    %38 = tpu.concatenate %34, %35, %36, %37 in 0 : vector<128x16xf32>, vector<128x16xf32>, vector<128x16xf32>, vector<128x16xf32> -> vector<512x16xf32>
    %39 = vector.shape_cast %38 : vector<512x16xf32> to vector<32x16x16xf32>
    "tpu.trace_start"() <{level = 10 : i32, message = "bqd,bkd->bqk"}> : () -> ()
    %cst_21 = arith.constant dense<0.000000e+00> : vector<32x16x16xf32>
    %40 = tpu.matmul %27, %33, %cst_21 {dimension_numbers = #tpu.dot_dimension_numbers<[2], [2], [1], [1], [0, 0, 0, 1, 1, 1], [0], [0]>} : vector<32x16x16xf32>, vector<32x16x16xf32>, vector<32x16x16xf32> -> vector<32x16x16xf32>
    "tpu.trace_stop"() : () -> ()
    %cst_22 = arith.constant 2.500000e-01 : f32
    %41 = vector.broadcast %cst_22 : f32 to vector<32x16x16xf32>
    %42 = arith.mulf %40, %41 : vector<32x16x16xf32>
    %cst_23 = arith.constant dense<0xFF800000> : vector<32x16xf32>
    %43 = vector.multi_reduction <maximumf>, %42, %cst_23 [2] : vector<32x16x16xf32> to vector<32x16xf32>
    %44 = vector.shape_cast %43 : vector<32x16xf32> to vector<32x16x1xf32>
    %45 = vector.broadcast %44 : vector<32x16x1xf32> to vector<32x16x16xf32>
    %46 = arith.subf %42, %45 : vector<32x16x16xf32>
    %47 = math.exp %46 : vector<32x16x16xf32>
    %cst_24 = arith.constant dense<0.000000e+00> : vector<32x16xf32>
    %48 = vector.multi_reduction <add>, %47, %cst_24 [2] : vector<32x16x16xf32> to vector<32x16xf32>
    %49 = vector.shape_cast %48 : vector<32x16xf32> to vector<32x16x1xf32>
    %50 = tpu.reciprocal %49 {approx = true} : vector<32x16x1xf32> -> vector<32x16x1xf32>
    %51 = vector.broadcast %50 : vector<32x16x1xf32> to vector<32x16x16xf32>
    %52 = arith.mulf %47, %51 : vector<32x16x16xf32>
    "tpu.trace_start"() <{level = 10 : i32, message = "bqk,bkd->bqd"}> : () -> ()
    %cst_25 = arith.constant dense<0.000000e+00> : vector<32x16x16xf32>
    %53 = tpu.matmul %52, %39, %cst_25 {dimension_numbers = #tpu.dot_dimension_numbers<[2], [1], [1], [2], [0, 0, 0, 1, 1, 2], [0], [0]>} : vector<32x16x16xf32>, vector<32x16x16xf32>, vector<32x16x16xf32> -> vector<32x16x16xf32>
    "tpu.trace_stop"() : () -> ()
    %54 = vector.shape_cast %53 : vector<32x16x16xf32> to vector<512x16xf32>
    %55 = vector.extract_strided_slice %54 {offsets = [0, 0], sizes = [128, 16], strides = [1, 1]} : vector<512x16xf32> to vector<128x16xf32>
    %56 = vector.extract_strided_slice %54 {offsets = [128, 0], sizes = [128, 16], strides = [1, 1]} : vector<512x16xf32> to vector<128x16xf32>
    %57 = vector.extract_strided_slice %54 {offsets = [256, 0], sizes = [128, 16], strides = [1, 1]} : vector<512x16xf32> to vector<128x16xf32>
    %58 = vector.extract_strided_slice %54 {offsets = [384, 0], sizes = [128, 16], strides = [1, 1]} : vector<512x16xf32> to vector<128x16xf32>
    %59 = tpu.concatenate %55, %56, %57, %58 in 1 : vector<128x16xf32>, vector<128x16xf32>, vector<128x16xf32>, vector<128x16xf32> -> vector<128x64xf32>
    %c0_26 = arith.constant 0 : index
    %c0_27 = arith.constant 0 : index
    %60 = vector.load %arg10[%c0_26, %c0_27] : memref<64x64xf32, #tpu.memory_space<vmem>>, vector<64x64xf32>
    %cst_28 = arith.constant dense<0.000000e+00> : vector<128x64xf32>
    %61 = tpu.matmul %59, %60, %cst_28 {dimension_numbers = #tpu.dot_dimension_numbers<[1], [0], [0], [1], [0, 0, 1, 1], [], []>} : vector<128x64xf32>, vector<64x64xf32>, vector<128x64xf32> -> vector<128x64xf32>
    %c0_29 = arith.constant 0 : index
    %c0_30 = arith.constant 0 : index
    %62 = vector.load %arg11[%c0_29, %c0_30] : memref<1x64xf32, #tpu.memory_space<vmem>>, vector<1x64xf32>
    %63 = vector.broadcast %62 : vector<1x64xf32> to vector<128x64xf32>
    %64 = arith.addf %61, %63 : vector<128x64xf32>
    %65 = arith.addf %6, %64 : vector<128x64xf32>
    %c0_31 = arith.constant 0 : index
    %c0_32 = arith.constant 0 : index
    %66 = vector.load %arg12[%c0_31, %c0_32] : memref<1x64xf32, #tpu.memory_space<vmem>>, vector<1x64xf32>
    %c0_33 = arith.constant 0 : index
    %c0_34 = arith.constant 0 : index
    %67 = vector.load %arg13[%c0_33, %c0_34] : memref<1x64xf32, #tpu.memory_space<vmem>>, vector<1x64xf32>
    %cst_35 = arith.constant dense<0.000000e+00> : vector<128xf32>
    %68 = vector.multi_reduction <add>, %65, %cst_35 [1] : vector<128x64xf32> to vector<128xf32>
    %69 = vector.shape_cast %68 : vector<128xf32> to vector<128x1xf32>
    %cst_36 = arith.constant 6.400000e+01 : f32
    %70 = vector.broadcast %cst_36 : f32 to vector<128x1xf32>
    %71 = arith.divf %69, %70 : vector<128x1xf32>
    %72 = vector.broadcast %71 : vector<128x1xf32> to vector<128x64xf32>
    %73 = arith.subf %65, %72 : vector<128x64xf32>
    %74 = arith.mulf %73, %73 : vector<128x64xf32>
    %cst_37 = arith.constant dense<0.000000e+00> : vector<128xf32>
    %75 = vector.multi_reduction <add>, %74, %cst_37 [1] : vector<128x64xf32> to vector<128xf32>
    %76 = vector.shape_cast %75 : vector<128xf32> to vector<128x1xf32>
    %cst_38 = arith.constant 6.400000e+01 : f32
    %77 = vector.broadcast %cst_38 : f32 to vector<128x1xf32>
    %78 = arith.divf %76, %77 : vector<128x1xf32>
    %79 = vector.broadcast %71 : vector<128x1xf32> to vector<128x64xf32>
    %80 = arith.subf %65, %79 : vector<128x64xf32>
    %cst_39 = arith.constant 9.99999974E-6 : f32
    %81 = vector.broadcast %cst_39 : f32 to vector<128x1xf32>
    %82 = arith.addf %78, %81 : vector<128x1xf32>
    %83 = math.rsqrt %82 : vector<128x1xf32>
    %84 = vector.broadcast %83 : vector<128x1xf32> to vector<128x64xf32>
    %85 = arith.mulf %80, %84 : vector<128x64xf32>
    %86 = vector.broadcast %66 : vector<1x64xf32> to vector<128x64xf32>
    %87 = arith.mulf %85, %86 : vector<128x64xf32>
    %88 = vector.broadcast %67 : vector<1x64xf32> to vector<128x64xf32>
    %89 = arith.addf %87, %88 : vector<128x64xf32>
    %c0_40 = arith.constant 0 : index
    %c0_41 = arith.constant 0 : index
    %90 = vector.load %arg14[%c0_40, %c0_41] : memref<64x128xf32, #tpu.memory_space<vmem>>, vector<64x128xf32>
    %cst_42 = arith.constant dense<0.000000e+00> : vector<128x128xf32>
    %91 = tpu.matmul %89, %90, %cst_42 {dimension_numbers = #tpu.dot_dimension_numbers<[1], [0], [0], [1], [0, 0, 1, 1], [], []>} : vector<128x64xf32>, vector<64x128xf32>, vector<128x128xf32> -> vector<128x128xf32>
    %c0_43 = arith.constant 0 : index
    %c0_44 = arith.constant 0 : index
    %92 = vector.load %arg15[%c0_43, %c0_44] : memref<1x128xf32, #tpu.memory_space<vmem>>, vector<1x128xf32>
    %93 = vector.broadcast %92 : vector<1x128xf32> to vector<128x128xf32>
    %94 = arith.addf %91, %93 : vector<128x128xf32>
    %cst_45 = arith.constant 0.000000e+00 : f32
    %95 = vector.broadcast %cst_45 : f32 to vector<128x128xf32>
    %96 = arith.maximumf %94, %95 : vector<128x128xf32>
    %c0_46 = arith.constant 0 : index
    %c0_47 = arith.constant 0 : index
    %97 = vector.load %arg16[%c0_46, %c0_47] : memref<128x64xf32, #tpu.memory_space<vmem>>, vector<128x64xf32>
    %cst_48 = arith.constant dense<0.000000e+00> : vector<128x64xf32>
    %98 = tpu.matmul %96, %97, %cst_48 {dimension_numbers = #tpu.dot_dimension_numbers<[1], [0], [0], [1], [0, 0, 1, 1], [], []>} : vector<128x128xf32>, vector<128x64xf32>, vector<128x64xf32> -> vector<128x64xf32>
    %c0_49 = arith.constant 0 : index
    %c0_50 = arith.constant 0 : index
    %99 = vector.load %arg17[%c0_49, %c0_50] : memref<1x64xf32, #tpu.memory_space<vmem>>, vector<1x64xf32>
    %100 = vector.broadcast %99 : vector<1x64xf32> to vector<128x64xf32>
    %101 = arith.addf %98, %100 : vector<128x64xf32>
    %102 = arith.addf %89, %101 : vector<128x64xf32>
    %c0_51 = arith.constant 0 : index
    %c0_52 = arith.constant 0 : index
    %103 = vector.load %arg18[%c0_51, %c0_52] : memref<1x64xf32, #tpu.memory_space<vmem>>, vector<1x64xf32>
    %c0_53 = arith.constant 0 : index
    %c0_54 = arith.constant 0 : index
    %104 = vector.load %arg19[%c0_53, %c0_54] : memref<1x64xf32, #tpu.memory_space<vmem>>, vector<1x64xf32>
    %cst_55 = arith.constant dense<0.000000e+00> : vector<128xf32>
    %105 = vector.multi_reduction <add>, %102, %cst_55 [1] : vector<128x64xf32> to vector<128xf32>
    %106 = vector.shape_cast %105 : vector<128xf32> to vector<128x1xf32>
    %cst_56 = arith.constant 6.400000e+01 : f32
    %107 = vector.broadcast %cst_56 : f32 to vector<128x1xf32>
    %108 = arith.divf %106, %107 : vector<128x1xf32>
    %109 = vector.broadcast %108 : vector<128x1xf32> to vector<128x64xf32>
    %110 = arith.subf %102, %109 : vector<128x64xf32>
    %111 = arith.mulf %110, %110 : vector<128x64xf32>
    %cst_57 = arith.constant dense<0.000000e+00> : vector<128xf32>
    %112 = vector.multi_reduction <add>, %111, %cst_57 [1] : vector<128x64xf32> to vector<128xf32>
    %113 = vector.shape_cast %112 : vector<128xf32> to vector<128x1xf32>
    %cst_58 = arith.constant 6.400000e+01 : f32
    %114 = vector.broadcast %cst_58 : f32 to vector<128x1xf32>
    %115 = arith.divf %113, %114 : vector<128x1xf32>
    %116 = vector.broadcast %108 : vector<128x1xf32> to vector<128x64xf32>
    %117 = arith.subf %102, %116 : vector<128x64xf32>
    %cst_59 = arith.constant 9.99999974E-6 : f32
    %118 = vector.broadcast %cst_59 : f32 to vector<128x1xf32>
    %119 = arith.addf %115, %118 : vector<128x1xf32>
    %120 = math.rsqrt %119 : vector<128x1xf32>
    %121 = vector.broadcast %120 : vector<128x1xf32> to vector<128x64xf32>
    %122 = arith.mulf %117, %121 : vector<128x64xf32>
    %123 = vector.broadcast %103 : vector<1x64xf32> to vector<128x64xf32>
    %124 = arith.mulf %122, %123 : vector<128x64xf32>
    %125 = vector.broadcast %104 : vector<1x64xf32> to vector<128x64xf32>
    %126 = arith.addf %124, %125 : vector<128x64xf32>
    %127 = vector.shape_cast %126 : vector<128x64xf32> to vector<8x16x64xf32>
    %cst_60 = arith.constant dense<0.000000e+00> : vector<8x64xf32>
    %128 = vector.multi_reduction <add>, %127, %cst_60 [1] : vector<8x16x64xf32> to vector<8x64xf32>
    %cst_61 = arith.constant 1.600000e+01 : f32
    %129 = vector.broadcast %cst_61 : f32 to vector<8x64xf32>
    %130 = arith.divf %128, %129 : vector<8x64xf32>
    %c0_62 = arith.constant 0 : index
    %c0_63 = arith.constant 0 : index
    %131 = vector.load %arg20[%c0_62, %c0_63] : memref<64x128xf32, #tpu.memory_space<vmem>>, vector<64x128xf32>
    %cst_64 = arith.constant dense<0.000000e+00> : vector<8x128xf32>
    %132 = tpu.matmul %130, %131, %cst_64 {dimension_numbers = #tpu.dot_dimension_numbers<[1], [0], [0], [1], [0, 0, 1, 1], [], []>} : vector<8x64xf32>, vector<64x128xf32>, vector<8x128xf32> -> vector<8x128xf32>
    %c0_65 = arith.constant 0 : index
    %c0_66 = arith.constant 0 : index
    %133 = vector.load %arg21[%c0_65, %c0_66] : memref<1x128xf32, #tpu.memory_space<vmem>>, vector<1x128xf32>
    %134 = vector.broadcast %133 : vector<1x128xf32> to vector<8x128xf32>
    %135 = arith.addf %132, %134 : vector<8x128xf32>
    %c0_67 = arith.constant 0 : index
    %c0_68 = arith.constant 0 : index
    %136 = vector.load %arg22[%c0_67, %c0_68] : memref<8x128xf32, #tpu.memory_space<vmem>>, vector<8x128xf32>
    tpu.vector_store %arg22[%c0_67, %c0_68], %135 {strides = array<i32>} : memref<8x128xf32, #tpu.memory_space<vmem>>, vector<8x128xf32>,
    return
  }
  func.func @transform_0(%arg0: i32) -> (i32, i32, i32) {
    %c0_i32 = arith.constant 0 : i32
    %c0_i32_0 = arith.constant 0 : i32
    %c0_i32_1 = arith.constant 0 : i32
    return %arg0, %c0_i32, %c0_i32_0 : i32, i32, i32
  }
  func.func @transform_1(%arg0: i32) -> (i32, i32) {
    %c0_i32 = arith.constant 0 : i32
    %c0_i32_0 = arith.constant 0 : i32
    %c0_i32_1 = arith.constant 0 : i32
    return %c0_i32, %c0_i32_0 : i32, i32
  }
  func.func @transform_2(%arg0: i32) -> (i32, i32) {
    %c0_i32 = arith.constant 0 : i32
    %c0_i32_0 = arith.constant 0 : i32
    %c0_i32_1 = arith.constant 0 : i32
    return %c0_i32, %c0_i32_0 : i32, i32
  }
  func.func @transform_3(%arg0: i32) -> (i32, i32) {
    %c0_i32 = arith.constant 0 : i32
    %c0_i32_0 = arith.constant 0 : i32
    %c0_i32_1 = arith.constant 0 : i32
    return %c0_i32, %c0_i32_0 : i32, i32
  }
  func.func @transform_4(%arg0: i32) -> (i32, i32) {
    %c0_i32 = arith.constant 0 : i32
    %c0_i32_0 = arith.constant 0 : i32
    %c0_i32_1 = arith.constant 0 : i32
    return %c0_i32, %c0_i32_0 : i32, i32
  }
  func.func @transform_5(%arg0: i32) -> (i32, i32) {
    %c0_i32 = arith.constant 0 : i32
    %c0_i32_0 = arith.constant 0 : i32
    %c0_i32_1 = arith.constant 0 : i32
    return %c0_i32, %c0_i32_0 : i32, i32
  }
  func.func @transform_6(%arg0: i32) -> (i32, i32) {
    %c0_i32 = arith.constant 0 : i32
    %c0_i32_0 = arith.constant 0 : i32
    %c0_i32_1 = arith.constant 0 : i32
    return %c0_i32, %c0_i32_0 : i32, i32
  }
  func.func @transform_7(%arg0: i32) -> (i32, i32) {
    %c0_i32 = arith.constant 0 : i32
    %c0_i32_0 = arith.constant 0 : i32
    %c0_i32_1 = arith.constant 0 : i32
    return %c0_i32, %c0_i32_0 : i32, i32
  }
  func.func @transform_8(%arg0: i32) -> (i32, i32) {
    %c0_i32 = arith.constant 0 : i32
    %c0_i32_0 = arith.constant 0 : i32
    %c0_i32_1 = arith.constant 0 : i32
    return %c0_i32, %c0_i32_0 : i32, i32
  }
  func.func @transform_9(%arg0: i32) -> (i32, i32) {
    %c0_i32 = arith.constant 0 : i32
    %c0_i32_0 = arith.constant 0 : i32
    %c0_i32_1 = arith.constant 0 : i32
    return %c0_i32, %c0_i32_0 : i32, i32
  }
  func.func @transform_10(%arg0: i32) -> (i32, i32) {
    %c0_i32 = arith.constant 0 : i32
    %c0_i32_0 = arith.constant 0 : i32
    %c0_i32_1 = arith.constant 0 : i32
    return %c0_i32, %c0_i32_0 : i32, i32
  }
  func.func @transform_11(%arg0: i32) -> (i32, i32) {
    %c0_i32 = arith.constant 0 : i32
    %c0_i32_0 = arith.constant 0 : i32
    %c0_i32_1 = arith.constant 0 : i32
    return %c0_i32, %c0_i32_0 : i32, i32
  }
  func.func @transform_12(%arg0: i32) -> (i32, i32) {
    %c0_i32 = arith.constant 0 : i32
    %c0_i32_0 = arith.constant 0 : i32
    %c0_i32_1 = arith.constant 0 : i32
    return %c0_i32, %c0_i32_0 : i32, i32
  }
  func.func @transform_13(%arg0: i32) -> (i32, i32) {
    %c0_i32 = arith.constant 0 : i32
    %c0_i32_0 = arith.constant 0 : i32
    %c0_i32_1 = arith.constant 0 : i32
    return %c0_i32, %c0_i32_0 : i32, i32
  }
  func.func @transform_14(%arg0: i32) -> (i32, i32) {
    %c0_i32 = arith.constant 0 : i32
    %c0_i32_0 = arith.constant 0 : i32
    %c0_i32_1 = arith.constant 0 : i32
    return %c0_i32, %c0_i32_0 : i32, i32
  }
  func.func @transform_15(%arg0: i32) -> (i32, i32) {
    %c0_i32 = arith.constant 0 : i32
    %c0_i32_0 = arith.constant 0 : i32
    %c0_i32_1 = arith.constant 0 : i32
    return %c0_i32, %c0_i32_0 : i32, i32
  }
  func.func @transform_16(%arg0: i32) -> (i32, i32) {
    %c0_i32 = arith.constant 0 : i32
    %c0_i32_0 = arith.constant 0 : i32
    %c0_i32_1 = arith.constant 0 : i32
    return %c0_i32, %c0_i32_0 : i32, i32
  }
  func.func @transform_17(%arg0: i32) -> (i32, i32) {
    %c0_i32 = arith.constant 0 : i32
    %c0_i32_0 = arith.constant 0 : i32
    %c0_i32_1 = arith.constant 0 : i32
    return %c0_i32, %c0_i32_0 : i32, i32
  }
  func.func @transform_18(%arg0: i32) -> (i32, i32) {
    %c0_i32 = arith.constant 0 : i32
    %c0_i32_0 = arith.constant 0 : i32
    %c0_i32_1 = arith.constant 0 : i32
    return %c0_i32, %c0_i32_0 : i32, i32
  }
  func.func @transform_19(%arg0: i32) -> (i32, i32) {
    %c0_i32 = arith.constant 0 : i32
    %c0_i32_0 = arith.constant 0 : i32
    %c0_i32_1 = arith.constant 0 : i32
    return %c0_i32, %c0_i32_0 : i32, i32
  }
  func.func @transform_20(%arg0: i32) -> (i32, i32) {
    %c0_i32 = arith.constant 0 : i32
    %c0_i32_0 = arith.constant 0 : i32
    %c0_i32_1 = arith.constant 0 : i32
    return %c0_i32, %c0_i32_0 : i32, i32
  }
  func.func @transform_21(%arg0: i32) -> (i32, i32) {
    %c0_i32 = arith.constant 0 : i32
    %c0_i32_0 = arith.constant 0 : i32
    return %arg0, %c0_i32 : i32, i32
  }
}

</mosaic_0001>

<bundles_post_ra>
// kernel: tpu_custom_call.1
= control target key start
LH: loop header
LB: loop body
LE: loop exit
PB: predicated region body
PF: predicated region fallthrough
CT: control target
= control target key end

     0   :  { %s14911_s0 = inlined_call_operand.vmem [shape: f32[16,16,7], index: 0, kind: input, shape index: {}]   ;;  %s14912_s1 = inlined_call_operand.vmem [shape: f32[7,64], index: 1, kind: input, shape index: {}]   ;;  %s14913_s2 = inlined_call_operand.vmem [shape: f32[1,64], index: 2, kind: input, shape index: {}]   ;;  %s14914_s3 = inlined_call_operand.vmem [shape: f32[64,64], index: 3, kind: input, shape index: {}]   ;;  %s14915_s4 = inlined_call_operand.vmem [shape: f32[1,64], index: 4, kind: input, shape index: {}]   ;;  %s14916_s5 = inlined_call_operand.vmem [shape: f32[64,64], index: 5, kind: input, shape index: {}]   ;;  %s14917_s6 = inlined_call_operand.vmem [shape: f32[1,64], index: 6, kind: input, shape index: {}]   ;;  %s14918_s7 = inlined_call_operand.vmem [shape: f32[64,64], index: 7, kind: input, shape index: {}]   ;;  %s14919_s8 = inlined_call_operand.vmem [shape: f32[1,64], index: 8, kind: input, shape index: {}]   ;;  %s14920_s9 = inlined_call_operand.vmem [shape: f32[64,64], index: 9, kind: input, shape index: {}]   ;;  %s14921_s10 = inlined_call_operand.vmem [shape: f32[1,64], index: 10, kind: input, shape index: {}]   ;;  %s14922_s11 = inlined_call_operand.vmem [shape: f32[1,64], index: 11, kind: input, shape index: {}]   ;;  %s14923_s12 = inlined_call_operand.vmem [shape: f32[1,64], index: 12, kind: input, shape index: {}]   ;;  %s14924_s13 = inlined_call_operand.vmem [shape: f32[64,128], index: 13, kind: input, shape index: {}]   ;;  %s14925_s14 = inlined_call_operand.vmem [shape: f32[1,128], index: 14, kind: input, shape index: {}]   ;;  %s14926_s15 = inlined_call_operand.vmem [shape: f32[128,64], index: 15, kind: input, shape index: {}]   ;;  %s14927_s16 = inlined_call_operand.vmem [shape: f32[1,64], index: 16, kind: input, shape index: {}]   ;;  %s14928_s17 = inlined_call_operand.vmem [shape: f32[1,64], index: 17, kind: input, shape index: {}]   ;;  %s14929_s18 = inlined_call_operand.vmem [shape: f32[1,64], index: 18, kind: input, shape index: {}]   ;;  %s14930_s19 = inlined_call_operand.vmem [shape: f32[64,128], index: 19, kind: input, shape index: {}]   ;;  %s14931_s20 = inlined_call_operand.vmem [shape: f32[1,128], index: 20, kind: input, shape index: {}]   ;;  %s14932_s21 = inlined_call_operand.hbm [shape: f32[16,128], index: 21, kind: output, shape index: {}]  }
   0x1   :  { %15003 = sst [smem:[#allocation70_spill]] %s14911_s0 }
   0x2   :  { %15004 = sst [smem:[#allocation71_spill]] %s14912_s1 }
   0x3   :  { %15005 = sst [smem:[#allocation72_spill]] %s14913_s2 }
   0x4   :  { %15006 = sst [smem:[#allocation73_spill]] %s14914_s3 }
   0x5   :  { %15007 = sst [smem:[#allocation74_spill]] %s14915_s4 }
   0x6   :  { %15008 = sst [smem:[#allocation75_spill]] %s14916_s5 }
   0x7   :  { %15009 = sst [smem:[#allocation76_spill]] %s14917_s6 }
   0x8   :  { %15010 = sst [smem:[#allocation77_spill]] %s14931_s20 }
   0x9   :  { %15011 = sst [smem:[#allocation78_spill]] %s14932_s21 }
   0xa   :  { %26 = vsyncpa [#allocation3], 0 }
   0xb   :  { %28 = vsyncpa [#allocation3 + $0x1], 0  ;;  %s12201_s2 = smov 0   ;;  %s12203_s25 = smov 0  }
   0xc   :  { %s12205_s26 = smov 0   ;;  %s12207_s27 = smov 0  }
   0xd LB: > { %15012 = sst [smem:[#allocation5_spill]] %s12067_s2  ;;  %s12222_s3 = sadd.s32 4294967295, %s12079_s27   ;;  %s12079_s27 = sphi %s12207_s27, %s15157_s27   ;;  %s12075_s26 = sphi %s12205_s26, %s15159_s26   ;;  %s12071_s25 = sphi %s12203_s25, %s15161_s25   ;;  %s12067_s2 = sphi %s12201_s2, %s15160_s2  }
   0xe   : > { %15013 = sst [smem:[#allocation6_spill]] %s12075_s26  ;;  %s9459_s28 = sadd.s32 4294967294, %s12079_s27  }
   0xf   : > { %15014 = sst [smem:[#allocation7_spill]] %s12079_s27  ;;  %s12226_s29 = sadd.s32 1, %s12079_s27  }
  0x10   : > { %15015 = sst [smem:[#allocation8_spill]] %s12226_s29  ;;  %s487_s0 = sadd.s32 1, %s12075_s26 }
  0x11   : > { %s484_s4 = ssub.s32 %s12079_s27, %s12226_s29  ;;  %p497_p0 = scmp.ne.s32.totalorder %s12075_s26, %s12071_s25 }
  0x12   : > { %p485_p1 = scmp.eq.s32.totalorder %s484_s4, 0  ;;  %p498_p2 = scmp.eq.s32.totalorder %s12222_s3, 1 }
  0x13   : > { %p503_p3 = scmp.ne.s32.totalorder %s12071_s25, %s12067_s2  ;;  %p504_p4 = scmp.eq.s32.totalorder %s9459_s28, 1 }
  0x14   : > { %s12237_s30 = scalar_select %p485_p1, %s12075_s26, %s487_s0  }
  0x15   : > { %p12239_p5 = por %p498_p2, %p497_p0  ;;  %p12243_p6 = por %p504_p4, %p503_p3 }
  0x16   : > { %15016 = sst [smem:[#allocation9_spill]] %s12237_s30  ;;  %p9462_p7 = scmp.ge.s32.totalorder %s12079_s27, 1 }
  0x17   : > { %s15018_s22 = scalar_select %p12243_p6, 1, 0 }
  0x18   : > { %p592_p8 = scmp.lt.s32.totalorder %s12079_s27, 3 }
  0x19   : > { %15019 = sst [smem:[#allocation10_spill]] %s15018_s22 }
  0x1a   : > { %p593_p9 = pnand %p9462_p7, %p592_p8 }
  0x1c   : > { %596 = sbr.rel (%p593_p9) target bundleno = 3159 (0xc57), region = 104 }
  0x23   : > { %s15020_s24 = sld [smem:[#allocation71_spill]]  ;;  %vm733_vm0 = vcmask 1046528   ;;  %s9464_s28 = sshll.u32 %s12222_s3, 3  ;;  %vm684_vm1 = vcmask 56320   ;;  %v1251_v41 = vld [vmem:[%s14918_s7] sm:$0xff]  ;;  %v1252_v42 = vld [vmem:[%s14918_s7 + $0x8] sm:$0xff] }
  0x24   : > { %s15021_s30 = sld [smem:[#allocation75_spill]]  ;;  %p654_p10 = scmp.lt.s32.totalorder %s9464_s28, 15  ;;  %v10989_v43 = vpack.c.bf16 %v1252_v42, %v1251_v41  ;;  %v1253_v46 = vld [vmem:[%s14918_s7 + $0x10] sm:$0xff]  ;;  %v1254_v47 = vld [vmem:[%s14918_s7 + $0x18] sm:$0xff]  ;;  %vm897_vm2 = vcmask 523264   ;;  %v1255_v53 = vld [vmem:[%s14918_s7 + $0x20] sm:$0xff] }
  0x25   : > { %s15022_s27 = sld [smem:[#allocation73_spill]]  ;;  %s15024_s26 = sld [smem:[#allocation70_spill]]  ;;  %v10993_v51 = vpack.c.bf16 %v1254_v47, %v1253_v46  ;;  %v1256_v54 = vld [vmem:[%s14918_s7 + $0x28] sm:$0xff]  ;;  %v1257_v60 = vld [vmem:[%s14918_s7 + $0x30] sm:$0xff]  ;;  %v1258_v61 = vld [vmem:[%s14918_s7 + $0x38] sm:$0xff]  ;;  %vm1795_vm3 = vcmask 130048  }
  0x26   : > { %s15163_s28 = smov (!%p654_p10, %s9464_s28), 15  ;;  %s15025_s1 = sld [smem:[#allocation72_spill]]  ;;  %v10997_v58 = vpack.c.bf16 %v1256_v54, %v1255_v53  ;;  %vm12533_vm4 = vmpackc.low %vm1795_vm3, %vm1795_vm3  ;;  %vm8020_vm5 = vcmask 261120   ;;  %vm8037_vm6 = vcmask 392192   ;;  %vm12088_vm7 = vmmov 0  }
  0x27   : > { %s9773_s22 = sshll.u32 %s15163_s28, 4  ;;  %s15042_s4 = sld [smem:[#allocation74_spill]]  ;;  %vm9299_vm8 = vcmask 1041409   ;;  %vm9301_vm9 = vcmask 1042434   ;;  %vm9303_vm10 = vcmask 1043459   ;;  %vm9305_vm11 = vcmask 1044484  }
  0x28   : > { %s15043_s6 = sld [smem:[#allocation76_spill]]  ;;  %s12082_s2 = smov 96   ;;  %vm9307_vm12 = vcmask 1045509   ;;  %vm9309_vm13 = vcmask 1046534   ;;  %vm9311_vm14 = vcmask 1047559  }
  0x29   : > { %v676_v0 = vld [vmem:[%s15020_s24] sm:$0x7f]  ;;  %s12083_s20 = smov 80   ;;  %s12084_s23 = smov 16  }
  0x2a   : > { %v1091_v1 = vld [vmem:[%s15021_s30] sm:$0xff]  ;;  %10208 = vmatprep.subr.msk.mxu0 %vm733_vm0, %v676_v0  ;;  %v1092_v2 = vld [vmem:[%s15021_s30 + $0x8] sm:$0xff]  ;;  %v1093_v9 = vld [vmem:[%s15021_s30 + $0x10] sm:$0xff]  ;;  %s650_s24 = sand.u32 1, %s12071_s25   ;;  %s15152_s28 = sld [smem:[#allocation77_spill]] }
  0x2b   : > { %10209 = vmatpush3.msk.msra.mxu0 %vm733_vm0, %v676_v0  ;;  %v10973_v3 = vpack.c.bf16 %v1092_v2, %v1091_v1  ;;  %s15023_s21 = smov %s15022_s27  ;;  %v882_v4 = vld [vmem:[%s15022_s27] sm:$0xff]  ;;  %v1094_v10 = vld [vmem:[%s15021_s30 + $0x18] sm:$0xff]  ;;  %s12286_s29 = scalar_lea.vmem %s15024_s26, %s9773_s22  ;;  %v1096_v19 = vld [vmem:[%s15021_s30 + $0x28] sm:$0xff]  ;;  %v11001_v1 = vpack.c.bf16 %v1258_v61, %v1257_v60 }
  0x2c   : > { %v883_v5 = vld [vmem:[%s15023_s21 + $0x8] sm:$0xff]  ;;  %v884_v6 = vld [vmem:[%s15023_s21 + $0x10] sm:$0xff]  ;;  %v885_v8 = vld [vmem:[%s15023_s21 + $0x18] sm:$0xff]  ;;  %v10977_v17 = vpack.c.bf16 %v1094_v10, %v1093_v9  ;;  %s9463_s0 = sshll.u32 %s650_s24, 3 }
  0x2d   : > { %v10957_v7 = vpack.c.bf16 %v883_v5, %v882_v4  ;;  %10974 = vmatprep.subr.bf16.mxu0 %v10973_v3  ;;  %v10961_v11 = vpack.c.bf16 %v885_v8, %v884_v6  ;;  %v886_v12 = vld [vmem:[%s15023_s21 + $0x20] sm:$0xff]  ;;  %v887_v13 = vld [vmem:[%s15023_s21 + $0x28] sm:$0xff]  ;;  %v662_v16 = vld [vmem:[%s12286_s29 + $0x10] sm:$0xff] }
  0x2e   : > { %v660_v14 = vld [vmem:[%s12286_s29] sm:$0xff]  ;;  %v661_v15 = vld [vmem:[%s12286_s29 + $0x8] sm:$0xff]  ;;  %v10965_v20 = vpack.c.bf16 %v887_v13, %v886_v12  ;;  %v663_v21 = vld [vmem:[%s12286_s29 + $0x18] sm:$0xff] }
  0x2f   : > { %10958 = vmatprep.subr.bf16.mxu1 %v10957_v7  ;;  %10210 = vmatprep.mubr.msk.f32.mxu0 %vm684_vm1, %v660_v14  ;;  %v1095_v18 = vld [vmem:[%s15021_s30 + $0x20] sm:$0xff]  ;;  %v665_v24 = vld [vmem:[%s12286_s29 + $0x28] sm:$0xff]  ;;  %v666_v25 = vld [vmem:[%s12286_s29 + $0x30] sm:$0xff] }
  0x30   : > { %10960 = vmatpush3.bf16.msra.mxu1 %v10957_v7  ;;  %10211 = vmatmul.mubr.msk.f32.vlgmr.msra.gmra.mrb[0].mxu0 %vm684_vm1, %v661_v15  ;;  %v664_v22 = vld [vmem:[%s12286_s29 + $0x20] sm:$0xff]  ;;  %v10981_v23 = vpack.c.bf16 %v1096_v19, %v1095_v18  ;;  %v667_v26 = vld [vmem:[%s12286_s29 + $0x38] sm:$0xff]  ;;  %v669_v28 = vld [vmem:[%s12286_s29 + $0x48] sm:$0xff] }
  0x31   : > { %10962 = vmatprep.subr.bf16.mxu1 %v10961_v11  ;;  %10213 = vmatprep.mubr.msk.f32.mxu0 %vm684_vm1, %v662_v16  ;;  %v668_v27 = vld [vmem:[%s12286_s29 + $0x40] sm:$0xff]  ;;  %v670_v29 = vld [vmem:[%s12286_s29 + $0x50] sm:$0xff]  ;;  %v671_v30 = vld [vmem:[%s12286_s29 + $0x58] sm:$0xff] }
  0x32   : > { %10976 = vmatpush3.bf16.msra.mxu0 %v10973_v3  ;;  %v672_v31 = vld [vmem:[%s12286_s29 + $0x60] sm:$0xff]  ;;  %v673_v32 = vld [vmem:[%s12286_s29 + $0x68] sm:$0xff]  ;;  %v674_v33 = vld [vmem:[%s12286_s29 + $0x70] sm:$0xff] }
  0x33   : > { %10978 = vmatprep.subr.bf16.mxu0 %v10977_v17  ;;  %v675_v34 = vld [vmem:[%s12286_s29 + $0x78] sm:$0xff]  ;;  %v888_v35 = vld [vmem:[%s15023_s21 + $0x30] sm:$0xff]  ;;  %v12347_v44 = vld [vmem:[%s15025_s1] ss:$0 sm:$0xff]  ;;  %s12081_s29 = smov 112   ;;  %s12085_s1 = smov 32  }
  0x34   : > { %10964 = vmatpush3.bf16.msra.mxu1 %v10961_v11  ;;  %10214 = vmatmul.mubr.msk.f32.gmra.mrb[2].mxu0 %vm684_vm1, %v663_v21  ;;  %v889_v36 = vld [vmem:[%s15023_s21 + $0x38] sm:$0xff]  ;;  %v1097_v37 = vld [vmem:[%s15021_s30 + $0x30] sm:$0xff] }
  0x35   : > { %10966 = vmatprep.subr.bf16.mxu1 %v10965_v20  ;;  %10216 = vmatprep.mubr.msk.f32.mxu0 %vm684_vm1, %v664_v22  ;;  %v10969_v38 = vpack.c.bf16 %v889_v36, %v888_v35  ;;  %v1098_v39 = vld [vmem:[%s15021_s30 + $0x38] sm:$0xff]  ;;  %v12514_v22 = vld [vmem:[%s15042_s4] ss:$0 sm:$0xff] }
  0x36   : > { %10980 = vmatpush3.bf16.msra.mxu0 %v10977_v17  ;;  %v10985_v40 = vpack.c.bf16 %v1098_v39, %v1097_v37 }
  0x37   : > { %10982 = vmatprep.subr.bf16.mxu0 %v10981_v23 }
  0x38   : > { %10968 = vmatpush3.bf16.msra.mxu1 %v10965_v20  ;;  %10217 = vmatmul.mubr.msk.f32.gmra.mrb[4].mxu0 %vm684_vm1, %v665_v24 }
  0x39   : > { %10219 = vmatprep.mubr.msk.f32.mxu0 %vm684_vm1, %v666_v25  ;;  %10970 = vmatprep.subr.bf16.mxu1 %v10969_v38 }
  0x3a   : > { %10984 = vmatpush3.bf16.msra.mxu0 %v10981_v23  ;;  %v12519_v23 = vld [vmem:[%s15043_s6] ss:$0 sm:$0xff]  ;;  %s9387_s6 = scalar_lea.sflag [#allocation3], %s650_s24 }
  0x3b   : > { %10986 = vmatprep.subr.bf16.mxu0 %v10985_v40 }
  0x3c   : > { %10220 = vmatmul.mubr.msk.f32.gmra.mrb[6].mxu0 %vm684_vm1, %v667_v26  ;;  %10972 = vmatpush3.bf16.msra.mxu1 %v10969_v38 }
  0x3d   : > { %10222 = vmatprep.mubr.msk.f32.mxu0 %vm684_vm1, %v668_v27  ;;  %11401 = vmatprep.subr.bf16.mxu1 %v10989_v43 }
  0x3e   : > { %10988 = vmatpush3.bf16.msra.mxu0 %v10985_v40 }
  0x3f   : > { %10990 = vmatprep.subr.bf16.mxu0 %v10989_v43 }
  0x40   : > { %10223 = vmatmul.mubr.msk.f32.gmra.mrb[8].mxu0 %vm684_vm1, %v669_v28 }
  0x41   : > { %10225 = vmatprep.mubr.msk.f32.mxu0 %vm684_vm1, %v670_v29 }
  0x44   : > { %10226 = vmatmul.mubr.msk.f32.gmra.mrb[10].mxu0 %vm684_vm1, %v671_v30 }
  0x45   : > { %10228 = vmatprep.mubr.msk.f32.mxu0 %vm684_vm1, %v672_v31 }
  0x48   : > { %10229 = vmatmul.mubr.msk.f32.gmra.mrb[12].mxu0 %vm684_vm1, %v673_v32 }
  0x49   : > { %10231 = vmatprep.mubr.msk.f32.mxu0 %vm684_vm1, %v674_v33 }
  0x4c   : > { %10232 = vmatmul.mubr.msk.f32.gmra.mrb[14].mxu0 %vm684_vm1, %v675_v34 }
 0x103   : > { %v10212_v45 = vpop.f32.mrb[0].mxu0 }
 0x104   : > { %v803_v48 = vpop.f32.mrb[1].mxu0  ;;  %v12359_v50 = vadd.f32 %v10212_v45, %v12347_v44 }
 0x105   : > { %v12356_v49 = vadd.f32 %v12347_v44, %v803_v48 }
 0x106   : > { %15027 = vst [vmem:[#allocation12_spill] sm:$0xff] %v12359_v50 }
 0x107   : > { %15026 = vst [vmem:[#allocation11_spill] sm:$0xff] %v12356_v49  ;;  %v10215_v52 = vpop.f32.mrb[2].mxu0  ;;  %10250 = vmatprep.mubr.msk.f32.mxu1 %vm897_vm2, %v12356_v49  ;;  %10290 = vmatprep.mubr.msk.f32.mxu0 %vm897_vm2, %v12356_v49 }
 0x108   : > { %v12372_v55 = vadd.f32 %v10215_v52, %v12347_v44  ;;  %v813_v56 = vpop.f32.mrb[3].mxu0  ;;  %10251 = vmatmul.mubr.msk.f32.vlgmr.msra.gmra.mrb[0].mxu1 %vm897_vm2, %v12359_v50  ;;  %10291 = vmatmul.mubr.msk.f32.vlgmr.msra.gmra.mrb[16].mxu0 %vm897_vm2, %v12359_v50 }
 0x109   : > { %v12379_v57 = vadd.f32 %v12347_v44, %v813_v56  ;;  %10992 = vmatpush3.bf16.msra.mxu0 %v10989_v43  ;;  %11405 = vmatpush3.bf16.msra.mxu1 %v10989_v43 }
 0x10a   : > { %15028 = vst [vmem:[#allocation13_spill] sm:$0xff] %v12372_v55  ;;  %10994 = vmatprep.subr.bf16.mxu0 %v10993_v51  ;;  %11402 = vmatprep.subr.bf16.mxu1 %v10993_v51 }
 0x10b   : > { %15029 = vst [vmem:[#allocation14_spill] sm:$0xff] %v12379_v57  ;;  %v10218_v59 = vpop.f32.mrb[4].mxu0  ;;  %10253 = vmatprep.mubr.msk.f32.mxu1 %vm897_vm2, %v12379_v57  ;;  %10293 = vmatprep.mubr.msk.f32.mxu0 %vm897_vm2, %v12379_v57 }
 0x10c   : > { %v12392_v62 = vadd.f32 %v10218_v59, %v12347_v44  ;;  %v823_v63 = vpop.f32.mrb[5].mxu0  ;;  %10254 = vmatmul.mubr.msk.f32.gmra.mrb[2].mxu1 %vm897_vm2, %v12372_v55  ;;  %10294 = vmatmul.mubr.msk.f32.gmra.mrb[18].mxu0 %vm897_vm2, %v12372_v55 }
 0x10d   : > { %v12399_v0 = vadd.f32 %v12347_v44, %v823_v63  ;;  %10996 = vmatpush3.bf16.msra.mxu0 %v10993_v51  ;;  %11406 = vmatpush3.bf16.msra.mxu1 %v10993_v51 }
 0x10e   : > { %15030 = vst [vmem:[#allocation15_spill] sm:$0xff] %v12392_v62  ;;  %10998 = vmatprep.subr.bf16.mxu0 %v10997_v58  ;;  %11403 = vmatprep.subr.bf16.mxu1 %v10997_v58 }
 0x10f   : > { %15031 = vst [vmem:[#allocation16_spill] sm:$0xff] %v12399_v0  ;;  %v10221_v2 = vpop.f32.mrb[6].mxu0  ;;  %10256 = vmatprep.mubr.msk.f32.mxu1 %vm897_vm2, %v12399_v0  ;;  %10296 = vmatprep.mubr.msk.f32.mxu0 %vm897_vm2, %v12399_v0 }
 0x110   : > { %v12406_v3 = vadd.f32 %v10221_v2, %v12347_v44  ;;  %v833_v4 = vpop.f32.mrb[7].mxu0  ;;  %10257 = vmatmul.mubr.msk.f32.gmra.mrb[4].mxu1 %vm897_vm2, %v12392_v62  ;;  %10297 = vmatmul.mubr.msk.f32.gmra.mrb[20].mxu0 %vm897_vm2, %v12392_v62 }
 0x111   : > { %v12413_v5 = vadd.f32 %v12347_v44, %v833_v4  ;;  %11000 = vmatpush3.bf16.msra.mxu0 %v10997_v58  ;;  %11407 = vmatpush3.bf16.msra.mxu1 %v10997_v58 }
 0x112   : > { %15032 = vst [vmem:[#allocation17_spill] sm:$0xff] %v12406_v3  ;;  %11002 = vmatprep.subr.bf16.mxu0 %v11001_v1  ;;  %11404 = vmatprep.subr.bf16.mxu1 %v11001_v1 }
 0x113   : > { %15033 = vst [vmem:[#allocation18_spill] sm:$0xff] %v12413_v5  ;;  %v10224_v6 = vpop.f32.mrb[8].mxu0  ;;  %10259 = vmatprep.mubr.msk.f32.mxu1 %vm897_vm2, %v12413_v5  ;;  %10299 = vmatprep.mubr.msk.f32.mxu0 %vm897_vm2, %v12413_v5 }
 0x114   : > { %v12420_v7 = vadd.f32 %v10224_v6, %v12347_v44  ;;  %v843_v8 = vpop.f32.mrb[9].mxu0  ;;  %10260 = vmatmul.mubr.msk.f32.gmra.mrb[6].mxu1 %vm897_vm2, %v12406_v3  ;;  %10300 = vmatmul.mubr.msk.f32.gmra.mrb[22].mxu0 %vm897_vm2, %v12406_v3 }
 0x115   : > { %v12427_v9 = vadd.f32 %v12347_v44, %v843_v8  ;;  %11004 = vmatpush3.bf16.msra.mxu0 %v11001_v1  ;;  %11408 = vmatpush3.bf16.msra.mxu1 %v11001_v1 }
 0x116   : > { %15034 = vst [vmem:[#allocation19_spill] sm:$0xff] %v12420_v7 }
 0x117   : > { %15035 = vst [vmem:[#allocation20_spill] sm:$0xff] %v12427_v9  ;;  %v10227_v10 = vpop.f32.mrb[10].mxu0  ;;  %10262 = vmatprep.mubr.msk.f32.mxu1 %vm897_vm2, %v12427_v9  ;;  %10302 = vmatprep.mubr.msk.f32.mxu0 %vm897_vm2, %v12427_v9 }
 0x118   : > { %v12434_v11 = vadd.f32 %v10227_v10, %v12347_v44  ;;  %v853_v12 = vpop.f32.mrb[11].mxu0  ;;  %10263 = vmatmul.mubr.msk.f32.gmra.mrb[8].mxu1 %vm897_vm2, %v12420_v7  ;;  %10303 = vmatmul.mubr.msk.f32.gmra.mrb[24].mxu0 %vm897_vm2, %v12420_v7 }
 0x119   : > { %v12441_v13 = vadd.f32 %v12347_v44, %v853_v12 }
 0x11a   : > { %15036 = vst [vmem:[#allocation21_spill] sm:$0xff] %v12434_v11 }
 0x11b   : > { %15037 = vst [vmem:[#allocation22_spill] sm:$0xff] %v12441_v13  ;;  %v10230_v14 = vpop.f32.mrb[12].mxu0  ;;  %10265 = vmatprep.mubr.msk.f32.mxu1 %vm897_vm2, %v12441_v13  ;;  %10305 = vmatprep.mubr.msk.f32.mxu0 %vm897_vm2, %v12441_v13 }
 0x11c   : > { %v12448_v15 = vadd.f32 %v10230_v14, %v12347_v44  ;;  %v863_v16 = vpop.f32.mrb[13].mxu0  ;;  %10266 = vmatmul.mubr.msk.f32.gmra.mrb[10].mxu1 %vm897_vm2, %v12434_v11  ;;  %10306 = vmatmul.mubr.msk.f32.gmra.mrb[26].mxu0 %vm897_vm2, %v12434_v11 }
 0x11d   : > { %v12455_v17 = vadd.f32 %v12347_v44, %v863_v16 }
 0x11e   : > { %15038 = vst [vmem:[#allocation23_spill] sm:$0xff] %v12448_v15 }
 0x11f   : > { %15039 = vst [vmem:[#allocation24_spill] sm:$0xff] %v12455_v17  ;;  %v10233_v18 = vpop.f32.mrb[14].mxu0  ;;  %10268 = vmatprep.mubr.msk.f32.mxu1 %vm897_vm2, %v12455_v17  ;;  %10308 = vmatprep.mubr.msk.f32.mxu0 %vm897_vm2, %v12455_v17 }
 0x120   : > { %v12462_v19 = vadd.f32 %v10233_v18, %v12347_v44  ;;  %v873_v20 = vpop.f32.mrb[15].mxu0  ;;  %10269 = vmatmul.mubr.msk.f32.gmra.mrb[12].mxu1 %vm897_vm2, %v12448_v15  ;;  %10309 = vmatmul.mubr.msk.f32.gmra.mrb[28].mxu0 %vm897_vm2, %v12448_v15 }
 0x121   : > { %v12469_v21 = vadd.f32 %v12347_v44, %v873_v20 }
 0x122   : > { %15040 = vst [vmem:[#allocation25_spill] sm:$0xff] %v12462_v19 }
 0x123   : > { %15041 = vst [vmem:[#allocation26_spill] sm:$0xff] %v12469_v21  ;;  %10271 = vmatprep.mubr.msk.f32.mxu1 %vm897_vm2, %v12469_v21  ;;  %10311 = vmatprep.mubr.msk.f32.mxu0 %vm897_vm2, %v12469_v21 }
 0x124   : > { %10272 = vmatmul.mubr.msk.f32.gmra.mrb[14].mxu1 %vm897_vm2, %v12462_v19  ;;  %10312 = vmatmul.mubr.msk.f32.gmra.mrb[30].mxu0 %vm897_vm2, %v12462_v19 }
 0x125   : > { %10330 = vmatprep.mubr.msk.f32.mxu0 %vm897_vm2, %v12356_v49  ;;  %10339 = vmatprep.mubr.msk.f32.mxu1 %vm897_vm2, %v12413_v5 }
 0x128   : > { %10331 = vmatmul.mubr.msk.f32.vlgmr.msra.gmra.mrb[32].mxu0 %vm897_vm2, %v12359_v50  ;;  %10340 = vmatmul.mubr.msk.f32.vlgmr.msra.gmra.mrb[16].mxu1 %vm897_vm2, %v12406_v3 }
 0x129   : > { %10333 = vmatprep.mubr.msk.f32.mxu0 %vm897_vm2, %v12379_v57  ;;  %10342 = vmatprep.mubr.msk.f32.mxu1 %vm897_vm2, %v12427_v9 }
 0x12c   : > { %10334 = vmatmul.mubr.msk.f32.gmra.mrb[34].mxu0 %vm897_vm2, %v12372_v55  ;;  %10343 = vmatmul.mubr.msk.f32.gmra.mrb[18].mxu1 %vm897_vm2, %v12420_v7 }
 0x12d   : > { %10336 = vmatprep.mubr.msk.f32.mxu0 %vm897_vm2, %v12399_v0  ;;  %10345 = vmatprep.mubr.msk.f32.mxu1 %vm897_vm2, %v12441_v13 }
 0x130   : > { %10337 = vmatmul.mubr.msk.f32.gmra.mrb[36].mxu0 %vm897_vm2, %v12392_v62  ;;  %10346 = vmatmul.mubr.msk.f32.gmra.mrb[20].mxu1 %vm897_vm2, %v12434_v11 }
 0x131   : > { %10348 = vmatprep.mubr.msk.f32.mxu1 %vm897_vm2, %v12455_v17 }
 0x134   : > { %10349 = vmatmul.mubr.msk.f32.gmra.mrb[22].mxu1 %vm897_vm2, %v12448_v15 }
 0x135   : > { %10351 = vmatprep.mubr.msk.f32.mxu1 %vm897_vm2, %v12469_v21 }
 0x138   : > { %10352 = vmatmul.mubr.msk.f32.gmra.mrb[24].mxu1 %vm897_vm2, %v12462_v19 }
 0x1db   : > { %v10252_v24 = vpop.f32.mrb[0].mxu1  ;;  %v10292_v25 = vpop.f32.mrb[16].mxu0 }
 0x1dc   : > { %v12522_v26 = vadd.f32 %v10252_v24, %v12514_v22  ;;  %v1178_v27 = vadd.f32 %v10292_v25, %v12519_v23  ;;  %v1012_v28 = vpop.f32.mrb[1].mxu1  ;;  %v1172_v29 = vpop.f32.mrb[17].mxu0 }
 0x1dd   : > { %v12526_v30 = vadd.f32 %v12514_v22, %v1012_v28  ;;  %v1173_v31 = vadd.f32 %v12519_v23, %v1172_v29 }
 0x1de   : > { %1429 = vrot.lane.b32.xlu0 %v12522_v26, %s12081_s29 }
 0x1df   : > { %1427 = vrot.lane.b32.xlu1 %v12526_v30, %s12081_s29  ;;  %10358 = vmatprep.mubr.msk.f32.mxu0 %vm1795_vm3, %v12526_v30  ;;  %v10255_v33 = vpop.f32.mrb[2].mxu1  ;;  %v10295_v34 = vpop.f32.mrb[18].mxu0  ;;  %v11005_v35 = vpack.c.bf16 %v1178_v27, %v1173_v31  ;;  %v12541_v36 = vpack.i.bf16 %v1178_v27, %v1173_v31 }
 0x1e0   : > { %v1188_v37 = vadd.f32 %v10295_v34, %v12519_v23  ;;  %v1182_v38 = vpop.f32.mrb[19].mxu0  ;;  %v1022_v39 = vpop.f32.mrb[3].mxu1  ;;  %v12557_v48 = vadd.f32 %v10255_v33, %v12514_v22 }
 0x1e1   : > { %11007 = vmatprep.subr.msk.bf16.mxu0 %vm12533_vm4, %v11005_v35  ;;  %v1183_v40 = vadd.f32 %v12519_v23, %v1182_v38  ;;  %v12575_v63 = vadd.f32 %v12514_v22, %v1022_v39 }
 0x1e2   : > { %11010 = vmatpush3.bf16.xpose.msk.msra.mxu0 %vm12533_vm4, %v11005_v35  ;;  %1461 = vrot.lane.b32.xlu0 %v12522_v26, %s12082_s2 }
 0x1e3   : > { %v10298_v41 = vpop.f32.mrb[20].mxu0  ;;  %1459 = vrot.lane.b32.xlu1 %v12526_v30, %s12082_s2  ;;  %v11011_v42 = vpack.c.bf16 %v1188_v37, %v1183_v40  ;;  %v10258_v43 = vpop.f32.mrb[4].mxu1  ;;  %v12553_v44 = vpack.i.bf16 %v1188_v37, %v1183_v40 }
 0x1e4   : > { %v1198_v45 = vadd.f32 %v10298_v41, %v12519_v23  ;;  %v1192_v46 = vpop.f32.mrb[21].mxu0  ;;  %v1032_v47 = vpop.f32.mrb[5].mxu1  ;;  %v12599_v18 = vadd.f32 %v10258_v43, %v12514_v22 }
 0x1e5   : > { %v1193_v51 = vadd.f32 %v12519_v23, %v1192_v46  ;;  %11013 = vmatprep.subr.msk.bf16.mxu0 %vm12533_vm4, %v11011_v42  ;;  %v12563_v52 = vadd.f32 %v12514_v22, %v1032_v47 }
 0x1e6   : > { %11458 = vrot.lane.b32.xlu0 %v12541_v36, %s12081_s29 }
 0x1e7   : > { %1433 = vrot.lane.b32.xlu1 %v12557_v48, %s12081_s29  ;;  %v11017_v53 = vpack.c.bf16 %v1198_v45, %v1193_v51  ;;  %v10301_v54 = vpop.f32.mrb[22].mxu0  ;;  %10372 = vmatprep.mubr.msk.f32.mxu1 %vm1795_vm3, %v12563_v52  ;;  %v10261_v56 = vpop.f32.mrb[6].mxu1  ;;  %v12571_v58 = vpack.i.bf16 %v1198_v45, %v1193_v51 }
 0x1e8   : > { %v1208_v59 = vadd.f32 %v10301_v54, %v12519_v23  ;;  %v1202_v60 = vpop.f32.mrb[23].mxu0  ;;  %v1042_v61 = vpop.f32.mrb[7].mxu1  ;;  %v12640_v46 = vadd.f32 %v10261_v56, %v12514_v22 }
 0x1e9   : > { %10359 = vmatmul.mubr.msk.f32.vlgmr.msra.gmra.mrb[38].mxu0 %vm1795_vm3, %v12522_v26  ;;  %11019 = vmatprep.subr.msk.bf16.mxu1 %vm12533_vm4, %v11017_v53  ;;  %v1203_v1 = vadd.f32 %v12519_v23, %v1202_v60  ;;  %v12608_v28 = vadd.f32 %v12514_v22, %v1042_v61 }
 0x1ea   : > { %11022 = vmatpush3.bf16.xpose.msk.msra.mxu1 %vm12533_vm4, %v11017_v53  ;;  %11463 = vrot.lane.b32.xlu0 %v12541_v36, %s12082_s2 }
 0x1eb   : > { %11016 = vmatpush3.bf16.xpose.msk.msra.mxu0 %vm12533_vm4, %v11011_v42  ;;  %10365 = vmatprep.mubr.msk.f32.mxu0 %vm1795_vm3, %v12575_v63  ;;  %v10304_v2 = vpop.f32.mrb[24].mxu0  ;;  %v11023_v4 = vpack.c.bf16 %v1208_v59, %v1203_v1  ;;  %v10264_v6 = vpop.f32.mrb[8].mxu1  ;;  %v12590_v8 = vpack.i.bf16 %v1208_v59, %v1203_v1 }
 0x1ec   : > { %1465 = vrot.lane.b32.xlu1 %v12557_v48, %s12082_s2  ;;  %v1218_v10 = vadd.f32 %v10304_v2, %v12519_v23  ;;  %v1212_v12 = vpop.f32.mrb[25].mxu0  ;;  %v1052_v14 = vpop.f32.mrb[9].mxu1  ;;  %v12643_v47 = vadd.f32 %v10264_v6, %v12514_v22 }
 0x1ed   : > { %v1213_v16 = vadd.f32 %v12519_v23, %v1212_v12  ;;  %11025 = vmatprep.subr.msk.bf16.mxu0 %vm12533_vm4, %v11023_v4  ;;  %v12614_v34 = vadd.f32 %v12514_v22, %v1052_v14 }
 0x1ee   : > { %11468 = vrot.lane.b32.xlu0 %v12553_v44, %s12081_s29 }
 0x1ef   : > { %v10307_v20 = vpop.f32.mrb[26].mxu0  ;;  %v10267_v24 = vpop.f32.mrb[10].mxu1  ;;  %v11029_v25 = vpack.c.bf16 %v1218_v10, %v1213_v16  ;;  %v12603_v27 = vpack.i.bf16 %v1218_v10, %v1213_v16 }
 0x1f0   : > { %11473 = vrot.lane.b32.xlu1 %v12553_v44, %s12082_s2  ;;  %v1228_v29 = vadd.f32 %v10307_v20, %v12519_v23  ;;  %v1222_v31 = vpop.f32.mrb[27].mxu0  ;;  %v1062_v33 = vpop.f32.mrb[11].mxu1 }
 0x1f1   : > { %10373 = vmatmul.mubr.msk.f32.vlgmr.msra.gmra.mrb[26].mxu1 %vm1795_vm3, %v12599_v18  ;;  %v1223_v35 = vadd.f32 %v12519_v23, %v1222_v31  ;;  %11031 = vmatprep.subr.msk.bf16.mxu1 %vm12533_vm4, %v11029_v25  ;;  %v12655_v1 = vadd.f32 %v12514_v22, %v1062_v33 }
 0x1f2   : > { %10366 = vmatmul.mubr.msk.f32.vlgmr.msra.gmra.mrb[40].mxu0 %vm1795_vm3, %v12557_v48  ;;  %1431 = vrot.lane.b32.xlu0 %v12575_v63, %s12081_s29 }
 0x1f3   : > { %11028 = vmatpush3.bf16.xpose.msk.msra.mxu0 %vm12533_vm4, %v11023_v4  ;;  %11034 = vmatpush3.bf16.xpose.msk.msra.mxu1 %vm12533_vm4, %v11029_v25  ;;  %v10270_v37 = vpop.f32.mrb[12].mxu1  ;;  %v10310_v38 = vpop.f32.mrb[28].mxu0  ;;  %v11035_v39 = vpack.c.bf16 %v1228_v29, %v1223_v35  ;;  %v12627_v40 = vpack.i.bf16 %v1228_v29, %v1223_v35  ;;  %v12661_v4 = vld [vmem:[%s14919_s8] ss:$0 sm:$0xff]  ;;  %v12691_v35 = vadd.f32 %v10267_v24, %v12514_v22 }
 0x1f4   : > { %11478 = vrot.lane.b32.xlu1 %v12571_v58, %s12081_s29  ;;  %v1238_v41 = vadd.f32 %v10310_v38, %v12519_v23  ;;  %v1072_v42 = vpop.f32.mrb[13].mxu1  ;;  %v1232_v43 = vpop.f32.mrb[29].mxu0  ;;  %10379 = vmatprep.mubr.msk.f32.mxu0 %vm1795_vm3, %v12608_v28  ;;  %v12694_v38 = vadd.f32 %v10270_v37, %v12514_v22 }
 0x1f5   : > { %v1233_v45 = vadd.f32 %v12519_v23, %v1232_v43  ;;  %11037 = vmatprep.subr.msk.bf16.mxu0 %vm12533_vm4, %v11035_v39  ;;  %10386 = vmatprep.mubr.msk.f32.mxu1 %vm1795_vm3, %v12614_v34  ;;  %v12666_v6 = vadd.f32 %v12514_v22, %v1072_v42 }
 0x1f6   : > { %1463 = vrot.lane.b32.xlu0 %v12575_v63, %s12082_s2 }
 0x1f7   : > { %v12647_v51 = vpop.f32.mrb[14].mxu1  ;;  %v10313_v53 = vpop.f32.mrb[30].mxu0  ;;  %v11041_v54 = vpack.c.bf16 %v1238_v41, %v1233_v45  ;;  %v12649_v59 = vpack.i.bf16 %v1238_v41, %v1233_v45 }
 0x1f8   : > { %1435 = vrot.lane.b32.xlu1 %v12563_v52, %s12081_s29  ;;  %v1248_v60 = vadd.f32 %v10313_v53, %v12519_v23  ;;  %v1082_v61 = vpop.f32.mrb[15].mxu1  ;;  %v1242_v56 = vpop.f32.mrb[31].mxu0 }
 0x1f9   : > { %v1243_v2 = vadd.f32 %v12519_v23, %v1242_v56  ;;  %11043 = vmatprep.subr.msk.bf16.mxu1 %vm12533_vm4, %v11041_v54 }
 0x1fa   : > { %10380 = vmatmul.mubr.msk.f32.vlgmr.msra.gmra.mrb[42].mxu0 %vm1795_vm3, %v12640_v46  ;;  %1437 = vrot.lane.b32.xlu0 %v12599_v18, %s12081_s29 }
 0x1fb   : > { %11040 = vmatpush3.bf16.xpose.msk.msra.mxu0 %vm12533_vm4, %v11035_v39  ;;  %v10332_v23 = vpop.f32.mrb[32].mxu0  ;;  %v10341_v10 = vpop.f32.mrb[16].mxu1  ;;  %10387 = vmatmul.mubr.msk.f32.vlgmr.msra.gmra.mrb[28].mxu1 %vm1795_vm3, %v12643_v47  ;;  %v11047_v12 = vpack.c.bf16 %v1248_v60, %v1243_v2  ;;  %v12676_v14 = vpack.i.bf16 %v1248_v60, %v1243_v2  ;;  %v12697_v39 = vadd.f32 %v12514_v22, %v1082_v61 }
 0x1fc   : > { %v1338_v16 = vadd.f32 %v10332_v23, %v12661_v4  ;;  %v1368_v20 = vadd.f32 %v10341_v10, %v12661_v4  ;;  %1467 = vrot.lane.b32.xlu1 %v12563_v52, %s12082_s2  ;;  %v1332_v25 = vpop.f32.mrb[33].mxu0  ;;  %v1362_v29 = vpop.f32.mrb[17].mxu1  ;;  %11046 = vmatpush3.bf16.xpose.msk.msra.mxu1 %vm12533_vm4, %v11041_v54 }
 0x1fd   : > { %v1333_v31 = vadd.f32 %v12661_v4, %v1332_v25  ;;  %v1363_v33 = vadd.f32 %v12661_v4, %v1362_v29  ;;  %10393 = vmatprep.mubr.msk.f32.mxu0 %vm1795_vm3, %v12655_v1  ;;  %11049 = vmatprep.subr.msk.bf16.mxu0 %vm12533_vm4, %v11047_v12 }
 0x1fe   : > { %11483 = vrot.lane.b32.xlu0 %v12571_v58, %s12082_s2  ;;  %10400 = vmatprep.mubr.msk.f32.mxu1 %vm1795_vm3, %v12666_v6 }
 0x1ff   : > { %v10335_v41 = vpop.f32.mrb[34].mxu0  ;;  %v10344_v42 = vpop.f32.mrb[18].mxu1  ;;  %v12703_v43 = vpack.i.bf16 %v1368_v20, %v1363_v33  ;;  %v12705_v45 = vpack.i.bf16 %v1338_v16, %v1333_v31  ;;  %v12713_v56 = vpack.c.bf16 %v1338_v16, %v1333_v31  ;;  %v12715_v2 = vpack.c.bf16 %v1368_v20, %v1363_v33 }
 0x200   : > { %v1348_v24 = vadd.f32 %v10335_v41, %v12661_v4  ;;  %1441 = vrot.lane.b32.xlu1 %v12640_v46, %s12081_s29  ;;  %v1342_v37 = vpop.f32.mrb[35].mxu0  ;;  %v1378_v53 = vadd.f32 %v10344_v42, %v12661_v4  ;;  %v1372_v54 = vpop.f32.mrb[19].mxu1  ;;  %v12739_v42 = vadd.f32 %v12647_v51, %v12514_v22 }
 0x201   : > { %v1343_v60 = vadd.f32 %v12661_v4, %v1342_v37  ;;  %v1373_v61 = vadd.f32 %v12661_v4, %v1372_v54  ;;  %15046 = vst [vmem:[#allocation27_spill] sm:$0xff] %v12715_v2 }
 0x202   : > { %10394 = vmatmul.mubr.msk.f32.vlgmr.msra.gmra.mrb[44].mxu0 %vm1795_vm3, %v12691_v35  ;;  %1439 = vrot.lane.b32.xlu0 %v12608_v28, %s12081_s29 }
 0x203   : > { %11052 = vmatpush3.bf16.xpose.msk.msra.mxu0 %vm12533_vm4, %v11047_v12  ;;  %v10338_v23 = vpop.f32.mrb[36].mxu0  ;;  %10401 = vmatmul.mubr.msk.f32.vlgmr.msra.gmra.mrb[30].mxu1 %vm1795_vm3, %v12694_v38  ;;  %v10347_v10 = vpop.f32.mrb[20].mxu1  ;;  %v12725_v25 = vpack.i.bf16 %v1378_v53, %v1373_v61  ;;  %v12727_v16 = vpack.i.bf16 %v1348_v24, %v1343_v60  ;;  %v12743_v37 = vpack.c.bf16 %v1348_v24, %v1343_v60 }
 0x204   : > { %v1358_v20 = vadd.f32 %v10338_v23, %v12661_v4  ;;  %11488 = vrot.lane.b32.xlu1 %v12590_v8, %s12081_s29  ;;  %v1352_v29 = vpop.f32.mrb[37].mxu0  ;;  %10407 = vmatprep.mubr.msk.f32.mxu0 %vm1795_vm3, %v12697_v39  ;;  %v1388_v12 = vadd.f32 %v10347_v10, %v12661_v4  ;;  %v1382_v31 = vpop.f32.mrb[21].mxu1  ;;  %v12745_v54 = vpack.c.bf16 %v1378_v53, %v1373_v61 }
 0x205   : > { %v1353_v33 = vadd.f32 %v12661_v4, %v1352_v29  ;;  %v1383_v41 = vadd.f32 %v12661_v4, %v1382_v31 }
 0x206   : > { %1445 = vrot.lane.b32.xlu0 %v12643_v47, %s12081_s29 }
 0x207   : > { %v10350_v23 = vpop.f32.mrb[22].mxu1  ;;  %v12747_v21 = vpack.i.bf16 %v1358_v20, %v1353_v33  ;;  %v12749_v10 = vpack.i.bf16 %v1388_v12, %v1383_v41  ;;  %v12754_v22 = vpack.c.bf16 %v1358_v20, %v1353_v33  ;;  %v12757_v19 = vpack.c.bf16 %v1388_v12, %v1383_v41 }
 0x208   : > { %11493 = vrot.lane.b32.xlu1 %v12590_v8, %s12082_s2  ;;  %v1398_v29 = vadd.f32 %v10350_v23, %v12661_v4  ;;  %v1392_v31 = vpop.f32.mrb[23].mxu1 }
 0x209   : > { %v1393_v51 = vadd.f32 %v12661_v4, %v1392_v31  ;;  %15047 = vst [vmem:[#allocation28_spill] sm:$0xff] %v12757_v19 }
 0x20a   : > { %10408 = vmatmul.mubr.msk.f32.vlgmr.msra.gmra.mrb[46].mxu0 %vm1795_vm3, %v12739_v42  ;;  %11498 = vrot.lane.b32.xlu0 %v12603_v27, %s12081_s29 }
 0x20b   : > { %v10353_v24 = vpop.f32.mrb[24].mxu1  ;;  %v12763_v53 = vpack.i.bf16 %v1398_v29, %v1393_v51  ;;  %v12765_v60 = vpack.c.bf16 %v1398_v29, %v1393_v51 }
 0x20c   : > { %1443 = vrot.lane.b32.xlu1 %v12614_v34, %s12081_s29  ;;  %v1408_v61 = vadd.f32 %v10353_v24, %v12661_v4  ;;  %v1402_v20 = vpop.f32.mrb[25].mxu1 }
 0x20d   : > { %15048 = vst [vmem:[#allocation29_spill] sm:$0xff] %v12763_v53  ;;  %15049 = vst [vmem:[#allocation30_spill] sm:$0xff] %v12765_v60  ;;  %v1403_v12 = vadd.f32 %v12661_v4, %v1402_v20 }
 0x20e   : > { %11503 = vrot.lane.b32.xlu0 %v12603_v27, %s12082_s2 }
 0x20f   : > { %v12773_v33 = vpack.i.bf16 %v1408_v61, %v1403_v12  ;;  %v12775_v41 = vpack.c.bf16 %v1408_v61, %v1403_v12 }
 0x210   : > { %1449 = vrot.lane.b32.xlu1 %v12691_v35, %s12081_s29 }
 0x211   : > { %15050 = vst [vmem:[#allocation31_spill] sm:$0xff] %v12773_v33  ;;  %15051 = vst [vmem:[#allocation32_spill] sm:$0xff] %v12775_v41 }
 0x212   : > { %1447 = vrot.lane.b32.xlu0 %v12655_v1, %s12081_s29 }
 0x214   : > { %11508 = vrot.lane.b32.xlu1 %v12627_v40, %s12081_s29 }
 0x216   : > { %1453 = vrot.lane.b32.xlu0 %v12694_v38, %s12081_s29 }
 0x218   : > { %1451 = vrot.lane.b32.xlu1 %v12666_v6, %s12081_s29 }
 0x21a   : > { %11513 = vrot.lane.b32.xlu0 %v12649_v59, %s12081_s29 }
 0x21c   : > { %1457 = vrot.lane.b32.xlu1 %v12739_v42, %s12081_s29 }
 0x21e   : > { %1469 = vrot.lane.b32.xlu0 %v12599_v18, %s12082_s2 }
 0x220   : > { %11518 = vrot.lane.b32.xlu1 %v12676_v14, %s12081_s29 }
 0x222   : > { %1471 = vrot.lane.b32.xlu0 %v12608_v28, %s12082_s2 }
 0x224   : > { %11523 = vrot.lane.b32.xlu1 %v12627_v40, %s12082_s2 }
 0x226   : > { %11528 = vrot.lane.b32.xlu0 %v12649_v59, %s12082_s2 }
 0x228   : > { %1473 = vrot.lane.b32.xlu1 %v12640_v46, %s12082_s2 }
 0x22a   : > { %1455 = vrot.lane.b32.xlu0 %v12697_v39, %s12081_s29 }
 0x22c   : > { %1475 = vrot.lane.b32.xlu1 %v12614_v34, %s12082_s2 }
 0x22e   : > { %1477 = vrot.lane.b32.xlu0 %v12643_v47, %s12082_s2 }
 0x230   : > { %1481 = vrot.lane.b32.xlu1 %v12691_v35, %s12082_s2 }
 0x232   : > { %1479 = vrot.lane.b32.xlu0 %v12655_v1, %s12082_s2 }
 0x234   : > { %1483 = vrot.lane.b32.xlu1 %v12666_v6, %s12082_s2 }
 0x236   : > { %11533 = vrot.lane.b32.xlu0 %v12541_v36, %s12083_s20 }
 0x238   : > { %11538 = vrot.lane.b32.xlu1 %v12553_v44, %s12083_s20 }
 0x23a   : > { %1485 = vrot.lane.b32.xlu0 %v12694_v38, %s12082_s2 }
 0x23c   : > { %1489 = vrot.lane.b32.xlu1 %v12739_v42, %s12082_s2 }
 0x23e   : > { %11543 = vrot.lane.b32.xlu0 %v12571_v58, %s12083_s20 }
 0x240   : > { %11548 = vrot.lane.b32.xlu1 %v12676_v14, %s12082_s2 }
 0x242   : > { %1493 = vrot.lane.b32.xlu0 %v12522_v26, %s12083_s20 }
 0x244   : > { %1491 = vrot.lane.b32.xlu1 %v12526_v30, %s12083_s20 }
 0x246   : > { %1495 = vrot.lane.b32.xlu0 %v12575_v63, %s12083_s20 }
 0x248   : > { %11553 = vrot.lane.b32.xlu1 %v12590_v8, %s12083_s20 }
 0x24a   : > { %1487 = vrot.lane.b32.xlu0 %v12697_v39, %s12082_s2 }
 0x24c   : > { %1497 = vrot.lane.b32.xlu1 %v12557_v48, %s12083_s20 }
 0x24e   : > { %11558 = vrot.lane.b32.xlu0 %v12603_v27, %s12083_s20 }
 0x250   : > { %1499 = vrot.lane.b32.xlu1 %v12563_v52, %s12083_s20  ;;  %v1430_v26 = vpop.permute.xlu0 %1429 }
 0x251   : > { %v1428_v30 = vpop.permute.xlu1 %1427 }
 0x252   : > { %1501 = vrot.lane.b32.xlu0 %v12599_v18, %s12083_s20  ;;  %10414 = vmatprep.mubr.msk.f32.mxu1 %vm1795_vm3, %v1428_v30 }
 0x254   : > { %11563 = vrot.lane.b32.xlu1 %v12627_v40, %s12083_s20  ;;  %v12848_v36 = vpop.permute.xlu0 %1461 }
 0x255   : > { %v12850_v44 = vpop.permute.xlu1 %1459 }
 0x256   : > { %1503 = vrot.lane.b32.xlu0 %v12608_v28, %s12083_s20 }
 0x258   : > { %1505 = vrot.lane.b32.xlu1 %v12640_v46, %s12083_s20  ;;  %v11459_v48 = vpop.permute.xlu0 %11458 }
 0x259   : > { %v11461_v52 = vunpack.i.h.bf16 %v11459_v48  ;;  %v11460_v58 = vunpack.i.l.bf16 %v11459_v48  ;;  %v1434_v63 = vpop.permute.xlu1 %1433 }
 0x25a   : > { %11568 = vrot.lane.b32.xlu0 %v12649_v59, %s12083_s20 }
 0x25b   : > { %v11053_v8 = vpack.c.bf16 %v11461_v52, %v11460_v58 }
 0x25c   : > { %1507 = vrot.lane.b32.xlu1 %v12614_v34, %s12083_s20  ;;  %v12860_v18 = vpop.permute.xlu0 %11463 }
 0x25d   : > { %11055 = vmatprep.subr.msk.bf16.mxu1 %vm12533_vm4, %v11053_v8 }
 0x25e   : > { %v12864_v27 = vpop.permute.xlu1 %1465  ;;  %11058 = vmatpush3.bf16.xpose.msk.msra.mxu1 %vm12533_vm4, %v11053_v8  ;;  %1509 = vrot.lane.b32.xlu0 %v12643_v47, %s12083_s20 }
 0x260   : > { %11573 = vrot.lane.b32.xlu1 %v12676_v14, %s12083_s20  ;;  %v11469_v28 = vpop.permute.xlu0 %11468 }
 0x261   : > { %v11471_v40 = vunpack.i.h.bf16 %v11469_v28  ;;  %v11470_v46 = vunpack.i.l.bf16 %v11469_v28 }
 0x262   : > { %v12872_v34 = vpop.permute.xlu1 %11473  ;;  %1511 = vrot.lane.b32.xlu0 %v12655_v1, %s12083_s20 }
 0x263   : > { %v11059_v59 = vpack.c.bf16 %v11471_v40, %v11470_v46 }
 0x264   : > { %1513 = vrot.lane.b32.xlu1 %v12691_v35, %s12083_s20  ;;  %v1432_v4 = vpop.permute.xlu0 %1431 }
 0x265   : > { %10415 = vmatmul.mubr.msk.f32.vlgmr.msra.gmra.mrb[32].mxu1 %vm1795_vm3, %v1430_v26  ;;  %11061 = vmatprep.subr.msk.bf16.mxu0 %vm12533_vm4, %v11059_v59 }
 0x266   : > { %v11479_v47 = vpop.permute.xlu1 %11478  ;;  %10421 = vmatprep.mubr.msk.f32.mxu0 %vm1795_vm3, %v1432_v4  ;;  %1515 = vrot.lane.b32.xlu0 %v12666_v6, %s12083_s20 }
 0x267   : > { %v11481_v14 = vunpack.i.h.bf16 %v11479_v47  ;;  %v11480_v23 = vunpack.i.l.bf16 %v11479_v47  ;;  %11064 = vmatpush3.bf16.xpose.msk.msra.mxu0 %vm12533_vm4, %v11059_v59  ;;  %v11466_v47 = vunpack.i.h.bf16 %v12860_v18 }
 0x268   : > { %1517 = vrot.lane.b32.xlu1 %v12694_v38, %s12083_s20  ;;  %v12888_v1 = vpop.permute.xlu0 %1463 }
 0x269   : > { %v11065_v35 = vpack.c.bf16 %v11481_v14, %v11480_v23  ;;  %v11465_v14 = vunpack.i.l.bf16 %v12860_v18  ;;  %v11476_v18 = vunpack.i.h.bf16 %v12872_v34 }
 0x26a   : > { %v1436_v29 = vpop.permute.xlu1 %1435  ;;  %1519 = vrot.lane.b32.xlu0 %v12697_v39, %s12083_s20 }
 0x26b   : > { %11067 = vmatprep.subr.msk.bf16.mxu1 %vm12533_vm4, %v11065_v35  ;;  %10428 = vmatprep.mubr.msk.f32.mxu1 %vm1795_vm3, %v1436_v29 }
 0x26c   : > { %1521 = vrot.lane.b32.xlu1 %v12739_v42, %s12083_s20  ;;  %11070 = vmatpush3.bf16.xpose.msk.msra.mxu1 %vm12533_vm4, %v11065_v35  ;;  %v1438_v6 = vpop.permute.xlu0 %1437 }
 0x26e   : > { %v12899_v38 = vpop.permute.xlu1 %1467  ;;  %10422 = vmatmul.mubr.msk.f32.vlgmr.msra.gmra.mrb[48].mxu0 %vm1795_vm3, %v1434_v63  ;;  %11593 = vrot.lane.b32.xlu0 %v12703_v43, %s12082_s2 }
 0x270   : > { %11578 = vrot.lane.b32.xlu1 %v12705_v45, %s12081_s29  ;;  %v12906_v39 = vpop.permute.xlu0 %11483 }
 0x272   : > { %v1442_v31 = vpop.permute.xlu1 %1441  ;;  %11603 = vrot.lane.b32.xlu0 %v12703_v43, %s12083_s20 }
 0x273   : > { %10429 = vmatmul.mubr.msk.f32.vlgmr.msra.gmra.mrb[34].mxu1 %vm1795_vm3, %v1438_v6 }
 0x274   : > { %11583 = vrot.lane.b32.xlu1 %v12703_v43, %s12081_s29  ;;  %v1440_v42 = vpop.permute.xlu0 %1439 }
 0x275   : > { %10435 = vmatprep.mubr.msk.f32.mxu0 %vm1795_vm3, %v1440_v42 }
 0x276   : > { %v11489_v51 = vpop.permute.xlu1 %11488  ;;  %11613 = vrot.lane.b32.xlu0 %v12725_v25, %s12081_s29 }
 0x277   : > { %v11491_v24 = vunpack.i.h.bf16 %v11489_v51  ;;  %v11490_v61 = vunpack.i.l.bf16 %v11489_v51  ;;  %v11475_v51 = vunpack.i.l.bf16 %v12872_v34 }
 0x278   : > { %11588 = vrot.lane.b32.xlu1 %v12705_v45, %s12082_s2  ;;  %v1446_v20 = vpop.permute.xlu0 %1445 }
 0x279   : > { %v11071_v12 = vpack.c.bf16 %v11491_v24, %v11490_v61  ;;  %v11107_v34 = vpack.c.bf16 %v11476_v18, %v11475_v51 }
 0x27a   : > { %v12918_v26 = vpop.permute.xlu1 %11493  ;;  %11618 = vrot.lane.b32.xlu0 %v12727_v16, %s12082_s2 }
 0x27b   : > { %11073 = vmatprep.subr.msk.bf16.mxu0 %vm12533_vm4, %v11071_v12 }
 0x27c   : > { %11598 = vrot.lane.b32.xlu1 %v12705_v45, %s12083_s20  ;;  %11076 = vmatpush3.bf16.xpose.msk.msra.mxu0 %vm12533_vm4, %v11071_v12  ;;  %v11499_v43 = vpop.permute.xlu0 %11498  ;;  %v11485_v12 = vunpack.i.l.bf16 %v12906_v39 }
 0x27d   : > { %v11501_v30 = vunpack.i.h.bf16 %v11499_v43  ;;  %v11500_v48 = vunpack.i.l.bf16 %v11499_v43 }
 0x27e   : > { %v1444_v52 = vpop.permute.xlu1 %1443  ;;  %11628 = vrot.lane.b32.xlu0 %v12727_v16, %s12083_s20 }
 0x27f   : > { %v11077_v58 = vpack.c.bf16 %v11501_v30, %v11500_v48  ;;  %10442 = vmatprep.mubr.msk.f32.mxu1 %vm1795_vm3, %v1444_v52 }
 0x280   : > { %11608 = vrot.lane.b32.xlu1 %v12727_v16, %s12081_s29  ;;  %v12933_v63 = vpop.permute.xlu0 %11503 }
 0x281   : > { %11079 = vmatprep.subr.msk.bf16.mxu1 %vm12533_vm4, %v11077_v58 }
 0x282   : > { %v1450_v45 = vpop.permute.xlu1 %1449  ;;  %11633 = vrot.lane.b32.xlu0 %v12725_v25, %s12083_s20  ;;  %11082 = vmatpush3.bf16.xpose.msk.msra.mxu1 %vm12533_vm4, %v11077_v58  ;;  %v11496_v58 = vunpack.i.h.bf16 %v12918_v26 }
 0x283   : > { %10436 = vmatmul.mubr.msk.f32.vlgmr.msra.gmra.mrb[50].mxu0 %vm1795_vm3, %v1442_v31 }
 0x284   : > { %11623 = vrot.lane.b32.xlu1 %v12725_v25, %s12082_s2  ;;  %v1448_v8 = vpop.permute.xlu0 %1447 }
 0x285   : > { %10449 = vmatprep.mubr.msk.f32.mxu0 %vm1795_vm3, %v1448_v8 }
 0x286   : > { %v11509_v16 = vpop.permute.xlu1 %11508  ;;  %11638 = vrot.lane.b32.xlu0 %v12747_v21, %s12081_s29 }
 0x287   : > { %v11511_v28 = vunpack.i.h.bf16 %v11509_v16  ;;  %v11510_v40 = vunpack.i.l.bf16 %v11509_v16  ;;  %v11506_v16 = vunpack.i.h.bf16 %v12933_v63 }
 0x288   : > { %11648 = vrot.lane.b32.xlu1 %v12747_v21, %s12082_s2  ;;  %v1454_v46 = vpop.permute.xlu0 %1453 }
 0x289   : > { %v11083_v59 = vpack.c.bf16 %v11511_v28, %v11510_v40  ;;  %10443 = vmatmul.mubr.msk.f32.vlgmr.msra.gmra.mrb[36].mxu1 %vm1795_vm3, %v1446_v20  ;;  %v11486_v20 = vunpack.i.h.bf16 %v12906_v39  ;;  %v11505_v28 = vunpack.i.l.bf16 %v12933_v63 }
 0x28a   : > { %v1452_v4 = vpop.permute.xlu1 %1451  ;;  %11643 = vrot.lane.b32.xlu0 %v12749_v10, %s12081_s29 }
 0x28b   : > { %11085 = vmatprep.subr.msk.bf16.mxu0 %vm12533_vm4, %v11083_v59  ;;  %10456 = vmatprep.mubr.msk.f32.mxu1 %vm1795_vm3, %v1452_v4  ;;  %v11113_v52 = vpack.c.bf16 %v11486_v20, %v11485_v12 }
 0x28c   : > { %11658 = vrot.lane.b32.xlu1 %v12747_v21, %s12083_s20  ;;  %11088 = vmatpush3.bf16.xpose.msk.msra.mxu0 %vm12533_vm4, %v11083_v59  ;;  %v11514_v25 = vpop.permute.xlu0 %11513  ;;  %v11101_v21 = vpack.c.bf16 %v11466_v47, %v11465_v14 }
 0x28d   : > { %v11516_v23 = vunpack.i.h.bf16 %v11514_v25  ;;  %v11515_v35 = vunpack.i.l.bf16 %v11514_v25 }
 0x28e   : > { %v1458_v29 = vpop.permute.xlu1 %1457  ;;  %11653 = vrot.lane.b32.xlu0 %v12749_v10, %s12082_s2 }
 0x28f   : > { %v11089_v6 = vpack.c.bf16 %v11516_v23, %v11515_v35 }
 0x290   : > { %11663 = vrot.lane.b32.xlu1 %v12749_v10, %s12083_s20  ;;  %v12965_v31 = vpop.permute.xlu0 %1469 }
 0x291   : > { %11091 = vmatprep.subr.msk.bf16.mxu1 %vm12533_vm4, %v11089_v6 }
 0x292   : > { %v11519_v42 = vpop.permute.xlu1 %11518  ;;  %11678 = vrot.lane.b32.xlu0 %v12773_v33, %s12081_s29  ;;  %11094 = vmatpush3.bf16.xpose.msk.msra.mxu1 %vm12533_vm4, %v11089_v6 }
 0x293   : > { %v11521_v24 = vunpack.i.h.bf16 %v11519_v42  ;;  %v11520_v61 = vunpack.i.l.bf16 %v11519_v42  ;;  %10450 = vmatmul.mubr.msk.f32.vlgmr.msra.gmra.mrb[52].mxu0 %vm1795_vm3, %v1450_v45  ;;  %11103 = vmatprep.subr.msk.bf16.mxu1 %vm12533_vm4, %v11101_v21  ;;  %v11495_v45 = vunpack.i.l.bf16 %v12918_v26  ;;  %v11125_v26 = vpack.c.bf16 %v11506_v16, %v11505_v28 }
 0x294   : > { %11668 = vrot.lane.b32.xlu1 %v12763_v53, %s12081_s29  ;;  %v1472_v10 = vpop.permute.xlu0 %1471  ;;  %s12086_s29 = smov 48  }
 0x295   : > { %v11095_v43 = vpack.c.bf16 %v11521_v24, %v11520_v61 }
 0x296   : > { %v11524_v30 = vpop.permute.xlu1 %11523  ;;  %11683 = vrot.lane.b32.xlu0 %v12773_v33, %s12082_s2 }
 0x297   : > { %11097 = vmatprep.subr.msk.bf16.mxu0 %vm12533_vm4, %v11095_v43  ;;  %v11526_v59 = vunpack.i.h.bf16 %v11524_v30  ;;  %v11525_v4 = vunpack.i.l.bf16 %v11524_v30 }
 0x298   : > { %11673 = vrot.lane.b32.xlu1 %v12763_v53, %s12082_s2  ;;  %11100 = vmatpush3.bf16.xpose.msk.msra.mxu0 %vm12533_vm4, %v11095_v43  ;;  %v11529_v48 = vpop.permute.xlu0 %11528 }
 0x299   : > { %11109 = vmatprep.subr.msk.bf16.mxu0 %vm12533_vm4, %v11107_v34  ;;  %10457 = vmatmul.mubr.msk.f32.vlgmr.msra.gmra.mrb[38].mxu1 %vm1795_vm3, %v1454_v46  ;;  %v11119_v46 = vpack.c.bf16 %v11496_v58, %v11495_v45  ;;  %v11531_v25 = vunpack.i.h.bf16 %v11529_v48  ;;  %v11530_v47 = vunpack.i.l.bf16 %v11529_v48  ;;  %v11131_v23 = vpack.c.bf16 %v11526_v59, %v11525_v4 }
 0x29a   : > { %v1474_v39 = vpop.permute.xlu1 %1473  ;;  %11106 = vmatpush3.bf16.xpose.msk.msra.mxu1 %vm12533_vm4, %v11101_v21  ;;  %10470 = vmatprep.mubr.msk.f32.mxu1 %vm1795_vm3, %v12850_v44 }
 0x29b   : > { %11115 = vmatprep.subr.msk.bf16.mxu1 %vm12533_vm4, %v11113_v52 }
 0x29c   : > { %v1456_v8 = vpop.permute.xlu0 %1455 }
 0x29d   : > { %10463 = vmatprep.mubr.msk.f32.mxu0 %vm1795_vm3, %v1456_v8 }
 0x29e   : > { %v1476_v40 = vpop.permute.xlu1 %1475 }
 0x29f   : > { %10464 = vmatmul.mubr.msk.f32.vlgmr.msra.gmra.mrb[54].mxu0 %vm1795_vm3, %v1458_v29 }
 0x2a0   : > { %11112 = vmatpush3.bf16.xpose.msk.msra.mxu0 %vm12533_vm4, %v11107_v34  ;;  %10477 = vmatprep.mubr.msk.f32.mxu0 %vm1795_vm3, %v12888_v1  ;;  %v1478_v44 = vpop.permute.xlu0 %1477 }
 0x2a1   : > { %11121 = vmatprep.subr.msk.bf16.mxu0 %vm12533_vm4, %v11119_v46  ;;  %10471 = vmatmul.mubr.msk.f32.vlgmr.msra.gmra.mrb[40].mxu1 %vm1795_vm3, %v12848_v36 }
 0x2a2   : > { %v1482_v63 = vpop.permute.xlu1 %1481  ;;  %11118 = vmatpush3.bf16.xpose.msk.msra.mxu1 %vm12533_vm4, %v11113_v52  ;;  %10484 = vmatprep.mubr.msk.f32.mxu1 %vm1795_vm3, %v12899_v38  ;;  %v11137_v38 = vpack.c.bf16 %v11531_v25, %v11530_v47 }
 0x2a3   : > { %11127 = vmatprep.subr.msk.bf16.mxu1 %vm12533_vm4, %v11125_v26 }
 0x2a4   : > { %v1480_v1 = vpop.permute.xlu0 %1479 }
 0x2a6   : > { %v1484_v14 = vpop.permute.xlu1 %1483 }
 0x2a7   : > { %10478 = vmatmul.mubr.msk.f32.vlgmr.msra.gmra.mrb[56].mxu0 %vm1795_vm3, %v12864_v27 }
 0x2a8   : > { %11124 = vmatpush3.bf16.xpose.msk.msra.mxu0 %vm12533_vm4, %v11119_v46  ;;  %10491 = vmatprep.mubr.msk.f32.mxu0 %vm1795_vm3, %v1472_v10  ;;  %v11534_v36 = vpop.permute.xlu0 %11533 }
 0x2a9   : > { %11133 = vmatprep.subr.msk.bf16.mxu0 %vm12533_vm4, %v11131_v23  ;;  %10485 = vmatmul.mubr.msk.f32.vlgmr.msra.gmra.mrb[42].mxu1 %vm1795_vm3, %v12965_v31  ;;  %v11536_v29 = vunpack.i.h.bf16 %v11534_v36  ;;  %v11535_v6 = vunpack.i.l.bf16 %v11534_v36 }
 0x2aa   : > { %v11539_v35 = vpop.permute.xlu1 %11538  ;;  %11130 = vmatpush3.bf16.xpose.msk.msra.mxu1 %vm12533_vm4, %v11125_v26  ;;  %10498 = vmatprep.mubr.msk.f32.mxu1 %vm1795_vm3, %v1476_v40 }
 0x2ab   : > { %11139 = vmatprep.subr.msk.bf16.mxu1 %vm12533_vm4, %v11137_v38  ;;  %v11149_v42 = vpack.c.bf16 %v11536_v29, %v11535_v6  ;;  %v11541_v51 = vunpack.i.h.bf16 %v11539_v35  ;;  %v11540_v24 = vunpack.i.l.bf16 %v11539_v35 }
 0x2ac   : > { %v1486_v27 = vpop.permute.xlu0 %1485 }
 0x2ad   : > { %v11155_v48 = vpack.c.bf16 %v11541_v51, %v11540_v24 }
 0x2ae   : > { %v1490_v21 = vpop.permute.xlu1 %1489 }
 0x2af   : > { %10492 = vmatmul.mubr.msk.f32.vlgmr.msra.gmra.mrb[58].mxu0 %vm1795_vm3, %v1474_v39 }
 0x2b0   : > { %11136 = vmatpush3.bf16.xpose.msk.msra.mxu0 %vm12533_vm4, %v11131_v23  ;;  %10505 = vmatprep.mubr.msk.f32.mxu0 %vm1795_vm3, %v1480_v1  ;;  %v11544_v31 = vpop.permute.xlu0 %11543 }
 0x2b1   : > { %10499 = vmatmul.mubr.msk.f32.vlgmr.msra.gmra.mrb[44].mxu1 %vm1795_vm3, %v1478_v44  ;;  %v11546_v12 = vunpack.i.h.bf16 %v11544_v31  ;;  %v11545_v43 = vunpack.i.l.bf16 %v11544_v31 }
 0x2b2   : > { %v11549_v18 = vpop.permute.xlu1 %11548  ;;  %11142 = vmatpush3.bf16.xpose.msk.msra.mxu1 %vm12533_vm4, %v11137_v38  ;;  %10512 = vmatprep.mubr.msk.f32.mxu1 %vm1795_vm3, %v1484_v14 }
 0x2b3   : > { %v11551_v61 = vunpack.i.h.bf16 %v11549_v18  ;;  %v11550_v10 = vunpack.i.l.bf16 %v11549_v18  ;;  %11151 = vmatprep.subr.msk.bf16.mxu1 %vm12533_vm4, %v11149_v42  ;;  %v11161_v39 = vpack.c.bf16 %v11546_v12, %v11545_v43 }
 0x2b4   : > { %v1494_v20 = vpop.permute.xlu0 %1493 }
 0x2b5   : > { %v11143_v30 = vpack.c.bf16 %v11551_v61, %v11550_v10 }
 0x2b6   : > { %v1492_v34 = vpop.permute.xlu1 %1491 }
 0x2b7   : > { %10506 = vmatmul.mubr.msk.f32.vlgmr.msra.gmra.mrb[60].mxu0 %vm1795_vm3, %v1482_v63  ;;  %11145 = vmatprep.subr.msk.bf16.mxu0 %vm12533_vm4, %v11143_v30 }
 0x2b8   : > { %11148 = vmatpush3.bf16.xpose.msk.msra.mxu0 %vm12533_vm4, %v11143_v30  ;;  %v1496_v52 = vpop.permute.xlu0 %1495 }
 0x2b9   : > { %11157 = vmatprep.subr.msk.bf16.mxu0 %vm12533_vm4, %v11155_v48  ;;  %10513 = vmatmul.mubr.msk.f32.vlgmr.msra.gmra.mrb[46].mxu1 %vm1795_vm3, %v1486_v27 }
 0x2ba   : > { %v11554_v58 = vpop.permute.xlu1 %11553  ;;  %11154 = vmatpush3.bf16.xpose.msk.msra.mxu1 %vm12533_vm4, %v11149_v42  ;;  %10526 = vmatprep.mubr.msk.f32.mxu1 %vm1795_vm3, %v1492_v34 }
 0x2bb   : > { %v11556_v45 = vunpack.i.h.bf16 %v11554_v58  ;;  %v11555_v8 = vunpack.i.l.bf16 %v11554_v58  ;;  %11163 = vmatprep.subr.msk.bf16.mxu1 %vm12533_vm4, %v11161_v39 }
 0x2bc   : > { %v1488_v16 = vpop.permute.xlu0 %1487  ;;  %v10360_v28 = vpop.f32.mrb[38].mxu0 }
 0x2bd   : > { %v13056_v40 = vmul.f32 0.25, %v10360_v28  ;;  %v1870_v46 = vpop.f32.mrb[39].mxu0  ;;  %10519 = vmatprep.mubr.msk.f32.mxu0 %vm1795_vm3, %v1488_v16  ;;  %v11167_v63 = vpack.c.bf16 %v11556_v45, %v11555_v8 }
 0x2be   : > { %v1498_v44 = vpop.permute.xlu1 %1497  ;;  %v13059_v26 = vmul.f32 0.25, %v1870_v46 }
 0x2bf   : > { %10520 = vmatmul.mubr.msk.f32.vlgmr.msra.gmra.mrb[62].mxu0 %vm1795_vm3, %v1490_v21  ;;  %v4519_v59 = vsel %vm1795_vm3, %v13056_v40, -inf }
 0x2c0   : > { %11160 = vmatpush3.bf16.xpose.msk.msra.mxu0 %vm12533_vm4, %v11155_v48  ;;  %10533 = vmatprep.mubr.msk.f32.mxu0 %vm1795_vm3, %v1496_v52  ;;  %v11559_v4 = vpop.permute.xlu0 %11558  ;;  %v4516_v1 = vsel %vm1795_vm3, %v13059_v26, -inf }
 0x2c1   : > { %v11561_v25 = vunpack.i.h.bf16 %v11559_v4  ;;  %v11560_v47 = vunpack.i.l.bf16 %v11559_v4  ;;  %11169 = vmatprep.subr.msk.bf16.mxu0 %vm12533_vm4, %v11167_v63  ;;  %4520 = vmax.xlane.f32.xlu1 %v4519_v59 }
 0x2c2   : > { %v1500_v14 = vpop.permute.xlu1 %1499  ;;  %10527 = vmatmul.mubr.msk.f32.vlgmr.msra.gmra.mrb[48].mxu1 %vm1795_vm3, %v1494_v20  ;;  %4517 = vmax.xlane.f32.xlu0 %v4516_v1 }
 0x2c3   : > { %v11173_v23 = vpack.c.bf16 %v11561_v25, %v11560_v47  ;;  %11166 = vmatpush3.bf16.xpose.msk.msra.mxu1 %vm12533_vm4, %v11161_v39  ;;  %10540 = vmatprep.mubr.msk.f32.mxu1 %vm1795_vm3, %v1500_v14 }
 0x2c4   : > { %v10374_v36 = vpop.f32.mrb[26].mxu1  ;;  %v1502_v38 = vpop.permute.xlu0 %1501 }
 0x2c5   : > { %v13075_v35 = vmul.f32 0.25, %v10374_v36  ;;  %v10367_v27 = vpop.f32.mrb[40].mxu0  ;;  %v2036_v29 = vpop.f32.mrb[27].mxu1  ;;  %11175 = vmatprep.subr.msk.bf16.mxu1 %vm12533_vm4, %v11173_v23 }
 0x2c6   : > { %v13079_v6 = vmul.f32 0.25, %v10367_v27  ;;  %v11564_v21 = vpop.permute.xlu1 %11563  ;;  %v1953_v31 = vpop.f32.mrb[41].mxu0  ;;  %v13092_v43 = vmul.f32 0.25, %v2036_v29 }
 0x2c7   : > { %v11566_v42 = vunpack.i.h.bf16 %v11564_v21  ;;  %v11565_v18 = vunpack.i.l.bf16 %v11564_v21  ;;  %v13081_v51 = vmul.f32 0.25, %v1953_v31  ;;  %10534 = vmatmul.mubr.msk.f32.vlgmr.msra.gmra.mrb[64].mxu0 %vm1795_vm3, %v1498_v44  ;;  %v4531_v24 = vsel %vm1795_vm3, %v13075_v35, -inf }
 0x2c8   : > { %11172 = vmatpush3.bf16.xpose.msk.msra.mxu0 %vm12533_vm4, %v11167_v63  ;;  %v1504_v61 = vpop.permute.xlu0 %1503  ;;  %4532 = vmax.xlane.f32.xlu0 %v4531_v24  ;;  %v4525_v10 = vsel %vm1795_vm3, %v13079_v6, -inf  ;;  %v4528_v46 = vsel %vm1795_vm3, %v13092_v43, -inf }
 0x2c9   : > { %v11179_v20 = vpack.c.bf16 %v11566_v42, %v11565_v18  ;;  %4526 = vmax.xlane.f32.xlu1 %v4525_v10  ;;  %10547 = vmatprep.mubr.msk.f32.mxu0 %vm1795_vm3, %v1504_v61  ;;  %v4522_v30 = vsel %vm1795_vm3, %v13081_v51, -inf }
 0x2ca   : > { %v1506_v12 = vpop.permute.xlu1 %1505  ;;  %10541 = vmatmul.mubr.msk.f32.vlgmr.msra.gmra.mrb[50].mxu1 %vm1795_vm3, %v1502_v38 }
 0x2cb   : > { %11178 = vmatpush3.bf16.xpose.msk.msra.mxu1 %vm12533_vm4, %v11173_v23  ;;  %11181 = vmatprep.subr.msk.bf16.mxu0 %vm12533_vm4, %v11179_v20 }
 0x2cc   : > { %v11569_v34 = vpop.permute.xlu0 %11568  ;;  %4523 = vmax.xlane.f32.xlu0 %v4522_v30 }
 0x2cd   : > { %v11571_v48 = vunpack.i.h.bf16 %v11569_v34  ;;  %v11570_v52 = vunpack.i.l.bf16 %v11569_v34  ;;  %v10381_v39 = vpop.f32.mrb[42].mxu0 }
 0x2ce   : > { %v13100_v58 = vmul.f32 0.25, %v10381_v39  ;;  %v1508_v45 = vpop.permute.xlu1 %1507  ;;  %v10388_v8 = vpop.f32.mrb[28].mxu1 }
 0x2cf   : > { %v11185_v16 = vpack.c.bf16 %v11571_v48, %v11570_v52  ;;  %10548 = vmatmul.mubr.msk.f32.vlgmr.msra.gmra.mrb[66].mxu0 %vm1795_vm3, %v1506_v12  ;;  %10554 = vmatprep.mubr.msk.f32.mxu1 %vm1795_vm3, %v1508_v45  ;;  %v13104_v28 = vmul.f32 0.25, %v10388_v8  ;;  %v2119_v44 = vpop.f32.mrb[43].mxu0  ;;  %v2202_v63 = vpop.f32.mrb[29].mxu1 }
 0x2d0   : > { %11184 = vmatpush3.bf16.xpose.msk.msra.mxu0 %vm12533_vm4, %v11179_v20  ;;  %v1510_v59 = vpop.permute.xlu0 %1509  ;;  %4529 = vmax.xlane.f32.xlu0 %v4528_v46  ;;  %v4537_v4 = vsel %vm1795_vm3, %v13100_v58, -inf  ;;  %v13112_v1 = vmul.f32 0.25, %v2119_v44  ;;  %v13116_v25 = vmul.f32 0.25, %v2202_v63 }
 0x2d1   : > { %4538 = vmax.xlane.f32.xlu1 %v4537_v4  ;;  %11187 = vmatprep.subr.msk.bf16.mxu1 %vm12533_vm4, %v11185_v16  ;;  %v4543_v47 = vsel %vm1795_vm3, %v13104_v28, -inf }
 0x2d2   : > { %v11574_v14 = vpop.permute.xlu1 %11573  ;;  %10555 = vmatmul.mubr.msk.f32.vlgmr.msra.gmra.mrb[52].mxu1 %vm1795_vm3, %v1510_v59  ;;  %v4534_v23 = vsel %vm1795_vm3, %v13112_v1, -inf  ;;  %v4540_v31 = vsel %vm1795_vm3, %v13116_v25, -inf }
 0x2d3   : > { %v11576_v36 = vunpack.i.h.bf16 %v11574_v14  ;;  %v11575_v38 = vunpack.i.l.bf16 %v11574_v14  ;;  %11190 = vmatpush3.bf16.xpose.msk.msra.mxu1 %vm12533_vm4, %v11185_v16 }
 0x2d4   : > { %11198 = vmatprep.subr.bf16.mxu1 %v12713_v56  ;;  %v1512_v27 = vpop.permute.xlu0 %1511  ;;  %4544 = vmax.xlane.f32.xlu0 %v4543_v47 }
 0x2d5   : > { %v11191_v29 = vpack.c.bf16 %v11576_v36, %v11575_v38  ;;  %4535 = vmax.xlane.f32.xlu1 %v4534_v23  ;;  %v10395_v21 = vpop.f32.mrb[44].mxu0  ;;  %10561 = vmatprep.mubr.msk.f32.mxu0 %vm1795_vm3, %v1512_v27 }
 0x2d6   : > { %v13129_v42 = vmul.f32 0.25, %v10395_v21  ;;  %v1514_v18 = vpop.permute.xlu1 %1513  ;;  %v10402_v24 = vpop.f32.mrb[30].mxu1 }
 0x2d7   : > { %10562 = vmatmul.mubr.msk.f32.vlgmr.msra.gmra.mrb[68].mxu0 %vm1795_vm3, %v1514_v18  ;;  %11193 = vmatprep.subr.msk.bf16.mxu0 %vm12533_vm4, %v11191_v29  ;;  %v13134_v61 = vmul.f32 0.25, %v10402_v24  ;;  %v2285_v10 = vpop.f32.mrb[45].mxu0  ;;  %v2368_v20 = vpop.f32.mrb[31].mxu1 }
 0x2d8   : > { %11196 = vmatpush3.bf16.xpose.msk.msra.mxu0 %vm12533_vm4, %v11191_v29  ;;  %v1516_v12 = vpop.permute.xlu0 %1515  ;;  %4541 = vmax.xlane.f32.xlu0 %v4540_v31  ;;  %v4549_v30 = vsel %vm1795_vm3, %v13129_v42, -inf  ;;  %v13140_v34 = vmul.f32 0.25, %v2285_v10  ;;  %v13143_v48 = vmul.f32 0.25, %v2368_v20 }
 0x2d9   : > { %11202 = vmatprep.subr.bf16.mxu0 %v12743_v37  ;;  %4550 = vmax.xlane.f32.xlu1 %v4549_v30  ;;  %v4555_v52 = vsel %vm1795_vm3, %v13134_v61, -inf }
 0x2da   : > { %v1518_v39 = vpop.permute.xlu1 %1517  ;;  %10568 = vmatprep.mubr.msk.f32.mxu1 %vm1795_vm3, %v1516_v12  ;;  %v4546_v32 = vsel %vm1795_vm3, %v13140_v34, -inf  ;;  %v4552_v16 = vsel %vm1795_vm3, %v13143_v48, -inf }
 0x2db   : > { %10569 = vmatmul.mubr.msk.f32.vlgmr.msra.gmra.mrb[54].mxu1 %vm1795_vm3, %v1518_v39 }
 0x2dc   : > { %11200 = vmatpush3.bf16.msra.mxu1 %v12713_v56  ;;  %v1520_v45 = vpop.permute.xlu0 %1519  ;;  %4556 = vmax.xlane.f32.xlu0 %v4555_v52 }
 0x2dd   : > { %11206 = vmatprep.subr.bf16.mxu1 %v12754_v22  ;;  %4547 = vmax.xlane.f32.xlu1 %v4546_v32  ;;  %v10409_v8 = vpop.f32.mrb[46].mxu0 }
 0x2de   : > { %v13155_v46 = vmul.f32 0.25, %v10409_v8  ;;  %v1522_v44 = vpop.permute.xlu1 %1521  ;;  %10575 = vmatprep.mubr.msk.f32.mxu0 %vm1795_vm3, %v1520_v45  ;;  %v2451_v63 = vpop.f32.mrb[47].mxu0 }
 0x2df   : > { %10576 = vmatmul.mubr.msk.f32.vlgmr.msra.gmra.mrb[70].mxu0 %vm1795_vm3, %v1522_v44  ;;  %v13159_v59 = vmul.f32 0.25, %v2451_v63 }
 0x2e0   : > { %11204 = vmatpush3.bf16.msra.mxu0 %v12743_v37  ;;  %4553 = vmax.xlane.f32.xlu0 %v4552_v16  ;;  %v4561_v56 = vsel %vm1795_vm3, %v13155_v46, -inf  ;;  %v13167_v47 = vpop.permute.xlu0 %11593 }
 0x2e1   : > { %11210 = vmatprep.subr.bf16.mxu0 %v12715_v2  ;;  %4562 = vmax.xlane.f32.xlu1 %v4561_v56  ;;  %v4558_v4 = vsel %vm1795_vm3, %v13159_v59, -inf  ;;  %15052 = vst [vmem:[#allocation33_spill] sm:$0xff] %v13167_v47 }
 0x2e2   : > { %v13169_v14 = vpop.permute.xlu1 %11578 }
 0x2e3   : > { %15053 = vst [vmem:[#allocation34_spill] sm:$0xff] %v13169_v14 }
 0x2e4   : > { %v13171_v23 = vpop.permute.xlu0 %11603 }
 0x2e5   : > { %4559 = vmax.xlane.f32.xlu1 %v4558_v4  ;;  %15054 = vst [vmem:[#allocation35_spill] sm:$0xff] %v13171_v23 }
 0x2e6   : > { %v13173_v36 = vpop.permute.xlu1 %11583 }
 0x2e7   : > { %15055 = vst [vmem:[#allocation36_spill] sm:$0xff] %v13173_v36 }
 0x2e8   : > { %v13177_v29 = vpop.permute.xlu0 %11613 }
 0x2e9   : > { %15056 = vst [vmem:[#allocation37_spill] sm:$0xff] %v13177_v29 }
 0x2ea   : > { %v13179_v21 = vpop.permute.xlu1 %11588 }
 0x2eb   : > { %15057 = vst [vmem:[#allocation38_spill] sm:$0xff] %v13179_v21 }
 0x2ec   : > { %v13187_v10 = vpop.permute.xlu0 %11618 }
 0x2ed   : > { %15058 = vst [vmem:[#allocation39_spill] sm:$0xff] %v13187_v10 }
 0x2ee   : > { %v13189_v20 = vpop.permute.xlu1 %11598 }
 0x2ef   : > { %15059 = vst [vmem:[#allocation40_spill] sm:$0xff] %v13189_v20 }
 0x2f0   : > { %v13197_v45 = vpop.permute.xlu0 %11628 }
 0x2f1   : > { %15060 = vst [vmem:[#allocation41_spill] sm:$0xff] %v13197_v45 }
 0x2f2   : > { %v13199_v16 = vpop.permute.xlu1 %11608 }
 0x2f3   : > { %15061 = vst [vmem:[#allocation42_spill] sm:$0xff] %v13199_v16 }
 0x338   : > { %v10416_v37 = vpop.f32.mrb[32].mxu1 }
 0x339   : > { %v13175_v38 = vmul.f32 0.25, %v10416_v37  ;;  %v2534_v27 = vpop.f32.mrb[33].mxu1 }
 0x33a   : > { %v13181_v31 = vmul.f32 0.25, %v2534_v27  ;;  %v13209_v27 = vpop.permute.xlu0 %11633 }
 0x33b   : > { %v4567_v18 = vsel %vm1795_vm3, %v13175_v38, -inf  ;;  %15062 = vst [vmem:[#allocation43_spill] sm:$0xff] %v13209_v27 }
 0x33c   : > { %4568 = vmax.xlane.f32.xlu0 %v4567_v18  ;;  %v4564_v24 = vsel %vm1795_vm3, %v13181_v31, -inf  ;;  %v13211_v18 = vpop.permute.xlu1 %11623 }
 0x33d   : > { %15063 = vst [vmem:[#allocation44_spill] sm:$0xff] %v13211_v18 }
 0x340   : > { %4565 = vmax.xlane.f32.xlu0 %v4564_v24 }
 0x341   : > { %v10423_v12 = vpop.f32.mrb[48].mxu0 }
 0x342   : > { %v13191_v30 = vmul.f32 0.25, %v10423_v12  ;;  %v2617_v52 = vpop.f32.mrb[49].mxu0  ;;  %v13215_v12 = vpop.permute.xlu0 %11638 }
 0x343   : > { %v13193_v39 = vmul.f32 0.25, %v2617_v52  ;;  %15064 = vst [vmem:[#allocation45_spill] sm:$0xff] %v13215_v12  ;;  %v13217_v52 = vpop.permute.xlu1 %11648 }
 0x344   : > { %v4573_v32 = vsel %vm1795_vm3, %v13191_v30, -inf  ;;  %15065 = vst [vmem:[#allocation46_spill] sm:$0xff] %v13217_v52 }
 0x345   : > { %4574 = vmax.xlane.f32.xlu1 %v4573_v32  ;;  %v4570_v56 = vsel %vm1795_vm3, %v13193_v39, -inf }
 0x346   : > { %v10430_v8 = vpop.f32.mrb[34].mxu1 }
 0x347   : > { %v13201_v44 = vmul.f32 0.25, %v10430_v8  ;;  %v2700_v63 = vpop.f32.mrb[35].mxu1  ;;  %v13223_v17 = vpop.permute.xlu1 %11658 }
 0x348   : > { %v13205_v4 = vmul.f32 0.25, %v2700_v63  ;;  %15067 = vst [vmem:[#allocation48_spill] sm:$0xff] %v13223_v17 }
 0x349   : > { %4571 = vmax.xlane.f32.xlu1 %v4570_v56  ;;  %v4579_v37 = vsel %vm1795_vm3, %v13201_v44, -inf  ;;  %v13221_v56 = vpop.permute.xlu0 %11643 }
 0x34a   : > { %4580 = vmax.xlane.f32.xlu0 %v4579_v37  ;;  %v4576_v24 = vsel %vm1795_vm3, %v13205_v4, -inf  ;;  %15066 = vst [vmem:[#allocation47_spill] sm:$0xff] %v13221_v56 }
 0x34b   : > { %v13235_v7 = vpop.permute.xlu1 %11663 }
 0x34c   : > { %15069 = vst [vmem:[#allocation50_spill] sm:$0xff] %v13235_v7 }
 0x34e   : > { %4577 = vmax.xlane.f32.xlu0 %v4576_v24 }
 0x34f   : > { %v13245_v3 = vpop.permute.xlu1 %11668 }
 0x350   : > { %15071 = vst [vmem:[#allocation52_spill] sm:$0xff] %v13245_v3 }
 0x356   : > { %v10437_v32 = vpop.f32.mrb[50].mxu0 }
 0x357   : > { %v13219_v8 = vmul.f32 0.25, %v10437_v32  ;;  %v2783_v63 = vpop.f32.mrb[51].mxu0  ;;  %v13233_v32 = vpop.permute.xlu0 %11653 }
 0x358   : > { %v13225_v37 = vmul.f32 0.25, %v2783_v63  ;;  %15068 = vst [vmem:[#allocation49_spill] sm:$0xff] %v13233_v32 }
 0x359   : > { %v4585_v15 = vsel %vm1795_vm3, %v13219_v8, -inf }
 0x35a   : > { %4586 = vmax.xlane.f32.xlu1 %v4585_v15  ;;  %v4582_v9 = vsel %vm1795_vm3, %v13225_v37, -inf }
 0x35c   : > { %v10444_v13 = vpop.f32.mrb[36].mxu1 }
 0x35d   : > { %v13229_v24 = vmul.f32 0.25, %v10444_v13  ;;  %v2866_v11 = vpop.f32.mrb[37].mxu1  ;;  %v13243_v13 = vpop.permute.xlu0 %11678 }
 0x35e   : > { %4583 = vmax.xlane.f32.xlu1 %v4582_v9  ;;  %v13237_v5 = vmul.f32 0.25, %v2866_v11  ;;  %15070 = vst [vmem:[#allocation51_spill] sm:$0xff] %v13243_v13 }
 0x35f   : > { %v4591_v63 = vsel %vm1795_vm3, %v13229_v24, -inf }
 0x360   : > { %4592 = vmax.xlane.f32.xlu0 %v4591_v63  ;;  %v4588_v15 = vsel %vm1795_vm3, %v13237_v5, -inf  ;;  %v13255_v63 = vpop.permute.xlu1 %11673 }
 0x361   : > { %v13253_v57 = vpop.permute.xlu0 %11683  ;;  %15073 = vst [vmem:[#allocation54_spill] sm:$0xff] %v13255_v63 }
 0x362   : > { %15072 = vst [vmem:[#allocation53_spill] sm:$0xff] %v13253_v57 }
 0x364   : > { %4589 = vmax.xlane.f32.xlu0 %v4588_v15 }
 0x365   : > { %v4518_v27 = vpop.xlane.xlu0 %4517 }
 0x366   : > { %v10451_v62 = vpop.f32.mrb[52].mxu0 }
 0x367   : > { %v13247_v9 = vmul.f32 0.25, %v10451_v62  ;;  %v2949_v0 = vpop.f32.mrb[53].mxu0  ;;  %v4521_v62 = vpop.xlane.xlu1 %4520 }
 0x368   : > { %v13249_v55 = vmul.f32 0.25, %v2949_v0 }
 0x369   : > { %v4597_v11 = vsel %vm1795_vm3, %v13247_v9, -inf  ;;  %v4533_v45 = vpop.xlane.xlu0 %4532 }
 0x36a   : > { %4598 = vmax.xlane.f32.xlu1 %v4597_v11  ;;  %v4594_v7 = vsel %vm1795_vm3, %v13249_v55, -inf  ;;  %v4709_v11 = vsub.f32 %v13056_v40, %v4521_v62 }
 0x36c   : > { %v10458_v49 = vpop.f32.mrb[38].mxu1 }
 0x36d   : > { %v13257_v15 = vmul.f32 0.25, %v10458_v49  ;;  %v3032_v50 = vpop.f32.mrb[39].mxu1 }
 0x36e   : > { %4595 = vmax.xlane.f32.xlu1 %v4594_v7  ;;  %v13261_v0 = vmul.f32 0.25, %v3032_v50  ;;  %v4708_v7 = vsub.f32 %v13059_v26, %v4518_v27  ;;  %v4527_v26 = vpop.xlane.xlu1 %4526  ;;  %v4524_v27 = vpop.xlane.xlu0 %4523 }
 0x36f   : > { %v4603_v23 = vsel %vm1795_vm3, %v13257_v15, -inf }
 0x370   : > { %4604 = vmax.xlane.f32.xlu0 %v4603_v23  ;;  %v4600_v57 = vsel %vm1795_vm3, %v13261_v0, -inf  ;;  %v4774_v23 = vmul.f32 1.442695, %v4709_v11  ;;  %v4772_v47 = vmul.f32 1.442695, %v4708_v7  ;;  %v4711_v11 = vsub.f32 %v13079_v6, %v4527_v26 }
 0x372   : > { %v10465_v17 = vpop.f32.mrb[54].mxu0  ;;  %11697 = vpow2.f32 %v4774_v23  ;;  %v4778_v6 = vmul.f32 1.442695, %v4711_v11  ;;  %v4710_v11 = vsub.f32 %v13081_v51, %v4524_v27 }
 0x373   : > { %v13266_v20 = vmul.f32 0.25, %v10465_v17  ;;  %v3115_v49 = vpop.f32.mrb[55].mxu0  ;;  %11699 = vpow2.f32 %v4772_v47 }
 0x374   : > { %v10472_v63 = vpop.f32.mrb[40].mxu1  ;;  %4601 = vmax.xlane.f32.xlu0 %v4600_v57  ;;  %v13271_v50 = vmul.f32 0.25, %v3115_v49  ;;  %11701 = vpow2.f32 %v4778_v6  ;;  %v4776_v33 = vmul.f32 1.442695, %v4710_v11  ;;  %v4539_v6 = vpop.xlane.xlu1 %4538 }
 0x375   : > { %v13273_v32 = vmul.f32 0.25, %v10472_v63  ;;  %v3198_v18 = vpop.f32.mrb[41].mxu1  ;;  %v4609_v40 = vsel %vm1795_vm3, %v13266_v20, -inf  ;;  %v4715_v11 = vsub.f32 %v13100_v58, %v4539_v6 }
 0x376   : > { %4610 = vmax.xlane.f32.xlu1 %v4609_v40  ;;  %v13277_v17 = vmul.f32 0.25, %v3198_v18  ;;  %v4606_v57 = vsel %vm1795_vm3, %v13271_v50, -inf }
 0x377   : > { %v4615_v62 = vsel %vm1795_vm3, %v13273_v32, -inf }
 0x378   : > { %4616 = vmax.xlane.f32.xlu0 %v4615_v62  ;;  %v4612_v18 = vsel %vm1795_vm3, %v13277_v17, -inf  ;;  %v4536_v58 = vpop.xlane.xlu1 %4535 }
 0x37a   : > { %4607 = vmax.xlane.f32.xlu1 %v4606_v57  ;;  %v10479_v63 = vpop.f32.mrb[56].mxu0  ;;  %v4713_v57 = vsub.f32 %v13075_v35, %v4533_v45 }
 0x37b   : > { %v13283_v49 = vmul.f32 0.25, %v10479_v63  ;;  %v3281_v52 = vpop.f32.mrb[57].mxu0  ;;  %v4530_v63 = vpop.xlane.xlu0 %4529 }
 0x37c   : > { %v10486_v40 = vpop.f32.mrb[42].mxu1  ;;  %4613 = vmax.xlane.f32.xlu0 %v4612_v18  ;;  %v13288_v7 = vmul.f32 0.25, %v3281_v52  ;;  %v4782_v26 = vmul.f32 1.442695, %v4713_v57  ;;  %v4712_v18 = vsub.f32 %v13092_v43, %v4530_v63  ;;  %v13306_v45 = vpop.eup %11697 }
 0x37d   : > { %v13290_v62 = vmul.f32 0.25, %v10486_v40  ;;  %v3364_v10 = vpop.f32.mrb[43].mxu1  ;;  %v4621_v23 = vsel %vm1795_vm3, %v13283_v49, -inf  ;;  %v13311_v43 = vpop.eup %11699 }
 0x37e   : > { %4622 = vmax.xlane.f32.xlu1 %v4621_v23  ;;  %v13295_v21 = vmul.f32 0.25, %v3364_v10  ;;  %v4618_v52 = vsel %vm1795_vm3, %v13288_v7, -inf  ;;  %11703 = vpow2.f32 %v4782_v26  ;;  %v4780_v63 = vmul.f32 1.442695, %v4712_v18  ;;  %v13328_v3 = vpop.eup %11701 }
 0x37f   : > { %v4627_v47 = vsel %vm1795_vm3, %v13290_v62, -inf  ;;  %v4545_v51 = vpop.xlane.xlu0 %4544  ;;  %15074 = vst [vmem:[#allocation55_spill] sm:$0xff] %v13328_v3 }
 0x380   : > { %4628 = vmax.xlane.f32.xlu0 %v4627_v47  ;;  %v4624_v10 = vsel %vm1795_vm3, %v13295_v21, -inf  ;;  %11705 = vpow2.f32 %v4780_v63  ;;  %v4717_v63 = vsub.f32 %v13104_v28, %v4545_v51 }
 0x381   : > { %11707 = vpow2.f32 %v4776_v33  ;;  %v4786_v33 = vmul.f32 1.442695, %v4715_v11  ;;  %v4714_v11 = vsub.f32 %v13112_v1, %v4536_v58 }
 0x382   : > { %4619 = vmax.xlane.f32.xlu1 %v4618_v52  ;;  %v10493_v40 = vpop.f32.mrb[58].mxu0  ;;  %v4790_v29 = vmul.f32 1.442695, %v4717_v63 }
 0x383   : > { %v13302_v13 = vmul.f32 0.25, %v10493_v40  ;;  %v3447_v35 = vpop.f32.mrb[59].mxu0  ;;  %v4903_v40 = vsel %vm1795_vm3, %v13306_v45, 0.0  ;;  %11709 = vpow2.f32 %v4786_v33  ;;  %v4784_v33 = vmul.f32 1.442695, %v4714_v11 }
 0x384   : > { %v10500_v23 = vpop.f32.mrb[44].mxu1  ;;  %4625 = vmax.xlane.f32.xlu0 %v4624_v10  ;;  %v13317_v27 = vmul.f32 0.25, %v3447_v35  ;;  %v4900_v10 = vsel %vm1795_vm3, %v13311_v43, 0.0  ;;  %11711 = vpow2.f32 %v4790_v29 }
 0x385   : > { %v3530_v47 = vpop.f32.mrb[45].mxu1  ;;  %v4633_v57 = vsel %vm1795_vm3, %v13302_v13, -inf  ;;  %v13313_v52 = vmul.f32 0.25, %v10500_v23 }
 0x386   : > { %4634 = vmax.xlane.f32.xlu1 %v4633_v57  ;;  %v13321_v26 = vmul.f32 0.25, %v3530_v47  ;;  %v4630_v35 = vsel %vm1795_vm3, %v13317_v27, -inf  ;;  %v4542_v47 = vpop.xlane.xlu0 %4541 }
 0x387   : > { %v4639_v23 = vsel %vm1795_vm3, %v13313_v52, -inf  ;;  %v4716_v36 = vsub.f32 %v13116_v25, %v4542_v47 }
 0x388   : > { %4904 = vadd.xlane.f32.xlu0 %v4903_v40  ;;  %v13333_v56 = vpop.eup %11703 }
 0x389   : > { %v4788_v25 = vmul.f32 1.442695, %v4716_v36 }
 0x38a   : > { %4901 = vadd.xlane.f32.xlu1 %v4900_v10  ;;  %v10507_v53 = vpop.f32.mrb[60].mxu0  ;;  %v4636_v10 = vsel %vm1795_vm3, %v13321_v26, -inf  ;;  %v13344_v12 = vpop.eup %11705 }
 0x38b   : > { %v3613_v18 = vpop.f32.mrb[61].mxu0  ;;  %v13335_v6 = vmul.f32 0.25, %v10507_v53  ;;  %v13349_v63 = vpop.eup %11707  ;;  %v4912_v41 = vsel %vm1795_vm3, %v13344_v12, 0.0  ;;  %11713 = vpow2.f32 %v4788_v25 }
 0x38c   : > { %v10514_v57 = vpop.f32.mrb[46].mxu1  ;;  %4640 = vmax.xlane.f32.xlu0 %v4639_v23  ;;  %v4909_v23 = vsel %vm1795_vm3, %v13328_v3, 0.0  ;;  %15075 = vst [vmem:[#allocation56_spill] sm:$0xff] %v13349_v63  ;;  %v13355_v1 = vmul.f32 0.25, %v3613_v18  ;;  %v4906_v58 = vsel %vm1795_vm3, %v13349_v63, 0.0  ;;  %v4557_v36 = vpop.xlane.xlu0 %4556  ;;  %11715 = vpow2.f32 %v4784_v33 }
 0x38d   : > { %v3696_v40 = vpop.f32.mrb[47].mxu1  ;;  %v13351_v16 = vmul.f32 0.25, %v10514_v57 }
 0x38e   : > { %4631 = vmax.xlane.f32.xlu1 %v4630_v35  ;;  %v4915_v35 = vsel %vm1795_vm3, %v13333_v56, 0.0  ;;  %v13361_v29 = vmul.f32 0.25, %v3696_v40  ;;  %v4642_v25 = vsel %vm1795_vm3, %v13355_v1, -inf  ;;  %v4721_v40 = vsub.f32 %v13134_v61, %v4557_v36 }
 0x38f   : > { %v4651_v57 = vsel %vm1795_vm3, %v13351_v16, -inf }
 0x390   : > { %4637 = vmax.xlane.f32.xlu0 %v4636_v10  ;;  %v4645_v10 = vsel %vm1795_vm3, %v13335_v6, -inf  ;;  %v4648_v19 = vsel %vm1795_vm3, %v13361_v29, -inf  ;;  %v4798_v60 = vmul.f32 1.442695, %v4721_v40  ;;  %v4554_v36 = vpop.xlane.xlu0 %4553 }
 0x392   : > { %4910 = vadd.xlane.f32.xlu1 %v4909_v23  ;;  %v10521_v28 = vpop.f32.mrb[62].mxu0  ;;  %v4551_v23 = vpop.xlane.xlu1 %4550 }
 0x393   : > { %v13340_v51 = vpop.f32.mrb[63].mxu0 }
 0x394   : > { %4916 = vadd.xlane.f32.xlu0 %v4915_v35 }
 0x395   : > { %v10528_v53 = vpop.f32.mrb[48].mxu1 }
 0x396   : > { %v3862_v47 = vpop.f32.mrb[49].mxu1  ;;  %4646 = vmax.xlane.f32.xlu1 %v4645_v10  ;;  %v4548_v18 = vpop.xlane.xlu1 %4547 }
 0x398   : > { %4913 = vadd.xlane.f32.xlu0 %v4912_v41  ;;  %v4719_v41 = vsub.f32 %v13129_v42, %v4551_v23  ;;  %v4718_v23 = vsub.f32 %v13140_v34, %v4548_v18 }
 0x39a   : > { %4907 = vadd.xlane.f32.xlu1 %v4906_v58  ;;  %v13359_v35 = vpop.f32.mrb[64].mxu0  ;;  %v13372_v58 = vpop.eup %11709  ;;  %v4794_v42 = vmul.f32 1.442695, %v4719_v41  ;;  %v4792_v34 = vmul.f32 1.442695, %v4718_v23 }
 0x39b   : > { %v13363_v10 = vpop.f32.mrb[65].mxu0  ;;  %15076 = vst [vmem:[#allocation57_spill] sm:$0xff] %v13372_v58  ;;  %v13379_v33 = vpop.eup %11711  ;;  %v4921_v2 = vsel %vm1795_vm3, %v13372_v58, 0.0  ;;  %v13403_v58 = vmul.f32 0.25, %v10528_v53 }
 0x39c   : > { %4652 = vmax.xlane.f32.xlu0 %v4651_v57  ;;  %15077 = vst [vmem:[#allocation58_spill] sm:$0xff] %v13379_v33  ;;  %v13382_v57 = vmul.f32 0.25, %v10521_v28  ;;  %v4927_v3 = vsel %vm1795_vm3, %v13379_v33, 0.0  ;;  %v13392_v63 = vpop.eup %11713  ;;  %11717 = vpow2.f32 %v4794_v42  ;;  %v4563_v40 = vpop.xlane.xlu1 %4562 }
 0x39d   : > { %v13368_v11 = vpop.f32.mrb[50].mxu1  ;;  %15078 = vst [vmem:[#allocation59_spill] sm:$0xff] %v13392_v63  ;;  %v13398_v41 = vpop.eup %11715  ;;  %11719 = vpow2.f32 %v4798_v60  ;;  %15080 = vst [vmem:[#allocation61_spill] sm:$0xff] %v13403_v58  ;;  %v4924_v42 = vsel %vm1795_vm3, %v13392_v63, 0.0  ;;  %v4663_v53 = vsel %vm1795_vm3, %v13403_v58, -inf  ;;  %v4723_v33 = vsub.f32 %v13155_v46, %v4563_v40 }
 0x39e   : > { %v13375_v14 = vpop.f32.mrb[51].mxu1  ;;  %4643 = vmax.xlane.f32.xlu1 %v4642_v25  ;;  %v4657_v28 = vsel %vm1795_vm3, %v13382_v57, -inf  ;;  %15079 = vst [vmem:[#allocation60_spill] sm:$0xff] %v13398_v41  ;;  %11721 = vpow2.f32 %v4792_v34  ;;  %v4918_v23 = vsel %vm1795_vm3, %v13398_v41, 0.0 }
 0x39f   : > { %v4802_v63 = vmul.f32 1.442695, %v4723_v33 }
 0x3a0   : > { %4649 = vmax.xlane.f32.xlu0 %v4648_v19  ;;  %v4560_v34 = vpop.xlane.xlu1 %4559 }
 0x3a1   : > { %v4722_v46 = vsub.f32 %v13159_v59, %v4560_v34  ;;  %v13440_v59 = vmul.f32 0.25, %v13363_v10  ;;  %v13454_v10 = vmul.f32 0.25, %v13368_v11 }
 0x3a2   : > { %4922 = vadd.xlane.f32.xlu1 %v4921_v2  ;;  %v13386_v61 = vpop.f32.mrb[66].mxu0  ;;  %v4720_v2 = vsub.f32 %v13143_v48, %v4554_v36  ;;  %v13412_v36 = vmul.f32 0.25, %v3862_v47 }
 0x3a3   : > { %v13388_v25 = vpop.f32.mrb[67].mxu0  ;;  %v4800_v58 = vmul.f32 1.442695, %v4722_v46 }
 0x3a4   : > { %4928 = vadd.xlane.f32.xlu0 %v4927_v3  ;;  %v13408_v3 = vmul.f32 0.25, %v13340_v51  ;;  %v4796_v60 = vmul.f32 1.442695, %v4720_v2  ;;  %15082 = vst [vmem:[#allocation63_spill] sm:$0xff] %v13412_v36  ;;  %v4660_v47 = vsel %vm1795_vm3, %v13412_v36, -inf }
 0x3a5   : > { %v13394_v19 = vpop.f32.mrb[52].mxu1 }
 0x3a6   : > { %v13401_v18 = vpop.f32.mrb[53].mxu1  ;;  %4658 = vmax.xlane.f32.xlu1 %v4657_v28  ;;  %15081 = vst [vmem:[#allocation62_spill] sm:$0xff] %v13408_v3  ;;  %v4654_v51 = vsel %vm1795_vm3, %v13408_v3, -inf  ;;  %11723 = vpow2.f32 %v4796_v60 }
 0x3a7   : > { %11725 = vpow2.f32 %v4802_v63  ;;  %v4666_v63 = vsel %vm1795_vm3, %v13440_v59, -inf }
 0x3a8   : > { %4925 = vadd.xlane.f32.xlu0 %v4924_v42  ;;  %v13421_v42 = vpop.eup %11717  ;;  %11727 = vpow2.f32 %v4800_v58  ;;  %v4675_v58 = vsel %vm1795_vm3, %v13454_v10, -inf }
 0x3a9   : > { %v13427_v41 = vpop.eup %11719  ;;  %v4933_v40 = vsel %vm1795_vm3, %v13421_v42, 0.0 }
 0x3aa   : > { %4919 = vadd.xlane.f32.xlu1 %v4918_v23  ;;  %v10563_v48 = vpop.f32.mrb[68].mxu0  ;;  %v4939_v36 = vsel %vm1795_vm3, %v13427_v41, 0.0 }
 0x3ab   : > { %v13414_v28 = vpop.f32.mrb[69].mxu0 }
 0x3ac   : > { %4664 = vmax.xlane.f32.xlu0 %v4663_v53  ;;  %v13432_v53 = vpop.eup %11721 }
 0x3ad   : > { %v4930_v33 = vsel %vm1795_vm3, %v13432_v53, 0.0 }
 0x3ae   : > { %v10570_v2 = vpop.f32.mrb[54].mxu1  ;;  %4655 = vmax.xlane.f32.xlu1 %v4654_v51  ;;  %v13435_v51 = vmul.f32 0.25, %v13359_v35  ;;  %v13449_v35 = vmul.f32 0.25, %v13375_v14  ;;  %v13463_v14 = vmul.f32 0.25, %v13386_v61  ;;  %v13477_v61 = vmul.f32 0.25, %v13388_v25 }
 0x3af   : > { %v13423_v23 = vpop.f32.mrb[55].mxu1 }
 0x3b0   : > { %4661 = vmax.xlane.f32.xlu0 %v4660_v47  ;;  %v4669_v34 = vsel %vm1795_vm3, %v13435_v51, -inf  ;;  %v13446_v47 = vpop.eup %11723  ;;  %v4672_v46 = vsel %vm1795_vm3, %v13449_v35, -inf  ;;  %15085 = vst [vmem:[#allocation66_spill] sm:$0xff] %v13477_v61 }
 0x3b2   : > { %4934 = vadd.xlane.f32.xlu1 %v4933_v40  ;;  %v10577_v60 = vpop.f32.mrb[70].mxu0  ;;  %v13460_v40 = vpop.eup %11725 }
 0x3b3   : > { %v4443_v3 = vpop.f32.mrb[71].mxu0  ;;  %15083 = vst [vmem:[#allocation64_spill] sm:$0xff] %v13460_v40  ;;  %v4945_v11 = vsel %vm1795_vm3, %v13460_v40, 0.0  ;;  %v13491_v40 = vmul.f32 0.25, %v10570_v2 }
 0x3b4   : > { %4940 = vadd.xlane.f32.xlu0 %v4939_v36  ;;  %v4936_v36 = vsel %vm1795_vm3, %v13446_v47, 0.0 }
 0x3b5   : > { %v4699_v2 = vsel %vm1795_vm3, %v13491_v40, -inf }
 0x3b6   : > { %4931 = vadd.xlane.f32.xlu1 %v4930_v33  ;;  %v13469_v33 = vpop.eup %11727 }
 0x3b7   : > { %15084 = vst [vmem:[#allocation65_spill] sm:$0xff] %v13469_v33 }
 0x3b8   : > { %4670 = vmax.xlane.f32.xlu0 %v4669_v34  ;;  %v13472_v34 = vmul.f32 0.25, %v13394_v19  ;;  %v13486_v19 = vmul.f32 0.25, %v13401_v18 }
 0x3ba   : > { %4667 = vmax.xlane.f32.xlu1 %v4666_v63  ;;  %v4681_v63 = vsel %vm1795_vm3, %v13463_v14, -inf  ;;  %v4684_v18 = vsel %vm1795_vm3, %v13486_v19, -inf }
 0x3bc   : > { %4937 = vadd.xlane.f32.xlu0 %v4936_v36  ;;  %v4942_v36 = vsel %vm1795_vm3, %v13469_v33, 0.0  ;;  %v13496_v33 = vmul.f32 0.25, %v13414_v28 }
 0x3be   : > { %4673 = vmax.xlane.f32.xlu1 %v4672_v46  ;;  %v13481_v46 = vmul.f32 0.25, %v10563_v48  ;;  %v4690_v28 = vsel %vm1795_vm3, %v13496_v33, -inf }
 0x3c0   : > { %4676 = vmax.xlane.f32.xlu0 %v4675_v58  ;;  %v4687_v58 = vsel %vm1795_vm3, %v13472_v34, -inf  ;;  %v4693_v48 = vsel %vm1795_vm3, %v13481_v46, -inf }
 0x3c2   : > { %4946 = vadd.xlane.f32.xlu1 %v4945_v11 }
 0x3c4   : > { %4682 = vmax.xlane.f32.xlu0 %v4681_v63  ;;  %v4678_v63 = vsel %vm1795_vm3, %v13477_v61, -inf }
 0x3c6   : > { %4943 = vadd.xlane.f32.xlu1 %v4942_v36 }
 0x3c8   : > { %4688 = vmax.xlane.f32.xlu0 %v4687_v58 }
 0x3c9   : > { %v4569_v11 = vpop.xlane.xlu0 %4568 }
 0x3ca   : > { %v4725_v25 = vsub.f32 %v13175_v38, %v4569_v11  ;;  %4679 = vmax.xlane.f32.xlu1 %v4678_v63  ;;  %v13501_v38 = vmul.f32 0.25, %v10577_v60  ;;  %v13506_v63 = vmul.f32 0.25, %v13423_v23  ;;  %v13513_v60 = vmul.f32 0.25, %v4443_v3 }
 0x3cc   : > { %v4806_v36 = vmul.f32 1.442695, %v4725_v25  ;;  %4694 = vmax.xlane.f32.xlu0 %v4693_v48 }
 0x3cd   : > { %v4566_v58 = vpop.xlane.xlu0 %4565 }
 0x3ce   : > { %11729 = vpow2.f32 %v4806_v36  ;;  %v4724_v61 = vsub.f32 %v13181_v31, %v4566_v58  ;;  %4685 = vmax.xlane.f32.xlu1 %v4684_v18  ;;  %v4705_v31 = vsel %vm1795_vm3, %v13501_v38, -inf }
 0x3d0   : > { %v4804_v11 = vmul.f32 1.442695, %v4724_v61  ;;  %4700 = vmax.xlane.f32.xlu0 %v4699_v2  ;;  %v4696_v61 = vsel %vm1795_vm3, %v13506_v63, -inf }
 0x3d2   : > { %11731 = vpow2.f32 %v4804_v11  ;;  %v4575_v25 = vpop.xlane.xlu1 %4574  ;;  %4691 = vmax.xlane.f32.xlu1 %v4690_v28  ;;  %v4702_v28 = vsel %vm1795_vm3, %v13513_v60, -inf }
 0x3d3   : > { %v4727_v48 = vsub.f32 %v13191_v30, %v4575_v25 }
 0x3d4   : > { %4706 = vmax.xlane.f32.xlu0 %v4705_v31 }
 0x3d5   : > { %v4810_v36 = vmul.f32 1.442695, %v4727_v48 }
 0x3d6   : > { %v4572_v23 = vpop.xlane.xlu1 %4571  ;;  %4697 = vmax.xlane.f32.xlu1 %v4696_v61 }
 0x3d7   : > { %11733 = vpow2.f32 %v4810_v36  ;;  %v4726_v58 = vsub.f32 %v13193_v39, %v4572_v23  ;;  %v4581_v18 = vpop.xlane.xlu0 %4580 }
 0x3d8   : > { %v13518_v2 = vpop.eup %11729  ;;  %v4729_v30 = vsub.f32 %v13201_v44, %v4581_v18 }
 0x3d9   : > { %v4808_v11 = vmul.f32 1.442695, %v4726_v58  ;;  %v4951_v3 = vsel %vm1795_vm3, %v13518_v2, 0.0 }
 0x3da   : > { %v4814_v25 = vmul.f32 1.442695, %v4729_v30  ;;  %4703 = vmax.xlane.f32.xlu1 %v4702_v28  ;;  %4952 = vadd.xlane.f32.xlu0 %v4951_v3 }
 0x3db   : > { %11735 = vpow2.f32 %v4808_v11  ;;  %v4578_v48 = vpop.xlane.xlu0 %4577 }
 0x3dc   : > { %v13525_v31 = vpop.eup %11731  ;;  %11737 = vpow2.f32 %v4814_v25  ;;  %v4728_v39 = vsub.f32 %v13205_v4, %v4578_v48 }
 0x3dd   : > { %v4948_v44 = vsel %vm1795_vm3, %v13525_v31, 0.0 }
 0x3de   : > { %v4812_v36 = vmul.f32 1.442695, %v4728_v39  ;;  %4949 = vadd.xlane.f32.xlu0 %v4948_v44 }
 0x3e0   : > { %11739 = vpow2.f32 %v4812_v36 }
 0x3e1   : > { %v13530_v61 = vpop.eup %11733 }
 0x3e2   : > { %15086 = vst [vmem:[#allocation67_spill] sm:$0xff] %v13530_v61  ;;  %v4957_v23 = vsel %vm1795_vm3, %v13530_v61, 0.0 }
 0x3e3   : > { %4958 = vadd.xlane.f32.xlu1 %v4957_v23 }
 0x3e5   : > { %v13534_v58 = vpop.eup %11735 }
 0x3e6   : > { %v13536_v18 = vpop.eup %11737  ;;  %v4954_v30 = vsel %vm1795_vm3, %v13534_v58, 0.0 }
 0x3e7   : > { %15087 = vst [vmem:[#allocation68_spill] sm:$0xff] %v13536_v18  ;;  %v4587_v4 = vpop.xlane.xlu1 %4586  ;;  %4955 = vadd.xlane.f32.xlu1 %v4954_v30  ;;  %v4963_v11 = vsel %vm1795_vm3, %v13536_v18, 0.0 }
 0x3e8   : > { %v4731_v28 = vsub.f32 %v13219_v8, %v4587_v4  ;;  %4964 = vadd.xlane.f32.xlu0 %v4963_v11 }
 0x3ea   : > { %v13543_v3 = vpop.eup %11739  ;;  %v4818_v25 = vmul.f32 1.442695, %v4731_v28 }
 0x3eb   : > { %v4584_v48 = vpop.xlane.xlu1 %4583  ;;  %v4960_v39 = vsel %vm1795_vm3, %v13543_v3, 0.0 }
 0x3ec   : > { %11741 = vpow2.f32 %v4818_v25  ;;  %v4730_v44 = vsub.f32 %v13225_v37, %v4584_v48  ;;  %4961 = vadd.xlane.f32.xlu0 %v4960_v39 }
 0x3ed   : > { %v4593_v36 = vpop.xlane.xlu0 %4592 }
 0x3ee   : > { %v4816_v23 = vmul.f32 1.442695, %v4730_v44  ;;  %v4733_v30 = vsub.f32 %v13229_v24, %v4593_v36 }
 0x3f0   : > { %11743 = vpow2.f32 %v4816_v23  ;;  %v4822_v18 = vmul.f32 1.442695, %v4733_v30 }
 0x3f1   : > { %v4590_v61 = vpop.xlane.xlu0 %4589 }
 0x3f2   : > { %11745 = vpow2.f32 %v4822_v18  ;;  %v4732_v8 = vsub.f32 %v13237_v5, %v4590_v61 }
 0x3f4   : > { %v4820_v4 = vmul.f32 1.442695, %v4732_v8 }
 0x3f6   : > { %v13550_v11 = vpop.eup %11741  ;;  %11747 = vpow2.f32 %v4820_v4 }
 0x3f7   : > { %v4599_v28 = vpop.xlane.xlu1 %4598  ;;  %v4969_v25 = vsel %vm1795_vm3, %v13550_v11, 0.0 }
 0x3f8   : > { %v4735_v37 = vsub.f32 %v13247_v9, %v4599_v28  ;;  %4970 = vadd.xlane.f32.xlu1 %v4969_v25 }
 0x3fa   : > { %v13555_v48 = vpop.eup %11743  ;;  %v4826_v24 = vmul.f32 1.442695, %v4735_v37 }
 0x3fb   : > { %v4596_v39 = vpop.xlane.xlu1 %4595  ;;  %v4966_v18 = vsel %vm1795_vm3, %v13555_v48, 0.0 }
 0x3fc   : > { %v13559_v44 = vpop.eup %11745  ;;  %11749 = vpow2.f32 %v4826_v24  ;;  %v4734_v5 = vsub.f32 %v13249_v55, %v4596_v39  ;;  %4967 = vadd.xlane.f32.xlu1 %v4966_v18 }
 0x3fd   : > { %v4605_v61 = vpop.xlane.xlu0 %4604  ;;  %v4975_v36 = vsel %vm1795_vm3, %v13559_v44, 0.0 }
 0x3fe   : > { %v4824_v23 = vmul.f32 1.442695, %v4734_v5  ;;  %v4737_v9 = vsub.f32 %v13257_v15, %v4605_v61  ;;  %4976 = vadd.xlane.f32.xlu0 %v4975_v36 }
 0x400   : > { %v13565_v30 = vpop.eup %11747  ;;  %11751 = vpow2.f32 %v4824_v23  ;;  %v4830_v8 = vmul.f32 1.442695, %v4737_v9 }
 0x401   : > { %v4602_v4 = vpop.xlane.xlu0 %4601  ;;  %v4972_v28 = vsel %vm1795_vm3, %v13565_v30, 0.0 }
 0x402   : > { %11753 = vpow2.f32 %v4830_v8  ;;  %v4736_v55 = vsub.f32 %v13261_v0, %v4602_v4  ;;  %4973 = vadd.xlane.f32.xlu0 %v4972_v28 }
 0x403   : > { %v4611_v25 = vpop.xlane.xlu1 %4610 }
 0x404   : > { %v4828_v37 = vmul.f32 1.442695, %v4736_v55  ;;  %v4739_v24 = vsub.f32 %v13266_v20, %v4611_v25 }
 0x405   : > { %v4617_v39 = vpop.xlane.xlu0 %4616 }
 0x406   : > { %v13571_v18 = vpop.eup %11749  ;;  %11755 = vpow2.f32 %v4828_v37  ;;  %v4834_v15 = vmul.f32 1.442695, %v4739_v24  ;;  %v4741_v5 = vsub.f32 %v13273_v32, %v4617_v39 }
 0x407   : > { %v4608_v61 = vpop.xlane.xlu1 %4607  ;;  %v4981_v36 = vsel %vm1795_vm3, %v13571_v18, 0.0 }
 0x408   : > { %11757 = vpow2.f32 %v4834_v15  ;;  %v4838_v23 = vmul.f32 1.442695, %v4741_v5  ;;  %v4738_v0 = vsub.f32 %v13271_v50, %v4608_v61  ;;  %4982 = vadd.xlane.f32.xlu1 %v4981_v36 }
 0x409   : > { %v4614_v9 = vpop.xlane.xlu0 %4613 }
 0x40a   : > { %v13577_v8 = vpop.eup %11751  ;;  %11759 = vpow2.f32 %v4838_v23  ;;  %v4832_v20 = vmul.f32 1.442695, %v4738_v0  ;;  %v4740_v4 = vsub.f32 %v13277_v17, %v4614_v9 }
 0x40b   : > { %v4623_v28 = vpop.xlane.xlu1 %4622  ;;  %v4978_v32 = vsel %vm1795_vm3, %v13577_v8, 0.0 }
 0x40c   : > { %v13582_v55 = vpop.eup %11753  ;;  %11761 = vpow2.f32 %v4832_v20  ;;  %v4836_v25 = vmul.f32 1.442695, %v4740_v4  ;;  %v4743_v37 = vsub.f32 %v13283_v49, %v4623_v28  ;;  %4979 = vadd.xlane.f32.xlu1 %v4978_v32 }
 0x40d   : > { %v4629_v50 = vpop.xlane.xlu0 %4628  ;;  %v4987_v24 = vsel %vm1795_vm3, %v13582_v55, 0.0 }
 0x40e   : > { %11763 = vpow2.f32 %v4836_v25  ;;  %v4842_v39 = vmul.f32 1.442695, %v4743_v37  ;;  %v4745_v15 = vsub.f32 %v13290_v62, %v4629_v50  ;;  %4988 = vadd.xlane.f32.xlu0 %v4987_v24 }
 0x40f   : > { %v4620_v17 = vpop.xlane.xlu1 %4619 }
 0x410   : > { %v13588_v5 = vpop.eup %11755  ;;  %11765 = vpow2.f32 %v4842_v39  ;;  %v4846_v61 = vmul.f32 1.442695, %v4745_v15  ;;  %v4742_v36 = vsub.f32 %v13288_v7, %v4620_v17 }
 0x411   : > { %v4626_v23 = vpop.xlane.xlu0 %4625  ;;  %v4984_v49 = vsel %vm1795_vm3, %v13588_v5, 0.0 }
 0x412   : > { %v13593_v0 = vpop.eup %11757  ;;  %11767 = vpow2.f32 %v4846_v61  ;;  %v4840_v9 = vmul.f32 1.442695, %v4742_v36  ;;  %v4744_v20 = vsub.f32 %v13295_v21, %v4626_v23  ;;  %4985 = vadd.xlane.f32.xlu0 %v4984_v49 }
 0x413   : > { %v4635_v62 = vpop.xlane.xlu1 %4634  ;;  %v4993_v4 = vsel %vm1795_vm3, %v13593_v0, 0.0 }
 0x414   : > { %v13598_v28 = vpop.eup %11759  ;;  %11769 = vpow2.f32 %v4840_v9  ;;  %v4844_v32 = vmul.f32 1.442695, %v4744_v20  ;;  %v4747_v7 = vsub.f32 %v13302_v13, %v4635_v62  ;;  %4994 = vadd.xlane.f32.xlu1 %v4993_v4 }
 0x415   : > { %v4905_v25 = vpop.xlane.xlu0 %4904  ;;  %v4999_v37 = vsel %vm1795_vm3, %v13598_v28, 0.0 }
 0x416   : > { %v13603_v50 = vpop.eup %11761  ;;  %11771 = vpow2.f32 %v4844_v32  ;;  %v4850_v21 = vmul.f32 1.442695, %v4747_v7  ;;  %5000 = vadd.xlane.f32.xlu0 %v4999_v37 }
 0x417   : > { %11773 = vrcp.f32 %v4905_v25  ;;  %v4902_v24 = vpop.xlane.xlu1 %4901  ;;  %v4990_v39 = vsel %vm1795_vm3, %v13603_v50, 0.0 }
 0x418   : > { %v13607_v15 = vpop.eup %11763  ;;  %11775 = vpow2.f32 %v4850_v21  ;;  %4991 = vadd.xlane.f32.xlu1 %v4990_v39 }
 0x419   : > { %11777 = vrcp.f32 %v4902_v24  ;;  %v4641_v13 = vpop.xlane.xlu0 %4640  ;;  %v4996_v17 = vsel %vm1795_vm3, %v13607_v15, 0.0 }
 0x41a   : > { %v13611_v61 = vpop.eup %11765  ;;  %v4749_v36 = vsub.f32 %v13313_v52, %v4641_v13  ;;  %4997 = vadd.xlane.f32.xlu0 %v4996_v17 }
 0x41b   : > { %v4632_v23 = vpop.xlane.xlu1 %4631  ;;  %v5005_v49 = vsel %vm1795_vm3, %v13611_v61, 0.0 }
 0x41c   : > { %v13616_v9 = vpop.eup %11767  ;;  %v4746_v20 = vsub.f32 %v13317_v27, %v4632_v23  ;;  %5006 = vadd.xlane.f32.xlu1 %v5005_v49  ;;  %v4854_v7 = vmul.f32 1.442695, %v4749_v36 }
 0x41d   : > { %v4638_v62 = vpop.xlane.xlu0 %4637  ;;  %v5011_v4 = vsel %vm1795_vm3, %v13616_v9, 0.0 }
 0x41e   : > { %v13621_v32 = vpop.eup %11769  ;;  %v4848_v25 = vmul.f32 1.442695, %v4746_v20  ;;  %v4748_v52 = vsub.f32 %v13321_v26, %v4638_v62  ;;  %5012 = vadd.xlane.f32.xlu0 %v5011_v4 }
 0x41f   : > { %v4911_v37 = vpop.xlane.xlu1 %4910  ;;  %v5002_v21 = vsel %vm1795_vm3, %v13621_v32, 0.0 }
 0x420   : > { %v13626_v24 = vpop.eup %11771  ;;  %11779 = vpow2.f32 %v4848_v25  ;;  %v4852_v27 = vmul.f32 1.442695, %v4748_v52  ;;  %5003 = vadd.xlane.f32.xlu1 %v5002_v21 }
 0x421   : > { %v11774_v39 = vpop.eup %11773  ;;  %v4917_v13 = vpop.xlane.xlu0 %4916  ;;  %v5008_v17 = vsel %vm1795_vm3, %v13626_v24, 0.0  ;;  %11781 = vpow2.f32 %v4854_v7 }
 0x422   : > { %v13630_v23 = vpop.eup %11775  ;;  %5009 = vadd.xlane.f32.xlu0 %v5008_v17  ;;  %11783 = vpow2.f32 %v4852_v27  ;;  %v5157_v4 = vmul.f32 %v11774_v39, %v13306_v45 }
 0x423   : > { %v11778_v26 = vpop.eup %11777  ;;  %v4647_v36 = vpop.xlane.xlu1 %4646  ;;  %11785 = vrcp.f32 %v4917_v13  ;;  %v5017_v25 = vsel %vm1795_vm3, %v13630_v23, 0.0 }
 0x424   : > { %v4751_v49 = vsub.f32 %v13335_v6, %v4647_v36  ;;  %v5156_v20 = vmul.f32 %v11778_v26, %v13311_v43 }
 0x425   : > { %v4914_v62 = vpop.xlane.xlu0 %4913 }
 0x426   : > { %v4858_v52 = vmul.f32 1.442695, %v4751_v49  ;;  %10582 = vmatprep.mubr.msk.f32.mxu1 %vm1795_vm3, %v5156_v20  ;;  %11787 = vrcp.f32 %v4914_v62  ;;  %5018 = vadd.xlane.f32.xlu0 %v5017_v25 }
 0x427   : > { %11789 = vrcp.f32 %v4911_v37  ;;  %10583 = vmatmul.mubr.msk.f32.vlgmr.msra.gmra.mrb[56].mxu1 %vm1795_vm3, %v5157_v4  ;;  %v4908_v7 = vpop.xlane.xlu1 %4907 }
 0x428   : > { %11791 = vpow2.f32 %v4858_v52  ;;  %11208 = vmatpush3.bf16.msra.mxu1 %v12754_v22 }
 0x429   : > { %11214 = vmatprep.subr.bf16.mxu1 %v12745_v54  ;;  %11793 = vrcp.f32 %v4908_v7  ;;  %v4653_v43 = vpop.xlane.xlu0 %4652 }
 0x42a   : > { %v13641_v45 = vpop.eup %11779  ;;  %v4753_v6 = vsub.f32 %v13351_v16, %v4653_v43 }
 0x42b   : > { %v4644_v21 = vpop.xlane.xlu1 %4643  ;;  %v5014_v27 = vsel %vm1795_vm3, %v13641_v45, 0.0  ;;  %v13646_v39 = vpop.eup %11781 }
 0x42c   : > { %v4750_v37 = vsub.f32 %v13355_v1, %v4644_v21  ;;  %5015 = vadd.xlane.f32.xlu0 %v5014_v27  ;;  %v4862_v13 = vmul.f32 1.442695, %v4753_v6  ;;  %v13649_v22 = vpop.eup %11783  ;;  %v5023_v16 = vsel %vm1795_vm3, %v13646_v39, 0.0 }
 0x42d   : > { %v4650_v17 = vpop.xlane.xlu0 %4649  ;;  %v11786_v49 = vpop.eup %11785 }
 0x42e   : > { %v4856_v26 = vmul.f32 1.442695, %v4750_v37  ;;  %v4752_v36 = vsub.f32 %v13361_v29, %v4650_v17  ;;  %v5020_v29 = vsel %vm1795_vm3, %v13649_v22, 0.0  ;;  %v5161_v27 = vmul.f32 %v11786_v49, %v13333_v56  ;;  %v15091_v56 = vld [vmem:[#allocation30_spill] sm:$0xff]  ;;  %v15092_v49 = vld [vmem:[#allocation27_spill] sm:$0xff] }
 0x42f   : > { %v4923_v20 = vpop.xlane.xlu1 %4922 }
 0x430   : > { %v11788_v62 = vpop.eup %11787  ;;  %11795 = vpow2.f32 %v4856_v26  ;;  %v4860_v4 = vmul.f32 1.442695, %v4752_v36  ;;  %5024 = vadd.xlane.f32.xlu0 %v5023_v16  ;;  %v15090_v26 = vld [vmem:[#allocation55_spill] sm:$0xff] }
 0x431   : > { %v11790_v25 = vpop.eup %11789  ;;  %11797 = vpow2.f32 %v4862_v13  ;;  %v4929_v1 = vpop.xlane.xlu0 %4928  ;;  %v5160_v52 = vmul.f32 %v11788_v62, %v13344_v12  ;;  %v15089_v12 = vld [vmem:[#allocation56_spill] sm:$0xff] }
 0x432   : > { %v13655_v7 = vpop.eup %11791  ;;  %11799 = vpow2.f32 %v4860_v4  ;;  %v5159_v36 = vmul.f32 %v11790_v25, %v15090_v26  ;;  %v15093_v62 = vld [vmem:[#allocation28_spill] sm:$0xff] }
 0x433   : > { %15088 = vst [vmem:[#allocation69_spill] sm:$0xff] %v13655_v7  ;;  %v11794_v43 = vpop.eup %11793  ;;  %v4659_v6 = vpop.xlane.xlu1 %4658  ;;  %10596 = vmatprep.mubr.msk.f32.mxu1 %vm1795_vm3, %v5160_v52  ;;  %v5029_v21 = vsel %vm1795_vm3, %v13655_v7, 0.0  ;;  %11801 = vrcp.f32 %v4929_v1  ;;  %v15094_v1 = vld [vmem:[#allocation61_spill] sm:$0xff] }
 0x434   : > { %v4755_v37 = vsub.f32 %v13382_v57, %v4659_v6  ;;  %5021 = vadd.xlane.f32.xlu0 %v5020_v29  ;;  %5030 = vadd.xlane.f32.xlu1 %v5029_v21  ;;  %v5158_v13 = vmul.f32 %v11794_v43, %v15089_v12  ;;  %v15097_v29 = vld [vmem:[#allocation62_spill] sm:$0xff] }
 0x435   : > { %10597 = vmatmul.mubr.msk.f32.vlgmr.msra.gmra.mrb[58].mxu1 %vm1795_vm3, %v5161_v27  ;;  %v4926_v17 = vpop.xlane.xlu0 %4925 }
 0x436   : > { %v4866_v16 = vmul.f32 1.442695, %v4755_v37  ;;  %10589 = vmatprep.mubr.msk.f32.mxu0 %vm1795_vm3, %v5158_v13  ;;  %11216 = vmatpush3.bf16.msra.mxu1 %v12745_v54  ;;  %11803 = vrcp.f32 %v4926_v17  ;;  %v15098_v17 = vld [vmem:[#allocation63_spill] sm:$0xff] }
 0x437   : > { %11805 = vrcp.f32 %v4923_v20  ;;  %10590 = vmatmul.mubr.msk.f32.vlgmr.msra.gmra.mrb[72].mxu0 %vm1795_vm3, %v5159_v36  ;;  %11222 = vmatprep.subr.bf16.mxu1 %v15091_v56  ;;  %v4920_v57 = vpop.xlane.xlu1 %4919 }
 0x438   : > { %11807 = vpow2.f32 %v4866_v16  ;;  %11212 = vmatpush3.bf16.msra.mxu0 %v15092_v49 }
 0x439   : > { %11218 = vmatprep.subr.bf16.mxu0 %v15093_v62  ;;  %11809 = vrcp.f32 %v4920_v57  ;;  %v4665_v4 = vpop.xlane.xlu0 %4664 }
 0x43a   : > { %v13673_v25 = vpop.eup %11795  ;;  %v4757_v52 = vsub.f32 %v15094_v1, %v4665_v4  ;;  %v15099_v4 = vld [vmem:[#allocation34_spill] sm:$0xff] }
 0x43b   : > { %v13676_v43 = vpop.eup %11797  ;;  %v4656_v54 = vpop.xlane.xlu1 %4655  ;;  %v5026_v20 = vsel %vm1795_vm3, %v13673_v25, 0.0  ;;  %v11581_v1 = vunpack.i.h.bf16 %v15099_v4 }
 0x43c   : > { %15095 = vst [vmem:[#allocation56_spill] sm:$0xff] %v13676_v43  ;;  %v13680_v6 = vpop.eup %11799  ;;  %v4754_v21 = vsub.f32 %v15097_v29, %v4656_v54  ;;  %5027 = vadd.xlane.f32.xlu1 %v5026_v20  ;;  %v4870_v27 = vmul.f32 1.442695, %v4757_v52  ;;  %v5035_v57 = vsel %vm1795_vm3, %v13676_v43, 0.0  ;;  %v11580_v54 = vunpack.i.l.bf16 %v15099_v4 }
 0x43d   : > { %15096 = vst [vmem:[#allocation55_spill] sm:$0xff] %v13680_v6  ;;  %v4662_v37 = vpop.xlane.xlu0 %4661  ;;  %v5032_v12 = vsel %vm1795_vm3, %v13680_v6, 0.0  ;;  %v11802_v36 = vpop.eup %11801 }
 0x43e   : > { %v4864_v13 = vmul.f32 1.442695, %v4754_v21  ;;  %v4756_v26 = vsub.f32 %v15098_v17, %v4662_v37  ;;  %5033 = vadd.xlane.f32.xlu0 %v5032_v12  ;;  %v15100_v21 = vld [vmem:[#allocation59_spill] sm:$0xff]  ;;  %v15101_v12 = vld [vmem:[#allocation58_spill] sm:$0xff] }
 0x43f   : > { %v4935_v16 = vpop.xlane.xlu1 %4934  ;;  %v5165_v17 = vmul.f32 %v11802_v36, %v15101_v12 }
 0x440   : > { %v11804_v49 = vpop.eup %11803  ;;  %11811 = vpow2.f32 %v4864_v13  ;;  %v4868_v52 = vmul.f32 1.442695, %v4756_v26  ;;  %5036 = vadd.xlane.f32.xlu1 %v5035_v57  ;;  %v15102_v26 = vld [vmem:[#allocation60_spill] sm:$0xff]  ;;  %v13699_v57 = vpack.c.bf16 %v11581_v1, %v11580_v54 }
 0x441   : > { %v11806_v20 = vpop.eup %11805  ;;  %11813 = vpow2.f32 %v4870_v27  ;;  %v4941_v29 = vpop.xlane.xlu0 %4940  ;;  %v5164_v6 = vmul.f32 %v11804_v49, %v15100_v21  ;;  %v15103_v49 = vld [vmem:[#allocation57_spill] sm:$0xff]  ;;  %v15104_v1 = vld [vmem:[#allocation32_spill] sm:$0xff] }
 0x442   : > { %v13691_v37 = vpop.eup %11807  ;;  %11815 = vpow2.f32 %v4868_v52  ;;  %v5163_v36 = vmul.f32 %v11806_v20, %v15103_v49 }
 0x443   : > { %v11810_v7 = vpop.eup %11809  ;;  %11817 = vrcp.f32 %v4935_v16  ;;  %v4932_v43 = vpop.xlane.xlu1 %4931  ;;  %10610 = vmatprep.mubr.msk.f32.mxu1 %vm1795_vm3, %v5164_v6  ;;  %v5041_v13 = vsel %vm1795_vm3, %v13691_v37, 0.0 }
 0x444   : > { %11819 = vrcp.f32 %v4932_v43  ;;  %5042 = vadd.xlane.f32.xlu1 %v5041_v13  ;;  %v5162_v27 = vmul.f32 %v11810_v7, %v15102_v26  ;;  %10611 = vmatmul.mubr.msk.f32.vlgmr.msra.gmra.mrb[60].mxu1 %vm1795_vm3, %v5165_v17  ;;  %v15105_v26 = vld [vmem:[#allocation42_spill] sm:$0xff] }
 0x445   : > { %11224 = vmatpush3.bf16.msra.mxu1 %v15091_v56  ;;  %v4671_v4 = vpop.xlane.xlu0 %4670  ;;  %11821 = vrcp.f32 %v4941_v29  ;;  %v11610_v49 = vunpack.i.l.bf16 %v15105_v26 }
 0x446   : > { %10603 = vmatprep.mubr.msk.f32.mxu0 %vm1795_vm3, %v5162_v27  ;;  %11230 = vmatprep.subr.bf16.mxu1 %v13699_v57  ;;  %v4759_v6 = vsub.f32 %v13435_v51, %v4671_v4  ;;  %v11611_v27 = vunpack.i.h.bf16 %v15105_v26 }
 0x447   : > { %10604 = vmatmul.mubr.msk.f32.vlgmr.msra.gmra.mrb[74].mxu0 %vm1795_vm3, %v5163_v36  ;;  %v4668_v43 = vpop.xlane.xlu1 %4667 }
 0x448   : > { %11220 = vmatpush3.bf16.msra.mxu0 %v15093_v62  ;;  %v4874_v7 = vmul.f32 1.442695, %v4759_v6  ;;  %v4758_v16 = vsub.f32 %v13440_v59, %v4668_v43 }
 0x449   : > { %11226 = vmatprep.subr.bf16.mxu0 %v15104_v1  ;;  %v4938_v56 = vpop.xlane.xlu0 %4937 }
 0x44a   : > { %v13710_v54 = vpop.eup %11811  ;;  %11823 = vpow2.f32 %v4874_v7  ;;  %v4872_v52 = vmul.f32 1.442695, %v4758_v16 }
 0x44b   : > { %v13712_v20 = vpop.eup %11813  ;;  %11825 = vrcp.f32 %v4938_v56  ;;  %v4674_v51 = vpop.xlane.xlu1 %4673  ;;  %v5038_v21 = vsel %vm1795_vm3, %v13710_v54, 0.0 }
 0x44c   : > { %v13716_v12 = vpop.eup %11815  ;;  %11827 = vpow2.f32 %v4872_v52  ;;  %v4760_v59 = vsub.f32 %v13449_v35, %v4674_v51  ;;  %5039 = vadd.xlane.f32.xlu1 %v5038_v21  ;;  %v5047_v43 = vsel %vm1795_vm3, %v13712_v20, 0.0  ;;  %v13731_v52 = vpack.c.bf16 %v11611_v27, %v11610_v49 }
 0x44d   : > { %v11818_v62 = vpop.eup %11817  ;;  %v4677_v29 = vpop.xlane.xlu0 %4676  ;;  %v5044_v17 = vsel %vm1795_vm3, %v13716_v12, 0.0 }
 0x44e   : > { %v11820_v13 = vpop.eup %11819  ;;  %v4876_v36 = vmul.f32 1.442695, %v4760_v59  ;;  %v4761_v4 = vsub.f32 %v13454_v10, %v4677_v29  ;;  %5045 = vadd.xlane.f32.xlu0 %v5044_v17  ;;  %v5167_v16 = vmul.f32 %v11818_v62, %v13421_v42  ;;  %v15106_v62 = vld [vmem:[#allocation45_spill] sm:$0xff] }
 0x44f   : > { %v4947_v6 = vpop.xlane.xlu1 %4946  ;;  %v5166_v35 = vmul.f32 %v11820_v13, %v13432_v53  ;;  %v11822_v51 = vpop.eup %11821  ;;  %v11641_v29 = vunpack.i.h.bf16 %v15106_v62  ;;  %v11640_v17 = vunpack.i.l.bf16 %v15106_v62  ;;  %v15108_v62 = vld [vmem:[#allocation36_spill] sm:$0xff] }
 0x450   : > { %11829 = vpow2.f32 %v4876_v36  ;;  %v4878_v7 = vmul.f32 1.442695, %v4761_v4  ;;  %5048 = vadd.xlane.f32.xlu1 %v5047_v43  ;;  %v5169_v4 = vmul.f32 %v11822_v51, %v13427_v41  ;;  %v15107_v43 = vld [vmem:[#allocation66_spill] sm:$0xff] }
 0x451   : > { %10617 = vmatprep.mubr.msk.f32.mxu0 %vm1795_vm3, %v5166_v35  ;;  %v4683_v56 = vpop.xlane.xlu0 %4682 }
 0x452   : > { %11831 = vpow2.f32 %v4878_v7  ;;  %10618 = vmatmul.mubr.msk.f32.vlgmr.msra.gmra.mrb[76].mxu0 %vm1795_vm3, %v5167_v16  ;;  %v4763_v10 = vsub.f32 %v13463_v14, %v4683_v56  ;;  %v13751_v7 = vpack.c.bf16 %v11641_v29, %v11640_v17  ;;  %v11586_v29 = vunpack.i.h.bf16 %v15108_v62 }
 0x453   : > { %11833 = vrcp.f32 %v4947_v6  ;;  %11228 = vmatpush3.bf16.msra.mxu0 %v15104_v1  ;;  %v4944_v53 = vpop.xlane.xlu1 %4943 }
 0x454   : > { %v13734_v21 = vpop.eup %11823  ;;  %v4882_v59 = vmul.f32 1.442695, %v4763_v10  ;;  %11234 = vmatprep.subr.bf16.mxu0 %v13731_v52  ;;  %11835 = vrcp.f32 %v4944_v53 }
 0x455   : > { %v11826_v42 = vpop.eup %11825  ;;  %v4689_v13 = vpop.xlane.xlu0 %4688  ;;  %v5053_v14 = vsel %vm1795_vm3, %v13734_v21, 0.0 }
 0x456   : > { %v13741_v26 = vpop.eup %11827  ;;  %11837 = vpow2.f32 %v4882_v59  ;;  %v4765_v1 = vsub.f32 %v13472_v34, %v4689_v13  ;;  %5054 = vadd.xlane.f32.xlu0 %v5053_v14  ;;  %v5168_v27 = vmul.f32 %v11826_v42, %v13446_v47  ;;  %v11585_v13 = vunpack.i.l.bf16 %v15108_v62 }
 0x457   : > { %v4680_v49 = vpop.xlane.xlu1 %4679  ;;  %v5050_v36 = vsel %vm1795_vm3, %v13741_v26, 0.0 }
 0x458   : > { %v4886_v6 = vmul.f32 1.442695, %v4765_v1  ;;  %v4762_v35 = vsub.f32 %v15107_v43, %v4680_v49  ;;  %10624 = vmatprep.mubr.msk.f32.mxu1 %vm1795_vm3, %v5168_v27  ;;  %5051 = vadd.xlane.f32.xlu1 %v5050_v36  ;;  %v15109_v49 = vld [vmem:[#allocation65_spill] sm:$0xff]  ;;  %v15110_v43 = vld [vmem:[#allocation64_spill] sm:$0xff] }
 0x459   : > { %10625 = vmatmul.mubr.msk.f32.vlgmr.msra.gmra.mrb[62].mxu1 %vm1795_vm3, %v5169_v4  ;;  %v4695_v34 = vpop.xlane.xlu0 %4694 }
 0x45a   : > { %v13753_v16 = vpop.eup %11829  ;;  %11839 = vpow2.f32 %v4886_v6  ;;  %v4880_v47 = vmul.f32 1.442695, %v4762_v35  ;;  %11232 = vmatpush3.bf16.msra.mxu1 %v13699_v57  ;;  %v4767_v56 = vsub.f32 %v13481_v46, %v4695_v34 }
 0x45b   : > { %11238 = vmatprep.subr.bf16.mxu1 %v13751_v7  ;;  %v4686_v41 = vpop.xlane.xlu1 %4685  ;;  %v5056_v10 = vsel %vm1795_vm3, %v13753_v16, 0.0 }
 0x45c   : > { %v13760_v51 = vpop.eup %11831  ;;  %11841 = vpow2.f32 %v4880_v47  ;;  %v4890_v53 = vmul.f32 1.442695, %v4767_v56  ;;  %v4764_v59 = vsub.f32 %v13486_v19, %v4686_v41  ;;  %5057 = vadd.xlane.f32.xlu1 %v5056_v10  ;;  %v13778_v41 = vpack.c.bf16 %v11586_v29, %v11585_v13 }
 0x45d   : > { %v11834_v42 = vpop.eup %11833  ;;  %v4701_v17 = vpop.xlane.xlu0 %4700  ;;  %v5059_v46 = vsel %vm1795_vm3, %v13760_v51, 0.0 }
 0x45e   : > { %v11836_v57 = vpop.eup %11835  ;;  %11843 = vpow2.f32 %v4890_v53  ;;  %v4884_v14 = vmul.f32 1.442695, %v4764_v59  ;;  %v4769_v1 = vsub.f32 %v13491_v40, %v4701_v17  ;;  %5060 = vadd.xlane.f32.xlu0 %v5059_v46  ;;  %v5171_v35 = vmul.f32 %v11834_v42, %v15110_v43 }
 0x45f   : > { %v4692_v27 = vpop.xlane.xlu1 %4691  ;;  %v5170_v36 = vmul.f32 %v11836_v57, %v15109_v49 }
 0x460   : > { %v13769_v19 = vpop.eup %11837  ;;  %11845 = vpow2.f32 %v4884_v14  ;;  %v4894_v4 = vmul.f32 1.442695, %v4769_v1  ;;  %v4766_v6 = vsub.f32 %v13496_v33, %v4692_v27 }
 0x461   : > { %10631 = vmatprep.mubr.msk.f32.mxu0 %vm1795_vm3, %v5170_v36  ;;  %v4707_v34 = vpop.xlane.xlu0 %4706  ;;  %v5065_v47 = vsel %vm1795_vm3, %v13769_v19, 0.0 }
 0x462   : > { %11847 = vpow2.f32 %v4894_v4  ;;  %v4888_v40 = vmul.f32 1.442695, %v4766_v6  ;;  %10632 = vmatmul.mubr.msk.f32.vlgmr.msra.gmra.mrb[78].mxu0 %vm1795_vm3, %v5171_v35  ;;  %v4771_v56 = vsub.f32 %v13501_v38, %v4707_v34  ;;  %5066 = vadd.xlane.f32.xlu0 %v5065_v47 }
 0x463   : > { %11236 = vmatpush3.bf16.msra.mxu0 %v13731_v52  ;;  %v4698_v33 = vpop.xlane.xlu1 %4697 }
 0x464   : > { %v13781_v10 = vpop.eup %11839  ;;  %11849 = vpow2.f32 %v4888_v40  ;;  %11242 = vmatprep.subr.bf16.mxu0 %v13778_v41  ;;  %v4768_v53 = vsub.f32 %v13506_v63, %v4698_v33  ;;  %v4898_v62 = vmul.f32 1.442695, %v4771_v56 }
 0x465   : > { %v5071_v59 = vsel %vm1795_vm3, %v13781_v10, 0.0 }
 0x466   : > { %v13787_v42 = vpop.eup %11841  ;;  %v4892_v38 = vmul.f32 1.442695, %v4768_v53  ;;  %5072 = vadd.xlane.f32.xlu0 %v5071_v59  ;;  %v15111_v53 = vld [vmem:[#allocation37_spill] sm:$0xff] }
 0x467   : > { %v4704_v29 = vpop.xlane.xlu1 %4703  ;;  %v4953_v17 = vpop.xlane.xlu0 %4952  ;;  %v5062_v52 = vsel %vm1795_vm3, %v13787_v42, 0.0  ;;  %v11616_v59 = vunpack.i.h.bf16 %v15111_v53 }
 0x468   : > { %v13791_v46 = vpop.eup %11843  ;;  %11851 = vpow2.f32 %v4892_v38  ;;  %v4770_v57 = vsub.f32 %v13513_v60, %v4704_v29  ;;  %5063 = vadd.xlane.f32.xlu1 %v5062_v52 }
 0x469   : > { %v5077_v63 = vsel %vm1795_vm3, %v13791_v46, 0.0  ;;  %11853 = vpow2.f32 %v4898_v62  ;;  %v11615_v62 = vunpack.i.l.bf16 %v15111_v53 }
 0x46a   : > { %v13796_v13 = vpop.eup %11845  ;;  %v4896_v14 = vmul.f32 1.442695, %v4770_v57  ;;  %5078 = vadd.xlane.f32.xlu0 %v5077_v63  ;;  %11855 = vrcp.f32 %v4953_v17 }
 0x46b   : > { %v4950_v1 = vpop.xlane.xlu0 %4949  ;;  %v5068_v27 = vsel %vm1795_vm3, %v13796_v13, 0.0  ;;  %v11245_v63 = vpack.c.bf16 %v11616_v59, %v11615_v62  ;;  %v15115_v59 = vld [vmem:[#allocation29_spill] sm:$0xff] }
 0x46c   : > { %v13800_v49 = vpop.eup %11847  ;;  %5069 = vadd.xlane.f32.xlu1 %v5068_v27  ;;  %11857 = vrcp.f32 %v4950_v1 }
 0x46d   : > { %v5083_v60 = vsel %vm1795_vm3, %v13800_v49, 0.0  ;;  %11859 = vpow2.f32 %v4896_v14 }
 0x46e   : > { %v13804_v36 = vpop.eup %11849  ;;  %5084 = vadd.xlane.f32.xlu0 %v5083_v60 }
 0x46f   : > { %v5074_v4 = vsel %vm1795_vm3, %v13804_v36, 0.0 }
 0x470   : > { %5075 = vadd.xlane.f32.xlu1 %v5074_v4  ;;  %v4959_v6 = vpop.xlane.xlu1 %4958 }
 0x471   : > { %11861 = vrcp.f32 %v4959_v6  ;;  %v15113_v6 = vld [vmem:[#allocation67_spill] sm:$0xff] }
 0x472   : > { %v13808_v43 = vpop.eup %11851 }
 0x473   : > { %v5080_v35 = vsel %vm1795_vm3, %v13808_v43, 0.0  ;;  %v13812_v34 = vpop.eup %11853 }
 0x474   : > { %5081 = vadd.xlane.f32.xlu1 %v5080_v35  ;;  %v4956_v47 = vpop.xlane.xlu1 %4955  ;;  %v11856_v56 = vpop.eup %11855  ;;  %v5089_v38 = vsel %vm1795_vm3, %v13812_v34, 0.0 }
 0x475   : > { %11863 = vrcp.f32 %v4956_v47  ;;  %v4965_v40 = vpop.xlane.xlu0 %4964  ;;  %v5173_v57 = vmul.f32 %v11856_v56, %v13518_v2 }
 0x476   : > { %v11858_v33 = vpop.eup %11857  ;;  %11865 = vrcp.f32 %v4965_v40 }
 0x477   : > { %v13818_v29 = vpop.eup %11859  ;;  %v5172_v17 = vmul.f32 %v11858_v33, %v13525_v31  ;;  %v15112_v31 = vld [vmem:[#allocation47_spill] sm:$0xff] }
 0x478   : > { %5090 = vadd.xlane.f32.xlu1 %v5089_v38  ;;  %v5086_v14 = vsel %vm1795_vm3, %v13818_v29, 0.0  ;;  %v11646_v60 = vunpack.i.h.bf16 %v15112_v31  ;;  %v11645_v4 = vunpack.i.l.bf16 %v15112_v31  ;;  %v15116_v38 = vld [vmem:[#allocation68_spill] sm:$0xff]  ;;  %v15118_v31 = vld [vmem:[#allocation51_spill] sm:$0xff] }
 0x479   : > { %v4962_v52 = vpop.xlane.xlu0 %4961  ;;  %10638 = vmatprep.mubr.msk.f32.mxu1 %vm1795_vm3, %v5172_v17 }
 0x47a   : > { %11867 = vrcp.f32 %v4962_v52  ;;  %10639 = vmatmul.mubr.msk.f32.vlgmr.msra.gmra.mrb[64].mxu1 %vm1795_vm3, %v5173_v57  ;;  %v11249_v40 = vpack.c.bf16 %v11646_v60, %v11645_v4  ;;  %v11681_v60 = vunpack.i.h.bf16 %v15118_v31  ;;  %v11680_v4 = vunpack.i.l.bf16 %v15118_v31 }
 0x47b   : > { %11240 = vmatpush3.bf16.msra.mxu1 %v13751_v7  ;;  %v11862_v1 = vpop.eup %11861  ;;  %v15114_v7 = vld [vmem:[#allocation52_spill] sm:$0xff] }
 0x47c   : > { %5087 = vadd.xlane.f32.xlu1 %v5086_v14  ;;  %11246 = vmatprep.subr.bf16.mxu1 %v11245_v63  ;;  %v5175_v35 = vmul.f32 %v11862_v1, %v15113_v6  ;;  %v11671_v33 = vunpack.i.h.bf16 %v15114_v7  ;;  %v11670_v53 = vunpack.i.l.bf16 %v15114_v7  ;;  %v15117_v14 = vld [vmem:[#allocation31_spill] sm:$0xff] }
 0x47e   : > { %v11253_v52 = vpack.c.bf16 %v11671_v33, %v11670_v53  ;;  %v15119_v33 = vld [vmem:[#allocation38_spill] sm:$0xff] }
 0x47f   : > { %v11864_v27 = vpop.eup %11863  ;;  %v11591_v53 = vunpack.i.h.bf16 %v15119_v33 }
 0x480   : > { %v5174_v2 = vmul.f32 %v11864_v27, %v13534_v58  ;;  %v11866_v47 = vpop.eup %11865 }
 0x481   : > { %v5177_v17 = vmul.f32 %v11866_v47, %v15116_v38 }
 0x482   : > { %10645 = vmatprep.mubr.msk.f32.mxu0 %vm1795_vm3, %v5174_v2 }
 0x483   : > { %10646 = vmatmul.mubr.msk.f32.vlgmr.msra.gmra.mrb[80].mxu0 %vm1795_vm3, %v5175_v35  ;;  %v11257_v35 = vpack.c.bf16 %v11681_v60, %v11680_v4 }
 0x484   : > { %v11868_v56 = vpop.eup %11867  ;;  %11244 = vmatpush3.bf16.msra.mxu0 %v13778_v41  ;;  %11688 = vrot.lane.b32.xlu0 %v15115_v59, %s12083_s20  ;;  %v11590_v59 = vunpack.i.l.bf16 %v15119_v33 }
 0x485   : > { %11250 = vmatprep.subr.bf16.mxu0 %v11249_v40  ;;  %v4971_v58 = vpop.xlane.xlu1 %4970  ;;  %v5176_v62 = vmul.f32 %v11868_v56, %v13543_v3 }
 0x486   : > { %11869 = vrcp.f32 %v4971_v58 }
 0x487   : > { %10652 = vmatprep.mubr.msk.f32.mxu1 %vm1795_vm3, %v5176_v62  ;;  %v11261_v62 = vpack.c.bf16 %v11591_v53, %v11590_v59 }
 0x488   : > { %10653 = vmatmul.mubr.msk.f32.vlgmr.msra.gmra.mrb[66].mxu1 %vm1795_vm3, %v5177_v17 }
 0x489   : > { %11248 = vmatpush3.bf16.msra.mxu1 %v11245_v63  ;;  %v4968_v57 = vpop.xlane.xlu1 %4967 }
 0x48a   : > { %11254 = vmatprep.subr.bf16.mxu1 %v11253_v52  ;;  %11871 = vrcp.f32 %v4968_v57 }
 0x48b   : > { %v4977_v41 = vpop.xlane.xlu0 %4976 }
 0x48c   : > { %11873 = vrcp.f32 %v4977_v41 }
 0x48d   : > { %11693 = vrot.lane.b32.xlu1 %v15117_v14, %s12083_s20  ;;  %v15120_v14 = vld [vmem:[#allocation39_spill] sm:$0xff]  ;;  %s15153_s20 = sld [smem:[#allocation78_spill]] }
 0x48f   : > { %v4974_v1 = vpop.xlane.xlu0 %4973 }
 0x490   : > { %11875 = vrcp.f32 %v4974_v1  ;;  %v11870_v3 = vpop.eup %11869  ;;  %v11621_v1 = vunpack.i.h.bf16 %v15120_v14 }
 0x491   : > { %v5179_v63 = vmul.f32 %v11870_v3, %v13550_v11 }
 0x494   : > { %v11872_v27 = vpop.eup %11871 }
 0x495   : > { %v4983_v2 = vpop.xlane.xlu1 %4982  ;;  %v5178_v6 = vmul.f32 %v11872_v27, %v13555_v48 }
 0x496   : > { %v11874_v47 = vpop.eup %11873  ;;  %11877 = vrcp.f32 %v4983_v2 }
 0x497   : > { %10659 = vmatprep.mubr.msk.f32.mxu0 %vm1795_vm3, %v5178_v6  ;;  %v5181_v11 = vmul.f32 %v11874_v47, %v13559_v44  ;;  %v15121_v6 = vld [vmem:[#allocation46_spill] sm:$0xff] }
 0x498   : > { %10660 = vmatmul.mubr.msk.f32.vlgmr.msra.gmra.mrb[82].mxu0 %vm1795_vm3, %v5179_v63  ;;  %v11651_v63 = vunpack.i.h.bf16 %v15121_v6  ;;  %v11650_v47 = vunpack.i.l.bf16 %v15121_v6 }
 0x499   : > { %11252 = vmatpush3.bf16.msra.mxu0 %v11249_v40  ;;  %v4980_v56 = vpop.xlane.xlu1 %4979 }
 0x49a   : > { %v11876_v7 = vpop.eup %11875  ;;  %11258 = vmatprep.subr.bf16.mxu0 %v11257_v35  ;;  %11879 = vrcp.f32 %v4980_v56 }
 0x49b   : > { %v4989_v58 = vpop.xlane.xlu0 %4988  ;;  %v5180_v48 = vmul.f32 %v11876_v7, %v13565_v30  ;;  %v11620_v30 = vunpack.i.l.bf16 %v15120_v14 }
 0x49c   : > { %11881 = vrcp.f32 %v4989_v58  ;;  %v15122_v58 = vld [vmem:[#allocation33_spill] sm:$0xff] }
 0x49d   : > { %10666 = vmatprep.mubr.msk.f32.mxu1 %vm1795_vm3, %v5180_v48  ;;  %v11265_v31 = vpack.c.bf16 %v11621_v1, %v11620_v30  ;;  %v11596_v48 = vunpack.i.h.bf16 %v15122_v58 }
 0x49e   : > { %10667 = vmatmul.mubr.msk.f32.vlgmr.msra.gmra.mrb[68].mxu1 %vm1795_vm3, %v5181_v11  ;;  %v11595_v11 = vunpack.i.l.bf16 %v15122_v58 }
 0x49f   : > { %11256 = vmatpush3.bf16.msra.mxu1 %v11253_v52  ;;  %v4986_v40 = vpop.xlane.xlu0 %4985 }
 0x4a0   : > { %11262 = vmatprep.subr.bf16.mxu1 %v11261_v62  ;;  %11883 = vrcp.f32 %v4986_v40  ;;  %v11878_v17 = vpop.eup %11877  ;;  %v11273_v1 = vpack.c.bf16 %v11596_v48, %v11595_v11 }
 0x4a1   : > { %v4995_v38 = vpop.xlane.xlu1 %4994  ;;  %v5183_v27 = vmul.f32 %v11878_v17, %v13571_v18 }
 0x4a2   : > { %11885 = vrcp.f32 %v4995_v38  ;;  %v15123_v38 = vld [vmem:[#allocation44_spill] sm:$0xff] }
 0x4a3   : > { %v5001_v57 = vpop.xlane.xlu0 %5000  ;;  %v11626_v17 = vunpack.i.h.bf16 %v15123_v38 }
 0x4a4   : > { %v11880_v41 = vpop.eup %11879 }
 0x4a5   : > { %v4992_v44 = vpop.xlane.xlu1 %4991  ;;  %v5182_v3 = vmul.f32 %v11880_v41, %v13577_v8 }
 0x4a6   : > { %11887 = vrcp.f32 %v4992_v44  ;;  %v11882_v60 = vpop.eup %11881 }
 0x4a7   : > { %11889 = vrcp.f32 %v5001_v57  ;;  %10673 = vmatprep.mubr.msk.f32.mxu0 %vm1795_vm3, %v5182_v3  ;;  %v4998_v52 = vpop.xlane.xlu0 %4997  ;;  %v5185_v56 = vmul.f32 %v11882_v60, %v13582_v55  ;;  %v11625_v57 = vunpack.i.l.bf16 %v15123_v38  ;;  %v15124_v3 = vld [vmem:[#allocation49_spill] sm:$0xff]  ;;  %v15127_v38 = vld [vmem:[#allocation40_spill] sm:$0xff] }
 0x4a8   : > { %11891 = vrcp.f32 %v4998_v52  ;;  %10674 = vmatmul.mubr.msk.f32.vlgmr.msra.gmra.mrb[84].mxu0 %vm1795_vm3, %v5183_v27  ;;  %v11656_v27 = vunpack.i.h.bf16 %v15124_v3  ;;  %v11655_v52 = vunpack.i.l.bf16 %v15124_v3 }
 0x4a9   : > { %11260 = vmatpush3.bf16.msra.mxu0 %v11257_v35  ;;  %v5007_v4 = vpop.xlane.xlu1 %5006  ;;  %v11269_v35 = vpack.c.bf16 %v11651_v63, %v11650_v47 }
 0x4aa   : > { %v11884_v2 = vpop.eup %11883  ;;  %11266 = vmatprep.subr.bf16.mxu0 %v11265_v31  ;;  %11893 = vrcp.f32 %v5007_v4  ;;  %v15125_v4 = vld [vmem:[#allocation54_spill] sm:$0xff] }
 0x4ab   : > { %v5013_v8 = vpop.xlane.xlu0 %5012  ;;  %v5184_v18 = vmul.f32 %v11884_v2, %v13588_v5  ;;  %v11676_v2 = vunpack.i.h.bf16 %v15125_v4  ;;  %v11675_v6 = vunpack.i.l.bf16 %v15125_v4 }
 0x4ac   : > { %v11886_v33 = vpop.eup %11885 }
 0x4ad   : > { %v5004_v7 = vpop.xlane.xlu1 %5003  ;;  %10680 = vmatprep.mubr.msk.f32.mxu1 %vm1795_vm3, %v5184_v18  ;;  %v5187_v41 = vmul.f32 %v11886_v33, %v13593_v0 }
 0x4ae   : > { %11895 = vrcp.f32 %v5004_v7  ;;  %10681 = vmatmul.mubr.msk.f32.vlgmr.msra.gmra.mrb[70].mxu1 %vm1795_vm3, %v5185_v56 }
 0x4af   : > { %11897 = vrcp.f32 %v5013_v8  ;;  %11264 = vmatpush3.bf16.msra.mxu1 %v11261_v62  ;;  %v5010_v53 = vpop.xlane.xlu0 %5009  ;;  %v11281_v8 = vpack.c.bf16 %v11656_v27, %v11655_v52  ;;  %v15129_v27 = vld [vmem:[#allocation69_spill] sm:$0xff] }
 0x4b0   : > { %v11888_v59 = vpop.eup %11887  ;;  %11270 = vmatprep.subr.bf16.mxu1 %v11269_v35  ;;  %11899 = vrcp.f32 %v5010_v53 }
 0x4b1   : > { %v11890_v55 = vpop.eup %11889  ;;  %v5186_v5 = vmul.f32 %v11888_v59, %v13603_v50  ;;  %v11277_v50 = vpack.c.bf16 %v11626_v17, %v11625_v57  ;;  %v11601_v17 = vunpack.i.h.bf16 %v15127_v38  ;;  %v11600_v57 = vunpack.i.l.bf16 %v15127_v38 }
 0x4b2   : > { %v11892_v40 = vpop.eup %11891  ;;  %v5189_v30 = vmul.f32 %v11890_v55, %v13598_v28 }
 0x4b3   : > { %10687 = vmatprep.mubr.msk.f32.mxu0 %vm1795_vm3, %v5186_v5  ;;  %v5019_v62 = vpop.xlane.xlu0 %5018  ;;  %v5188_v14 = vmul.f32 %v11892_v40, %v13607_v15 }
 0x4b4   : > { %10688 = vmatmul.mubr.msk.f32.vlgmr.msra.gmra.mrb[86].mxu0 %vm1795_vm3, %v5187_v41  ;;  %v11894_v44 = vpop.eup %11893  ;;  %11901 = vrcp.f32 %v5019_v62  ;;  %v11293_v62 = vpack.c.bf16 %v11601_v17, %v11600_v57 }
 0x4b5   : > { %11268 = vmatpush3.bf16.msra.mxu0 %v11265_v31  ;;  %10694 = vmatprep.mubr.msk.f32.mxu1 %vm1795_vm3, %v5188_v14  ;;  %v5191_v63 = vmul.f32 %v11894_v44, %v13611_v61 }
 0x4b6   : > { %11274 = vmatprep.subr.bf16.mxu0 %v11273_v1  ;;  %10695 = vmatmul.mubr.msk.f32.vlgmr.msra.gmra.mrb[72].mxu1 %vm1795_vm3, %v5189_v30  ;;  %v15128_v30 = vld [vmem:[#allocation41_spill] sm:$0xff] }
 0x4b7   : > { %11272 = vmatpush3.bf16.msra.mxu1 %v11269_v35  ;;  %v15126_v35 = vld [vmem:[#allocation53_spill] sm:$0xff]  ;;  %v11630_v44 = vunpack.i.l.bf16 %v15128_v30 }
 0x4b8   : > { %v11896_v0 = vpop.eup %11895  ;;  %11278 = vmatprep.subr.bf16.mxu1 %v11277_v50  ;;  %v11686_v33 = vunpack.i.h.bf16 %v15126_v35  ;;  %v11685_v53 = vunpack.i.l.bf16 %v15126_v35 }
 0x4b9   : > { %v11898_v15 = vpop.eup %11897  ;;  %v5016_v60 = vpop.xlane.xlu0 %5015  ;;  %v5190_v28 = vmul.f32 %v11896_v0, %v13621_v32  ;;  %v11285_v32 = vpack.c.bf16 %v11676_v2, %v11675_v6 }
 0x4ba   : > { %v11900_v31 = vpop.eup %11899  ;;  %11903 = vrcp.f32 %v5016_v60  ;;  %v5193_v18 = vmul.f32 %v11898_v15, %v13616_v9  ;;  %v11289_v48 = vpack.c.bf16 %v11686_v33, %v11685_v53 }
 0x4bb   : > { %10701 = vmatprep.mubr.msk.f32.mxu0 %vm1795_vm3, %v5190_v28  ;;  %v5192_v47 = vmul.f32 %v11900_v31, %v13626_v24  ;;  %v15131_v28 = vld [vmem:[#allocation55_spill] sm:$0xff] }
 0x4bc   : > { %10702 = vmatmul.mubr.msk.f32.vlgmr.msra.gmra.mrb[88].mxu0 %vm1795_vm3, %v5191_v63 }
 0x4bd   : > { %11276 = vmatpush3.bf16.msra.mxu0 %v11273_v1  ;;  %v5025_v56 = vpop.xlane.xlu0 %5024  ;;  %10708 = vmatprep.mubr.msk.f32.mxu1 %vm1795_vm3, %v5192_v47 }
 0x4be   : > { %11282 = vmatprep.subr.bf16.mxu0 %v11281_v8  ;;  %10709 = vmatmul.mubr.msk.f32.vlgmr.msra.gmra.mrb[74].mxu1 %vm1795_vm3, %v5193_v18  ;;  %11905 = vrcp.f32 %v5025_v56  ;;  %v11902_v7 = vpop.eup %11901 }
 0x4bf   : > { %11280 = vmatpush3.bf16.msra.mxu1 %v11277_v50  ;;  %v5195_v58 = vmul.f32 %v11902_v7, %v13630_v23  ;;  %v11631_v50 = vunpack.i.h.bf16 %v15128_v30  ;;  %v15133_v7 = vld [vmem:[#allocation35_spill] sm:$0xff] }
 0x4c0   : > { %11286 = vmatprep.subr.bf16.mxu1 %v11285_v32  ;;  %v11605_v35 = vunpack.i.l.bf16 %v15133_v7 }
 0x4c1   : > { %v5022_v61 = vpop.xlane.xlu0 %5021  ;;  %v5031_v9 = vpop.xlane.xlu1 %5030  ;;  %v11297_v2 = vpack.c.bf16 %v11631_v50, %v11630_v44 }
 0x4c2   : > { %11907 = vrcp.f32 %v5022_v61 }
 0x4c3   : > { %11909 = vrcp.f32 %v5031_v9 }
 0x4c4   : > { %v11904_v24 = vpop.eup %11903 }
 0x4c5   : > { %v5194_v59 = vmul.f32 %v11904_v24, %v13641_v45  ;;  %v11606_v24 = vunpack.i.h.bf16 %v15133_v7 }
 0x4c7   : > { %10715 = vmatprep.mubr.msk.f32.mxu0 %vm1795_vm3, %v5194_v59 }
 0x4c8   : > { %10716 = vmatmul.mubr.msk.f32.vlgmr.msra.gmra.mrb[90].mxu0 %vm1795_vm3, %v5195_v58  ;;  %v11906_v55 = vpop.eup %11905  ;;  %v15134_v58 = vld [vmem:[#allocation43_spill] sm:$0xff] }
 0x4c9   : > { %11284 = vmatpush3.bf16.msra.mxu0 %v11281_v8  ;;  %v5028_v11 = vpop.xlane.xlu1 %5027  ;;  %v5197_v41 = vmul.f32 %v11906_v55, %v13646_v39  ;;  %v15130_v39 = vld [vmem:[#allocation48_spill] sm:$0xff] }
 0x4ca   : > { %11290 = vmatprep.subr.bf16.mxu0 %v11289_v48  ;;  %11911 = vrcp.f32 %v5028_v11  ;;  %v11661_v15 = vunpack.i.h.bf16 %v15130_v39  ;;  %v11660_v60 = vunpack.i.l.bf16 %v15130_v39  ;;  %v11635_v11 = vunpack.i.l.bf16 %v15134_v58 }
 0x4cb   : > { %v5034_v5 = vpop.xlane.xlu0 %5033 }
 0x4cc   : > { %v11908_v40 = vpop.eup %11907  ;;  %11913 = vrcp.f32 %v5034_v5  ;;  %v11301_v8 = vpack.c.bf16 %v11661_v15, %v11660_v60 }
 0x4cd   : > { %v5037_v45 = vpop.xlane.xlu1 %5036  ;;  %v5196_v23 = vmul.f32 %v11908_v40, %v13649_v22  ;;  %v11910_v14 = vpop.eup %11909  ;;  %v11305_v40 = vpack.c.bf16 %v11606_v24, %v11605_v35 }
 0x4ce   : > { %11915 = vrcp.f32 %v5037_v45  ;;  %v5199_v52 = vmul.f32 %v11910_v14, %v15129_v27 }
 0x4cf   : > { %10722 = vmatprep.mubr.msk.f32.mxu1 %vm1795_vm3, %v5196_v23  ;;  %v15135_v23 = vld [vmem:[#allocation50_spill] sm:$0xff] }
 0x4d0   : > { %10723 = vmatmul.mubr.msk.f32.vlgmr.msra.gmra.mrb[76].mxu1 %vm1795_vm3, %v5197_v41  ;;  %v11666_v41 = vunpack.i.h.bf16 %v15135_v23 }
 0x4d1   : > { %11288 = vmatpush3.bf16.msra.mxu1 %v11285_v32  ;;  %v5043_v0 = vpop.xlane.xlu1 %5042 }
 0x4d2   : > { %11294 = vmatprep.subr.bf16.mxu1 %v11293_v62  ;;  %11917 = vrcp.f32 %v5043_v0 }
 0x4d4   : > { %v11912_v1 = vpop.eup %11911 }
 0x4d5   : > { %v5198_v3 = vmul.f32 %v11912_v1, %v13673_v25  ;;  %v15132_v25 = vld [vmem:[#allocation56_spill] sm:$0xff] }
 0x4d6   : > { %v11914_v22 = vpop.eup %11913 }
 0x4d7   : > { %10729 = vmatprep.mubr.msk.f32.mxu0 %vm1795_vm3, %v5198_v3  ;;  %v5200_v31 = vmul.f32 %v11914_v22, %v15131_v28 }
 0x4d8   : > { %v11916_v4 = vpop.eup %11915  ;;  %10730 = vmatmul.mubr.msk.f32.vlgmr.msra.gmra.mrb[92].mxu0 %vm1795_vm3, %v5199_v52 }
 0x4d9   : > { %11292 = vmatpush3.bf16.msra.mxu0 %v11289_v48  ;;  %v5040_v6 = vpop.xlane.xlu1 %5039  ;;  %10736 = vmatprep.mubr.msk.f32.mxu1 %vm1795_vm3, %v5200_v31  ;;  %v5201_v63 = vmul.f32 %v11916_v4, %v15132_v25  ;;  %v11636_v48 = vunpack.i.h.bf16 %v15134_v58 }
 0x4da   : > { %11298 = vmatprep.subr.bf16.mxu0 %v11297_v2  ;;  %11919 = vrcp.f32 %v5040_v6 }
 0x4db   : > { %10737 = vmatmul.mubr.msk.f32.vlgmr.msra.gmra.mrb[78].mxu1 %vm1795_vm3, %v5201_v63  ;;  %v5046_v47 = vpop.xlane.xlu0 %5045  ;;  %v11309_v17 = vpack.c.bf16 %v11636_v48, %v11635_v11 }
 0x4dc   : > { %11296 = vmatpush3.bf16.msra.mxu1 %v11293_v62  ;;  %11921 = vrcp.f32 %v5046_v47  ;;  %v11918_v56 = vpop.eup %11917  ;;  %v11665_v62 = vunpack.i.l.bf16 %v15135_v23 }
 0x4dd   : > { %11302 = vmatprep.subr.bf16.mxu1 %v11301_v8  ;;  %v5049_v18 = vpop.xlane.xlu1 %5048  ;;  %v5203_v59 = vmul.f32 %v11918_v56, %v13691_v37 }
 0x4de   : > { %11923 = vrcp.f32 %v5049_v18  ;;  %v11313_v50 = vpack.c.bf16 %v11666_v41, %v11665_v62 }
 0x4e3   : > { %v5055_v32 = vpop.xlane.xlu0 %5054 }
 0x4e4   : > { %v11920_v61 = vpop.eup %11919  ;;  %11925 = vrcp.f32 %v5055_v32 }
 0x4e5   : > { %v5052_v33 = vpop.xlane.xlu1 %5051  ;;  %v5202_v53 = vmul.f32 %v11920_v61, %v13710_v54 }
 0x4e6   : > { %v11922_v9 = vpop.eup %11921  ;;  %11927 = vrcp.f32 %v5052_v33 }
 0x4e7   : > { %10743 = vmatprep.mubr.msk.f32.mxu0 %vm1795_vm3, %v5202_v53  ;;  %v5204_v55 = vmul.f32 %v11922_v9, %v13716_v12 }
 0x4e8   : > { %v11924_v5 = vpop.eup %11923  ;;  %10744 = vmatmul.mubr.msk.f32.vlgmr.msra.gmra.mrb[94].mxu0 %vm1795_vm3, %v5203_v59 }
 0x4e9   : > { %11300 = vmatpush3.bf16.msra.mxu0 %v11297_v2  ;;  %v5058_v38 = vpop.xlane.xlu1 %5057  ;;  %10750 = vmatprep.mubr.msk.f32.mxu1 %vm1795_vm3, %v5204_v55  ;;  %v5205_v54 = vmul.f32 %v11924_v5, %v13712_v20 }
 0x4ea   : > { %11306 = vmatprep.subr.bf16.mxu0 %v11305_v40  ;;  %11929 = vrcp.f32 %v5058_v38 }
 0x4eb   : > { %10751 = vmatmul.mubr.msk.f32.vlgmr.msra.gmra.mrb[80].mxu1 %vm1795_vm3, %v5205_v54  ;;  %v5061_v37 = vpop.xlane.xlu0 %5060 }
 0x4ec   : > { %11304 = vmatpush3.bf16.msra.mxu1 %v11301_v8  ;;  %11931 = vrcp.f32 %v5061_v37 }
 0x4ed   : > { %11310 = vmatprep.subr.bf16.mxu1 %v11309_v17 }
 0x4ee   : > { %v11926_v12 = vpop.eup %11925 }
 0x4ef   : > { %v5067_v57 = vpop.xlane.xlu0 %5066  ;;  %v5207_v20 = vmul.f32 %v11926_v12, %v13734_v21 }
 0x4f0   : > { %v11928_v45 = vpop.eup %11927  ;;  %11933 = vrcp.f32 %v5067_v57 }
 0x4f1   : > { %v5206_v14 = vmul.f32 %v11928_v45, %v13741_v26 }
 0x4f3   : > { %10757 = vmatprep.mubr.msk.f32.mxu0 %vm1795_vm3, %v5206_v14  ;;  %v5073_v1 = vpop.xlane.xlu0 %5072 }
 0x4f4   : > { %v11930_v30 = vpop.eup %11929  ;;  %10758 = vmatmul.mubr.msk.f32.vlgmr.msra.gmra.mrb[96].mxu0 %vm1795_vm3, %v5207_v20 }
 0x4f5   : > { %11308 = vmatpush3.bf16.msra.mxu0 %v11305_v40  ;;  %v5064_v44 = vpop.xlane.xlu1 %5063  ;;  %v5208_v0 = vmul.f32 %v11930_v30, %v13753_v16 }
 0x4f6   : > { %v11932_v3 = vpop.eup %11931  ;;  %11314 = vmatprep.subr.bf16.mxu0 %v11313_v50  ;;  %11935 = vrcp.f32 %v5064_v44 }
 0x4f7   : > { %10764 = vmatprep.mubr.msk.f32.mxu1 %vm1795_vm3, %v5208_v0  ;;  %v5079_v26 = vpop.xlane.xlu0 %5078  ;;  %v5209_v21 = vmul.f32 %v11932_v3, %v13760_v51  ;;  %11937 = vrcp.f32 %v5073_v1 }
 0x4f9   : > { %v5070_v22 = vpop.xlane.xlu1 %5069  ;;  %10765 = vmatmul.mubr.msk.f32.vlgmr.msra.gmra.mrb[82].mxu1 %vm1795_vm3, %v5209_v21 }
 0x4fa   : > { %v13938_v27 = vpop.f32.mrb[56].mxu1  ;;  %11939 = vrcp.f32 %v5070_v22  ;;  %11312 = vmatpush3.bf16.msra.mxu1 %v11309_v17  ;;  %v11934_v15 = vpop.eup %11933 }
 0x4fb   : > { %v13940_v52 = vpop.f32.mrb[57].mxu1  ;;  %v5085_v39 = vpop.xlane.xlu0 %5084  ;;  %11941 = vrcp.f32 %v5079_v26  ;;  %v5211_v6 = vmul.f32 %v11934_v15, %v13769_v19 }
 0x4fd   : > { %v5076_v16 = vpop.xlane.xlu1 %5075 }
 0x4fe   : > { %11943 = vrcp.f32 %v5076_v16 }
 0x4ff   : > { %v11689_v60 = vpop.permute.xlu0 %11688  ;;  %11945 = vrcp.f32 %v5085_v39 }
 0x500   : > { %v11936_v28 = vpop.eup %11935  ;;  %v11691_v31 = vunpack.i.h.bf16 %v11689_v60  ;;  %v11690_v4 = vunpack.i.l.bf16 %v11689_v60 }
 0x501   : > { %v5082_v51 = vpop.xlane.xlu1 %5081  ;;  %v5210_v2 = vmul.f32 %v11936_v28, %v13787_v42  ;;  %v11938_v63 = vpop.eup %11937 }
 0x502   : > { %11947 = vrcp.f32 %v5082_v51  ;;  %v11317_v25 = vpack.c.bf16 %v11691_v31, %v11690_v4  ;;  %v5213_v56 = vmul.f32 %v11938_v63, %v13781_v10  ;;  %v8054_v63 = vld [vmem:[%s14920_s9] sm:$0xff] }
 0x503   : > { %10771 = vmatprep.mubr.msk.f32.mxu0 %vm1795_vm3, %v5210_v2 }
 0x504   : > { %v11940_v47 = vpop.eup %11939  ;;  %10772 = vmatmul.mubr.msk.f32.vlgmr.msra.gmra.mrb[98].mxu0 %vm1795_vm3, %v5211_v6  ;;  %11318 = vmatprep.subr.bf16.mxu1 %v11317_v25 }
 0x505   : > { %11316 = vmatpush3.bf16.msra.mxu0 %v11313_v50  ;;  %v5091_v8 = vpop.xlane.xlu1 %5090  ;;  %v5212_v18 = vmul.f32 %v11940_v47, %v13796_v13  ;;  %v11942_v32 = vpop.eup %11941  ;;  %v8055_v47 = vld [vmem:[%s14920_s9 + $0x8] sm:$0xff] }
 0x506   : > { %11949 = vrcp.f32 %v5091_v8  ;;  %v5215_v10 = vmul.f32 %v11942_v32, %v13791_v46  ;;  %v8056_v8 = vld [vmem:[%s14920_s9 + $0x10] sm:$0xff] }
 0x507   : > { %10778 = vmatprep.mubr.msk.f32.mxu1 %vm1795_vm3, %v5212_v18  ;;  %v11325_v18 = vpack.c.bf16 %v8055_v47, %v8054_v63 }
 0x508   : > { %v11944_v42 = vpop.eup %11943  ;;  %v13949_v61 = vpop.f32.mrb[58].mxu1  ;;  %10779 = vmatmul.mubr.msk.f32.vlgmr.msra.gmra.mrb[84].mxu1 %vm1795_vm3, %v5213_v56  ;;  %v8057_v56 = vld [vmem:[%s14920_s9 + $0x18] sm:$0xff] }
 0x509   : > { %11320 = vmatpush3.bf16.msra.mxu1 %v11317_v25  ;;  %v13952_v19 = vpop.f32.mrb[59].mxu1  ;;  %v5088_v7 = vpop.xlane.xlu1 %5087  ;;  %v5214_v24 = vmul.f32 %v11944_v42, %v13804_v36  ;;  %v11329_v32 = vpack.c.bf16 %v8057_v56, %v8056_v8  ;;  %v8058_v42 = vld [vmem:[%s14920_s9 + $0x20] sm:$0xff] }
 0x50a   : > { %v13955_v35 = vpop.f32.mrb[72].mxu0  ;;  %11951 = vrcp.f32 %v5088_v7  ;;  %v11946_v13 = vpop.eup %11945  ;;  %v8059_v7 = vld [vmem:[%s14920_s9 + $0x28] sm:$0xff]  ;;  %11326 = vmatprep.subr.bf16.mxu1 %v11325_v18 }
 0x50b   : > { %v13958_v33 = vpop.f32.mrb[73].mxu0  ;;  %10785 = vmatprep.mubr.msk.f32.mxu0 %vm1795_vm3, %v5214_v24  ;;  %v5217_v36 = vmul.f32 %v11946_v13, %v13800_v49  ;;  %v11333_v24 = vpack.c.bf16 %v8059_v7, %v8058_v42 }
 0x50c   : > { %v11948_v53 = vpop.eup %11947  ;;  %10786 = vmatmul.mubr.msk.f32.vlgmr.msra.gmra.mrb[100].mxu0 %vm1795_vm3, %v5215_v10 }
 0x50d   : > { %v11694_v9 = vpop.permute.xlu1 %11693  ;;  %v5216_v59 = vmul.f32 %v11948_v53, %v13808_v43 }
 0x50e   : > { %v11696_v58 = vunpack.i.h.bf16 %v11694_v9  ;;  %v11695_v48 = vunpack.i.l.bf16 %v11694_v9 }
 0x50f   : > { %10792 = vmatprep.mubr.msk.f32.mxu1 %vm1795_vm3, %v5216_v59  ;;  %v8060_v59 = vld [vmem:[%s14920_s9 + $0x30] sm:$0xff] }
 0x510   : > { %10793 = vmatmul.mubr.msk.f32.vlgmr.msra.gmra.mrb[86].mxu1 %vm1795_vm3, %v5217_v36  ;;  %v11321_v46 = vpack.c.bf16 %v11696_v58, %v11695_v48  ;;  %v11950_v11 = vpop.eup %11949  ;;  %v8061_v58 = vld [vmem:[%s14920_s9 + $0x38] sm:$0xff] }
 0x511   : > { %v5219_v40 = vmul.f32 %v11950_v11, %v13812_v34  ;;  %11328 = vmatpush3.bf16.msra.mxu1 %v11325_v18  ;;  %v11337_v48 = vpack.c.bf16 %v8061_v58, %v8060_v59 }
 0x512   : > { %11322 = vmatprep.subr.bf16.mxu0 %v11321_v46  ;;  %11330 = vmatprep.subr.bf16.mxu1 %v11329_v32 }
 0x513   : > { %11324 = vmatpush3.bf16.msra.mxu0 %v11321_v46 }
 0x514   : > { %v11952_v55 = vpop.eup %11951 }
 0x515   : > { %v5218_v5 = vmul.f32 %v11952_v55, %v13818_v29  ;;  %11332 = vmatpush3.bf16.msra.mxu1 %v11329_v32 }
 0x516   : > { %11334 = vmatprep.subr.bf16.mxu1 %v11333_v24 }
 0x517   : > { %10799 = vmatprep.mubr.msk.f32.mxu0 %vm1795_vm3, %v5218_v5  ;;  %v13969_v43 = vpop.f32.mrb[60].mxu1 }
 0x518   : > { %10800 = vmatmul.mubr.msk.f32.vlgmr.msra.gmra.mrb[102].mxu0 %vm1795_vm3, %v5219_v40  ;;  %v13972_v49 = vpop.f32.mrb[61].mxu1 }
 0x519   : > { %11336 = vmatpush3.bf16.msra.mxu1 %v11333_v24 }
 0x51a   : > { %v13974_v38 = vpop.f32.mrb[74].mxu0  ;;  %11338 = vmatprep.subr.bf16.mxu1 %v11337_v48 }
 0x51b   : > { %v13976_v54 = vpop.f32.mrb[75].mxu0 }
 0x51d   : > { %11340 = vmatpush3.bf16.msra.mxu1 %v11337_v48 }
 0x525   : > { %v13978_v37 = vpop.f32.mrb[76].mxu0 }
 0x526   : > { %v13980_v17 = vpop.f32.mrb[77].mxu0 }
 0x52c   : > { %v13982_v12 = vpop.f32.mrb[62].mxu1 }
 0x52d   : > { %v13984_v29 = vpop.f32.mrb[63].mxu1 }
 0x535   : > { %v13986_v34 = vpop.f32.mrb[78].mxu0 }
 0x536   : > { %v13988_v57 = vpop.f32.mrb[79].mxu0 }
 0x54d   : > { %v10640_v45 = vpop.f32.mrb[64].mxu1 }
 0x54e   : > { %v5940_v23 = vpop.f32.mrb[65].mxu1  ;;  %7830 = vrot.lane.b32.xlu1 %v10640_v45, %s12084_s23 }
 0x54f   : > { %7828 = vrot.lane.b32.xlu0 %v5940_v23, %s12084_s23 }
 0x556   : > { %v10647_v41 = vpop.f32.mrb[80].mxu0 }
 0x557   : > { %7834 = vrot.lane.b32.xlu1 %v10647_v41, %s12084_s23  ;;  %v6021_v62 = vpop.f32.mrb[81].mxu0 }
 0x558   : > { %7832 = vrot.lane.b32.xlu0 %v6021_v62, %s12084_s23 }
 0x55b   : > { %v10654_v14 = vpop.f32.mrb[66].mxu1 }
 0x55c   : > { %v6102_v20 = vpop.f32.mrb[67].mxu1  ;;  %7838 = vrot.lane.b32.xlu1 %v10654_v14, %s12084_s23 }
 0x55d   : > { %7836 = vrot.lane.b32.xlu0 %v6102_v20, %s12084_s23 }
 0x56b   : > { %v10661_v1 = vpop.f32.mrb[82].mxu0 }
 0x56c   : > { %7842 = vrot.lane.b32.xlu1 %v10661_v1, %s12084_s23  ;;  %v6183_v30 = vpop.f32.mrb[83].mxu0 }
 0x56d   : > { %7840 = vrot.lane.b32.xlu0 %v6183_v30, %s12084_s23 }
 0x571   : > { %v10668_v50 = vpop.f32.mrb[68].mxu1 }
 0x572   : > { %v6264_v44 = vpop.f32.mrb[69].mxu1  ;;  %7846 = vrot.lane.b32.xlu1 %v10668_v50, %s12084_s23 }
 0x573   : > { %7844 = vrot.lane.b32.xlu0 %v6264_v44, %s12084_s23 }
 0x57b   : > { %v10675_v0 = vpop.f32.mrb[84].mxu0 }
 0x57c   : > { %7850 = vrot.lane.b32.xlu1 %v10675_v0, %s12084_s23  ;;  %v6345_v3 = vpop.f32.mrb[85].mxu0 }
 0x57d   : > { %7848 = vrot.lane.b32.xlu0 %v6345_v3, %s12084_s23 }
 0x581   : > { %v10682_v26 = vpop.f32.mrb[70].mxu1 }
 0x582   : > { %v6426_v21 = vpop.f32.mrb[71].mxu1  ;;  %7854 = vrot.lane.b32.xlu1 %v10682_v26, %s12084_s23 }
 0x583   : > { %7852 = vrot.lane.b32.xlu0 %v6426_v21, %s12084_s23 }
 0x587   : > { %v10689_v22 = vpop.f32.mrb[86].mxu0 }
 0x588   : > { %7858 = vrot.lane.b32.xlu1 %v10689_v22, %s12084_s23  ;;  %v6507_v39 = vpop.f32.mrb[87].mxu0 }
 0x589   : > { %7856 = vrot.lane.b32.xlu0 %v6507_v39, %s12084_s23  ;;  %v10696_v16 = vpop.f32.mrb[72].mxu1 }
 0x58a   : > { %v6588_v15 = vpop.f32.mrb[73].mxu1 }
 0x58c   : > { %7894 = vrot.lane.b32.xlu1 %v10696_v16, %s12085_s1 }
 0x58d   : > { %7892 = vrot.lane.b32.xlu0 %v6588_v15, %s12085_s1 }
 0x58f   : > { %v10703_v60 = vpop.f32.mrb[88].mxu0 }
 0x590   : > { %7898 = vrot.lane.b32.xlu1 %v10703_v60, %s12085_s1  ;;  %v6669_v28 = vpop.f32.mrb[89].mxu0 }
 0x591   : > { %7896 = vrot.lane.b32.xlu0 %v6669_v28, %s12085_s1  ;;  %v10710_v31 = vpop.f32.mrb[74].mxu1 }
 0x592   : > { %v6750_v4 = vpop.f32.mrb[75].mxu1 }
 0x594   : > { %7902 = vrot.lane.b32.xlu1 %v10710_v31, %s12085_s1 }
 0x595   : > { %7900 = vrot.lane.b32.xlu0 %v6750_v4, %s12085_s1 }
 0x59b   : > { %v10717_v51 = vpop.f32.mrb[90].mxu0 }
 0x59c   : > { %7906 = vrot.lane.b32.xlu1 %v10717_v51, %s12085_s1  ;;  %v6831_v2 = vpop.f32.mrb[91].mxu0 }
 0x59d   : > { %7904 = vrot.lane.b32.xlu0 %v6831_v2, %s12085_s1 }
 0x5a3   : > { %v10724_v6 = vpop.f32.mrb[76].mxu1 }
 0x5a4   : > { %v6912_v25 = vpop.f32.mrb[77].mxu1  ;;  %7910 = vrot.lane.b32.xlu1 %v10724_v6, %s12085_s1 }
 0x5a5   : > { %7908 = vrot.lane.b32.xlu0 %v6912_v25, %s12085_s1 }
 0x5ab   : > { %v10731_v10 = vpop.f32.mrb[92].mxu0 }
 0x5ac   : > { %7914 = vrot.lane.b32.xlu1 %v10731_v10, %s12085_s1  ;;  %v6993_v13 = vpop.f32.mrb[93].mxu0 }
 0x5ad   : > { %7912 = vrot.lane.b32.xlu0 %v6993_v13, %s12085_s1 }
 0x5ae   : > { %v10738_v53 = vpop.f32.mrb[78].mxu1 }
 0x5af   : > { %v7074_v9 = vpop.f32.mrb[79].mxu1 }
 0x5b0   : > { %7918 = vrot.lane.b32.xlu1 %v10738_v53, %s12085_s1 }
 0x5b1   : > { %7916 = vrot.lane.b32.xlu0 %v7074_v9, %s12085_s1 }
 0x5bb   : > { %v10745_v36 = vpop.f32.mrb[94].mxu0 }
 0x5bc   : > { %7922 = vrot.lane.b32.xlu1 %v10745_v36, %s12085_s1  ;;  %v7155_v46 = vpop.f32.mrb[95].mxu0 }
 0x5bd   : > { %7920 = vrot.lane.b32.xlu0 %v7155_v46, %s12085_s1  ;;  %s652_s1 = scalar_lea.vmem [#allocation2], %s9463_s0 }
 0x5be   : > { %v10752_v11 = vpop.f32.mrb[80].mxu1  ;;  %s9400_s2 = sshll.u32 %s652_s1, 4  ;;  %s14871_s2 = int_to_ptr.vmem [resolvable:$true] %s9400_s2 }
 0x5bf   : > { %v7236_v55 = vpop.f32.mrb[81].mxu1  ;;  %s12017_s4 = scalar_lea.vmem %s14871_s2, 128 }
 0x5c0   : > { %7958 = vrot.lane.b32.xlu1 %v10752_v11, %s12086_s29  ;;  %v7831_v14 = vpop.permute.xlu1 %7830  ;;  %p12018_p11 = scmp.ne.s32.totalorder %s14871_s2, %s12017_s4 }
 0x5c1   : > { %7956 = vrot.lane.b32.xlu0 %v7236_v55, %s12086_s29  ;;  %v7829_v21 = vpop.permute.xlu0 %7828 }
 0x5c2   : > { %v8004_v11 = vsel %vm1795_vm3, %v13940_v52, %v7829_v21  ;;  %p12019_p12 = pnand %p12018_p11, %p12239_p5 }
 0x5c4   : > { %p12020_p13 = pneg %p12019_p12 }
 0x5c7   : > { %v10759_v5 = vpop.f32.mrb[96].mxu0 }
 0x5c8   : > { %7962 = vrot.lane.b32.xlu1 %v10759_v5, %s12086_s29  ;;  %v7317_v40 = vpop.f32.mrb[97].mxu0  ;;  %v8005_v5 = vsel %vm1795_vm3, %v13938_v27, %v7831_v14 }
 0x5c9   : > { %7960 = vrot.lane.b32.xlu0 %v7317_v40, %s12086_s29  ;;  %v7835_v30 = vpop.permute.xlu1 %7834 }
 0x5ca   : > { %v7833_v39 = vpop.permute.xlu0 %7832  ;;  %v8007_v27 = vsel %vm1795_vm3, %v13955_v35, %v7835_v30 }
 0x5cb   : > { %v8006_v52 = vsel %vm1795_vm3, %v13958_v33, %v7833_v39 }
 0x5cc   : > { %v10766_v45 = vpop.f32.mrb[82].mxu1 }
 0x5cd   : > { %7966 = vrot.lane.b32.xlu1 %v10766_v45, %s12086_s29  ;;  %v7398_v23 = vpop.f32.mrb[83].mxu1 }
 0x5ce   : > { %7964 = vrot.lane.b32.xlu0 %v7398_v23, %s12086_s29  ;;  %v14042_v3 = vpop.permute.xlu1 %7838 }
 0x5cf   : > { %v7837_v31 = vpop.permute.xlu0 %7836  ;;  %v8009_v35 = vsel %vm1795_vm3, %v13949_v61, %v14042_v3 }
 0x5d0   : > { %v8008_v33 = vsel %vm1795_vm3, %v13952_v19, %v7837_v31 }
 0x5d7   : > { %v10773_v41 = vpop.f32.mrb[98].mxu0 }
 0x5d8   : > { %7970 = vrot.lane.b32.xlu1 %v10773_v41, %s12086_s29  ;;  %v7479_v62 = vpop.f32.mrb[99].mxu0 }
 0x5d9   : > { %7968 = vrot.lane.b32.xlu0 %v7479_v62, %s12086_s29 }
 0x5db   : > { %v10780_v20 = vpop.f32.mrb[84].mxu1 }
 0x5dc   : > { %7974 = vrot.lane.b32.xlu1 %v10780_v20, %s12086_s29  ;;  %v7560_v1 = vpop.f32.mrb[85].mxu1 }
 0x5dd   : > { %7972 = vrot.lane.b32.xlu0 %v7560_v1, %s12086_s29 }
 0x5de   : > { %v14046_v22 = vpop.permute.xlu1 %7842 }
 0x5df   : > { %v10787_v50 = vpop.f32.mrb[100].mxu0  ;;  %v7841_v51 = vpop.permute.xlu0 %7840  ;;  %v8011_v61 = vsel %vm1795_vm3, %v13974_v38, %v14046_v22 }
 0x5e0   : > { %7978 = vrot.lane.b32.xlu1 %v10787_v50, %s12086_s29  ;;  %v7641_v44 = vpop.f32.mrb[101].mxu0  ;;  %v8010_v19 = vsel %vm1795_vm3, %v13976_v54, %v7841_v51 }
 0x5e1   : > { %7976 = vrot.lane.b32.xlu0 %v7641_v44, %s12086_s29 }
 0x5e3   : > { %v10794_v0 = vpop.f32.mrb[86].mxu1 }
 0x5e4   : > { %7982 = vrot.lane.b32.xlu1 %v10794_v0, %s12086_s29  ;;  %v7722_v26 = vpop.f32.mrb[87].mxu1  ;;  %v14048_v15 = vpop.permute.xlu1 %7846 }
 0x5e5   : > { %7980 = vrot.lane.b32.xlu0 %v7722_v26, %s12086_s29  ;;  %v14058_v6 = vpop.permute.xlu0 %7844  ;;  %v8013_v38 = vsel %vm1795_vm3, %v13969_v43, %v14048_v15 }
 0x5e6   : > { %v8012_v54 = vsel %vm1795_vm3, %v13972_v49, %v14058_v6 }
 0x5eb   : > { %v10801_v16 = vpop.f32.mrb[102].mxu0 }
 0x5ec   : > { %7986 = vrot.lane.b32.xlu1 %v10801_v16, %s12086_s29  ;;  %v7803_v60 = vpop.f32.mrb[103].mxu0 }
 0x5ed   : > { %7984 = vrot.lane.b32.xlu0 %v7803_v60, %s12086_s29  ;;  %s9770_s29 = sshll.u32 %s12222_s3, 7  ;;  %s12090_s3 = smov [#allocation2]  }
 0x5ee   : > { %v14052_v28 = vpop.permute.xlu1 %7850  ;;  %s14869_s23 = scalar_lea.hbm %s15153_s20, %s9770_s29  ;;  %s12021_s0 = sshll.u32 %s12090_s3, 4  ;;  %s12022_s0 = int_to_ptr.vmem [resolvable:$false] %s12021_s0 }
 0x5ef   : > { %v14064_v47 = vpop.permute.xlu0 %7848  ;;  %v8015_v43 = vsel %vm1795_vm3, %v13978_v37, %v14052_v28  ;;  %s12023_s26 = scalar_lea.vmem %s12022_s0, 256  ;;  %p12024_p0 = scmp.lt.s32.totalorder %s14871_s2, %s12022_s0 }
 0x5f0   : > { %v8014_v49 = vsel %vm1795_vm3, %v13980_v17, %v14064_v47  ;;  %p12025_p1 = scmp.lt.s32.totalorder %s12023_s26, %s12017_s4 }
 0x5f2   : > { %p12026_p2 = por %p12025_p1, %p12024_p0 }
 0x5f4   : > { %v7855_v4 = vpop.permute.xlu1 %7854  ;;  %p12027_p3 = pnand %p12026_p2, %p12020_p13 }
 0x5f5   : > { %v14056_v2 = vsel %vm1795_vm3, %v13982_v12, %v7855_v4  ;;  %v14066_v8 = vpop.permute.xlu0 %7852 }
 0x5f6   : > { %v8016_v17 = vsel %vm1795_vm3, %v13984_v29, %v14066_v8 }
 0x5fa   : > { %v7859_v25 = vpop.permute.xlu1 %7858 }
 0x5fb   : > { %v14062_v63 = vsel %vm1795_vm3, %v13986_v34, %v7859_v25  ;;  %v14068_v18 = vpop.permute.xlu0 %7856 }
 0x5fc   : > { %v8018_v29 = vsel %vm1795_vm3, %v13988_v57, %v14068_v18  ;;  %v14174_v57 = vld [vmem:[%s14921_s10] ss:$0 sm:$0xff] }
 0x5fe   : > { %v7895_v56 = vpop.permute.xlu1 %7894 }
 0x5ff   : > { %v7893_v32 = vpop.permute.xlu0 %7892  ;;  %v8022_v23 = vsel %vm8020_vm5, %v8005_v5, %v7895_v56 }
 0x600   : > { %v8021_v40 = vsel %vm8020_vm5, %v8004_v11, %v7893_v32 }
 0x602   : > { %v7899_v42 = vpop.permute.xlu1 %7898 }
 0x603   : > { %v7897_v7 = vpop.permute.xlu0 %7896  ;;  %v8024_v50 = vsel %vm8020_vm5, %v8007_v27, %v7899_v42 }
 0x604   : > { %v8023_v14 = vsel %vm8020_vm5, %v8006_v52, %v7897_v7 }
 0x606   : > { %v7903_v24 = vpop.permute.xlu1 %7902 }
 0x607   : > { %v7901_v12 = vpop.permute.xlu0 %7900  ;;  %v8026_v39 = vsel %vm8020_vm5, %v8009_v35, %v7903_v24 }
 0x608   : > { %v8025_v30 = vsel %vm8020_vm5, %v8008_v33, %v7901_v12  ;;  %v15139_v33 = vld [vmem:[#allocation13_spill] sm:$0xff] }
 0x60e   : > { %v7907_v10 = vpop.permute.xlu1 %7906 }
 0x60f   : > { %v7905_v13 = vpop.permute.xlu0 %7904  ;;  %v8028_v25 = vsel %vm8020_vm5, %v8011_v61, %v7907_v10 }
 0x610   : > { %v8027_v3 = vsel %vm8020_vm5, %v8010_v19, %v7905_v13  ;;  %v15141_v19 = vld [vmem:[#allocation15_spill] sm:$0xff] }
 0x616   : > { %v7911_v53 = vpop.permute.xlu1 %7910 }
 0x617   : > { %v7909_v9 = vpop.permute.xlu0 %7908  ;;  %v8030_v7 = vsel %vm8020_vm5, %v8013_v38, %v7911_v53 }
 0x618   : > { %v8029_v22 = vsel %vm8020_vm5, %v8012_v54, %v7909_v9 }
 0x61e   : > { %v14070_v59 = vpop.permute.xlu1 %7914 }
 0x61f   : > { %v7913_v34 = vpop.permute.xlu0 %7912  ;;  %v8032_v13 = vsel %vm8020_vm5, %v8015_v43, %v14070_v59 }
 0x620   : > { %v8031_v15 = vsel %vm8020_vm5, %v8014_v49, %v7913_v34 }
 0x622   : > { %v14072_v58 = vpop.permute.xlu1 %7918 }
 0x623   : > { %v14074_v48 = vpop.permute.xlu0 %7916  ;;  %v8034_v59 = vsel %vm8020_vm5, %v14056_v2, %v14072_v58 }
 0x624   : > { %v8033_v37 = vsel %vm8020_vm5, %v8016_v17, %v14074_v48 }
 0x62e   : > { %v14076_v36 = vpop.permute.xlu1 %7922 }
 0x62f   : > { %v14078_v46 = vpop.permute.xlu0 %7920  ;;  %v8036_v2 = vsel %vm8020_vm5, %v14062_v63, %v14076_v36  ;;  %v15136_v63 = vld [vmem:[#allocation12_spill] sm:$0xff] }
 0x630   : > { %v8035_v48 = vsel %vm8020_vm5, %v8018_v29, %v14078_v46  ;;  %v15147_v29 = vld [vmem:[#allocation22_spill] sm:$0xff] }
 0x632   : > { %v7959_v55 = vpop.permute.xlu1 %7958 }
 0x633   : > { %v7957_v45 = vpop.permute.xlu0 %7956  ;;  %v8039_v62 = vsel %vm8037_vm6, %v8022_v23, %v7959_v55  ;;  %v15137_v23 = vld [vmem:[#allocation11_spill] sm:$0xff] }
 0x634   : > { %v8038_v41 = vsel %vm8037_vm6, %v8021_v40, %v7957_v45 }
 0x635   : > { %10818 = vmatprep.mubr.msk.f32.mxu1 %vm897_vm2, %v8038_v41 }
 0x636   : > { %10819 = vmatmul.mubr.msk.f32.vlgmr.msra.gmra.mrb[88].mxu1 %vm897_vm2, %v8039_v62 }
 0x63a   : > { %v7963_v20 = vpop.permute.xlu1 %7962 }
 0x63b   : > { %v7961_v1 = vpop.permute.xlu0 %7960  ;;  %v8041_v0 = vsel %vm8037_vm6, %v8024_v50, %v7963_v20  ;;  %v15138_v50 = vld [vmem:[#allocation14_spill] sm:$0xff] }
 0x63c   : > { %v8040_v44 = vsel %vm8037_vm6, %v8023_v14, %v7961_v1 }
 0x63d   : > { %10821 = vmatprep.mubr.msk.f32.mxu1 %vm897_vm2, %v8040_v44 }
 0x63e   : > { %10822 = vmatmul.mubr.msk.f32.gmra.mrb[90].mxu1 %vm897_vm2, %v8041_v0 }
 0x63f   : > { %v7967_v26 = vpop.permute.xlu1 %7966 }
 0x640   : > { %v7965_v21 = vpop.permute.xlu0 %7964  ;;  %v8043_v60 = vsel %vm8037_vm6, %v8026_v39, %v7967_v26 }
 0x641   : > { %v8042_v16 = vsel %vm8037_vm6, %v8025_v30, %v7965_v21 }
 0x642   : > { %10824 = vmatprep.mubr.msk.f32.mxu1 %vm897_vm2, %v8042_v16  ;;  %v15140_v16 = vld [vmem:[#allocation16_spill] sm:$0xff] }
 0x643   : > { %10825 = vmatmul.mubr.msk.f32.gmra.mrb[92].mxu1 %vm897_vm2, %v8043_v60 }
 0x64a   : > { %v7971_v31 = vpop.permute.xlu1 %7970 }
 0x64b   : > { %v7969_v4 = vpop.permute.xlu0 %7968  ;;  %v8045_v32 = vsel %vm8037_vm6, %v8028_v25, %v7971_v31 }
 0x64c   : > { %v8044_v56 = vsel %vm8037_vm6, %v8027_v3, %v7969_v4 }
 0x64d   : > { %10827 = vmatprep.mubr.msk.f32.mxu1 %vm897_vm2, %v8044_v56 }
 0x64e   : > { %10828 = vmatmul.mubr.msk.f32.gmra.mrb[94].mxu1 %vm897_vm2, %v8045_v32  ;;  %v7975_v51 = vpop.permute.xlu1 %7974 }
 0x64f   : > { %v7973_v42 = vpop.permute.xlu0 %7972  ;;  %v8047_v12 = vsel %vm8037_vm6, %v8030_v7, %v7975_v51  ;;  %v15142_v51 = vld [vmem:[#allocation17_spill] sm:$0xff] }
 0x650   : > { %v8046_v24 = vsel %vm8037_vm6, %v8029_v22, %v7973_v42  ;;  %v15143_v22 = vld [vmem:[#allocation18_spill] sm:$0xff] }
 0x651   : > { %10830 = vmatprep.mubr.msk.f32.mxu1 %vm897_vm2, %v8046_v24 }
 0x652   : > { %10831 = vmatmul.mubr.msk.f32.gmra.mrb[96].mxu1 %vm897_vm2, %v8047_v12  ;;  %v7979_v6 = vpop.permute.xlu1 %7978 }
 0x653   : > { %v7977_v10 = vpop.permute.xlu0 %7976  ;;  %v8049_v9 = vsel %vm8037_vm6, %v8032_v13, %v7979_v6  ;;  %v15145_v13 = vld [vmem:[#allocation20_spill] sm:$0xff] }
 0x654   : > { %v8048_v53 = vsel %vm8037_vm6, %v8031_v15, %v7977_v10  ;;  %v15144_v15 = vld [vmem:[#allocation19_spill] sm:$0xff] }
 0x655   : > { %10833 = vmatprep.mubr.msk.f32.mxu1 %vm897_vm2, %v8048_v53 }
 0x656   : > { %10834 = vmatmul.mubr.msk.f32.gmra.mrb[98].mxu1 %vm897_vm2, %v8049_v9  ;;  %v7983_v47 = vpop.permute.xlu1 %7982 }
 0x657   : > { %v7981_v28 = vpop.permute.xlu0 %7980  ;;  %v8051_v11 = vsel %vm8037_vm6, %v8034_v59, %v7983_v47 }
 0x658   : > { %v8050_v34 = vsel %vm8037_vm6, %v8033_v37, %v7981_v28 }
 0x659   : > { %10836 = vmatprep.mubr.msk.f32.mxu1 %vm897_vm2, %v8050_v34  ;;  %v15146_v34 = vld [vmem:[#allocation21_spill] sm:$0xff] }
 0x65a   : > { %10837 = vmatmul.mubr.msk.f32.gmra.mrb[100].mxu1 %vm897_vm2, %v8051_v11 }
 0x65e   : > { %v7987_v8 = vpop.permute.xlu1 %7986 }
 0x65f   : > { %v7985_v55 = vpop.permute.xlu0 %7984  ;;  %v8053_v5 = vsel %vm8037_vm6, %v8036_v2, %v7987_v8 }
 0x660   : > { %v8052_v58 = vsel %vm8037_vm6, %v8035_v48, %v7985_v55 }
 0x661   : > { %10839 = vmatprep.mubr.msk.f32.mxu1 %vm897_vm2, %v8052_v58 }
 0x662   : > { %10840 = vmatmul.mubr.msk.f32.gmra.mrb[102].mxu1 %vm897_vm2, %v8053_v5 }
 0x709   : > { %v10820_v18 = vpop.f32.mrb[88].mxu1 }
 0x70a   : > { %v8189_v46 = vadd.f32 %v10820_v18, %v14174_v57  ;;  %v8183_v40 = vpop.f32.mrb[89].mxu1 }
 0x70b   : > { %v8184_v45 = vadd.f32 %v14174_v57, %v8183_v40 }
 0x70c   : > { %v14179_v36 = vadd.f32 %v8189_v46, %v15136_v63  ;;  %v15148_v46 = vld [vmem:[#allocation23_spill] sm:$0xff] }
 0x70d   : > { %v14182_v41 = vadd.f32 %v8184_v45, %v15137_v23  ;;  %v15149_v45 = vld [vmem:[#allocation24_spill] sm:$0xff] }
 0x70e   : > { %v8283_v62 = vsel %vm897_vm2, %v14179_v36, 0.0 }
 0x70f   : > { %8284 = vadd.xlane.f32.xlu1 %v8283_v62  ;;  %v8280_v52 = vsel %vm897_vm2, %v14182_v41, 0.0 }
 0x710   : > { %8281 = vadd.xlane.f32.xlu0 %v8280_v52 }
 0x711   : > { %v10823_v20 = vpop.f32.mrb[90].mxu1 }
 0x712   : > { %v8193_v27 = vpop.f32.mrb[91].mxu1  ;;  %v8199_v14 = vadd.f32 %v10823_v20, %v14174_v57 }
 0x713   : > { %v8194_v1 = vadd.f32 %v14174_v57, %v8193_v27 }
 0x714   : > { %v14194_v26 = vadd.f32 %v8199_v14, %v15139_v33 }
 0x715   : > { %v14191_v44 = vadd.f32 %v8194_v1, %v15138_v50  ;;  %v15150_v1 = vld [vmem:[#allocation25_spill] sm:$0xff] }
 0x716   : > { %v10826_v0 = vpop.f32.mrb[92].mxu1  ;;  %v8289_v61 = vsel %vm897_vm2, %v14194_v26, 0.0 }
 0x717   : > { %v8209_v35 = vadd.f32 %v10826_v0, %v14174_v57  ;;  %v8203_v30 = vpop.f32.mrb[93].mxu1  ;;  %v8286_v21 = vsel %vm897_vm2, %v14191_v44, 0.0  ;;  %v15151_v0 = vld [vmem:[#allocation26_spill] sm:$0xff] }
 0x718   : > { %v8204_v39 = vadd.f32 %v14174_v57, %v8203_v30  ;;  %8287 = vadd.xlane.f32.xlu0 %v8286_v21 }
 0x719   : > { %v14204_v31 = vadd.f32 %v8209_v35, %v15141_v19 }
 0x71a   : > { %v14201_v60 = vadd.f32 %v8204_v39, %v15140_v16 }
 0x71b   : > { %v8295_v4 = vsel %vm897_vm2, %v14204_v31, 0.0 }
 0x71c   : > { %8290 = vadd.xlane.f32.xlu0 %v8289_v61  ;;  %v8292_v3 = vsel %vm897_vm2, %v14201_v60, 0.0 }
 0x71d   : > { %8293 = vadd.xlane.f32.xlu1 %v8292_v3 }
 0x720   : > { %8296 = vadd.xlane.f32.xlu0 %v8295_v4 }
 0x721   : > { %v10829_v25 = vpop.f32.mrb[94].mxu1 }
 0x722   : > { %v8219_v56 = vadd.f32 %v10829_v25, %v14174_v57  ;;  %v8213_v32 = vpop.f32.mrb[95].mxu1 }
 0x723   : > { %v8214_v54 = vadd.f32 %v14174_v57, %v8213_v32 }
 0x724   : > { %v14215_v38 = vadd.f32 %v8219_v56, %v15142_v51 }
 0x725   : > { %v14218_v42 = vadd.f32 %v8214_v54, %v15143_v22  ;;  %v10832_v7 = vpop.f32.mrb[96].mxu1 }
 0x726   : > { %v8229_v24 = vadd.f32 %v10832_v7, %v14174_v57  ;;  %v8223_v12 = vpop.f32.mrb[97].mxu1  ;;  %v8301_v49 = vsel %vm897_vm2, %v14215_v38, 0.0 }
 0x727   : > { %v8224_v6 = vadd.f32 %v14174_v57, %v8223_v12  ;;  %8302 = vadd.xlane.f32.xlu0 %v8301_v49  ;;  %v8298_v43 = vsel %vm897_vm2, %v14218_v42, 0.0 }
 0x728   : > { %v14227_v10 = vadd.f32 %v8229_v24, %v15144_v15  ;;  %8299 = vadd.xlane.f32.xlu1 %v8298_v43 }
 0x729   : > { %v14230_v53 = vadd.f32 %v8224_v6, %v15145_v13  ;;  %v10835_v9 = vpop.f32.mrb[98].mxu1 }
 0x72a   : > { %v8239_v17 = vadd.f32 %v10835_v9, %v14174_v57  ;;  %v8233_v47 = vpop.f32.mrb[99].mxu1  ;;  %v8307_v37 = vsel %vm897_vm2, %v14227_v10, 0.0 }
 0x72b   : > { %v8234_v28 = vadd.f32 %v14174_v57, %v8233_v47  ;;  %8308 = vadd.xlane.f32.xlu0 %v8307_v37  ;;  %v8304_v59 = vsel %vm897_vm2, %v14230_v53, 0.0 }
 0x72c   : > { %v14239_v11 = vadd.f32 %v8239_v17, %v15146_v34  ;;  %8305 = vadd.xlane.f32.xlu1 %v8304_v59 }
 0x72d   : > { %v14242_v8 = vadd.f32 %v8234_v28, %v15147_v29  ;;  %v10838_v48 = vpop.f32.mrb[100].mxu1 }
 0x72e   : > { %v8249_v55 = vadd.f32 %v10838_v48, %v14174_v57  ;;  %v8243_v2 = vpop.f32.mrb[101].mxu1  ;;  %v8313_v58 = vsel %vm897_vm2, %v14239_v11, 0.0 }
 0x72f   : > { %v8244_v5 = vadd.f32 %v14174_v57, %v8243_v2  ;;  %8314 = vadd.xlane.f32.xlu0 %v8313_v58  ;;  %v8310_v18 = vsel %vm897_vm2, %v14242_v8, 0.0  ;;  %v8534_v2 = vld [vmem:[%s14924_s13 + $0x8] sm:$0xff] }
 0x730   : > { %v14251_v40 = vadd.f32 %v8249_v55, %v15148_v46  ;;  %8311 = vadd.xlane.f32.xlu1 %v8310_v18  ;;  %v8533_v55 = vld [vmem:[%s14924_s13] sm:$0xff] }
 0x731   : > { %v14254_v63 = vadd.f32 %v8244_v5, %v15149_v45  ;;  %v11341_v46 = vpack.c.bf16 %v8534_v2, %v8533_v55  ;;  %v8759_v2 = vld [vmem:[%s14926_s15 + $0x10] sm:$0xff] }
 0x732   : > { %v8319_v23 = vsel %vm897_vm2, %v14251_v40, 0.0 }
 0x733   : > { %8320 = vadd.xlane.f32.xlu0 %v8319_v23  ;;  %v8316_v62 = vsel %vm897_vm2, %v14254_v63, 0.0  ;;  %11342 = vmatprep.subr.bf16.mxu0 %v11341_v46 }
 0x734   : > { %8317 = vadd.xlane.f32.xlu1 %v8316_v62  ;;  %11344 = vmatpush3.bf16.msra.mxu0 %v11341_v46  ;;  %v8761_v46 = vld [vmem:[%s14926_s15 + $0x20] sm:$0xff] }
 0x735   : > { %v10841_v52 = vpop.f32.mrb[102].mxu1 }
 0x736   : > { %v8259_v20 = vadd.f32 %v10841_v52, %v14174_v57  ;;  %v8253_v27 = vpop.f32.mrb[103].mxu1 }
 0x737   : > { %v8254_v14 = vadd.f32 %v14174_v57, %v8253_v27  ;;  %v8535_v27 = vld [vmem:[%s14924_s13 + $0x10] sm:$0xff] }
 0x738   : > { %v14263_v50 = vadd.f32 %v8259_v20, %v15150_v1 }
 0x739   : > { %v14266_v33 = vadd.f32 %v8254_v14, %v15151_v0 }
 0x73a   : > { %v8325_v35 = vsel %vm897_vm2, %v14263_v50, 0.0 }
 0x73b   : > { %8326 = vadd.xlane.f32.xlu0 %v8325_v35  ;;  %v8322_v30 = vsel %vm897_vm2, %v14266_v33, 0.0 }
 0x73c   : > { %8323 = vadd.xlane.f32.xlu1 %v8322_v30 }
 0x79c   : > { %v8285_v21 = vpop.xlane.xlu1 %8284 }
 0x79d   : > { %v8330_v39 = vmul.f32 0.015625, %v8285_v21  ;;  %v8282_v16 = vpop.xlane.xlu0 %8281 }
 0x79e   : > { %v8329_v19 = vmul.f32 0.015625, %v8282_v16 }
 0x79f   : > { %v14273_v57 = vsub.f32 %v14179_v36, %v8330_v39 }
 0x7a0   : > { %v14276_v61 = vsub.f32 %v14182_v41, %v8329_v19 }
 0x7a1   : > { %v8362_v3 = vmul.f32 %v14273_v57, %v14273_v57 }
 0x7a2   : > { %v8361_v4 = vmul.f32 %v14276_v61, %v14276_v61 }
 0x7a3   : > { %v8380_v25 = vsel %vm897_vm2, %v8362_v3, 0.0 }
 0x7a4   : > { %8381 = vadd.xlane.f32.xlu0 %v8380_v25  ;;  %v8377_v56 = vsel %vm897_vm2, %v8361_v4, 0.0  ;;  %v8537_v4 = vld [vmem:[%s14924_s13 + $0x20] sm:$0xff] }
 0x7a5   : > { %8378 = vadd.xlane.f32.xlu1 %v8377_v56  ;;  %v8288_v32 = vpop.xlane.xlu0 %8287 }
 0x7a6   : > { %v8331_v54 = vmul.f32 0.015625, %v8288_v32 }
 0x7a8   : > { %v14285_v36 = vsub.f32 %v14191_v44, %v8331_v54 }
 0x7a9   : > { %v8291_v51 = vpop.xlane.xlu0 %8290 }
 0x7aa   : > { %v8332_v41 = vmul.f32 0.015625, %v8291_v51  ;;  %v8294_v22 = vpop.xlane.xlu1 %8293  ;;  %v8363_v7 = vmul.f32 %v14285_v36, %v14285_v36 }
 0x7ab   : > { %v8333_v24 = vmul.f32 0.015625, %v8294_v22 }
 0x7ac   : > { %v14290_v12 = vsub.f32 %v14194_v26, %v8332_v41  ;;  %v8383_v49 = vsel %vm897_vm2, %v8363_v7, 0.0 }
 0x7ad   : > { %v14294_v6 = vsub.f32 %v14201_v60, %v8333_v24  ;;  %8384 = vadd.xlane.f32.xlu1 %v8383_v49  ;;  %v8297_v43 = vpop.xlane.xlu0 %8296  ;;  %v8539_v49 = vld [vmem:[%s14924_s13 + $0x30] sm:$0xff] }
 0x7ae   : > { %v8334_v15 = vmul.f32 0.015625, %v8297_v43  ;;  %v8364_v44 = vmul.f32 %v14290_v12, %v14290_v12  ;;  %v8540_v43 = vld [vmem:[%s14924_s13 + $0x38] sm:$0xff] }
 0x7af   : > { %v8365_v13 = vmul.f32 %v14294_v6, %v14294_v6 }
 0x7b0   : > { %v14301_v9 = vsub.f32 %v14204_v31, %v8334_v15  ;;  %v8386_v26 = vsel %vm897_vm2, %v8364_v44, 0.0  ;;  %v11353_v15 = vpack.c.bf16 %v8540_v43, %v8539_v49 }
 0x7b1   : > { %8387 = vadd.xlane.f32.xlu0 %v8386_v26  ;;  %v8389_v17 = vsel %vm897_vm2, %v8365_v13, 0.0 }
 0x7b2   : > { %8390 = vadd.xlane.f32.xlu1 %v8389_v17  ;;  %v8366_v60 = vmul.f32 %v14301_v9, %v14301_v9 }
 0x7b4   : > { %v8303_v47 = vpop.xlane.xlu0 %8302  ;;  %v8392_v37 = vsel %vm897_vm2, %v8366_v60, 0.0 }
 0x7b5   : > { %v8336_v28 = vmul.f32 0.015625, %v8303_v47  ;;  %v8300_v59 = vpop.xlane.xlu1 %8299  ;;  %8393 = vadd.xlane.f32.xlu0 %v8392_v37 }
 0x7b6   : > { %v8335_v34 = vmul.f32 0.015625, %v8300_v59 }
 0x7b7   : > { %v14309_v29 = vsub.f32 %v14215_v38, %v8336_v28 }
 0x7b8   : > { %v14312_v31 = vsub.f32 %v14218_v42, %v8335_v34  ;;  %v8309_v48 = vpop.xlane.xlu0 %8308 }
 0x7b9   : > { %v8338_v58 = vmul.f32 0.015625, %v8309_v48  ;;  %v8306_v5 = vpop.xlane.xlu1 %8305  ;;  %v8368_v18 = vmul.f32 %v14309_v29, %v14309_v29 }
 0x7ba   : > { %v8337_v38 = vmul.f32 0.015625, %v8306_v5  ;;  %v8367_v42 = vmul.f32 %v14312_v31, %v14312_v31  ;;  %v8760_v5 = vld [vmem:[%s14926_s15 + $0x18] sm:$0xff] }
 0x7bb   : > { %v14325_v45 = vsub.f32 %v14227_v10, %v8338_v58  ;;  %v8398_v23 = vsel %vm897_vm2, %v8368_v18, 0.0  ;;  %v8536_v10 = vld [vmem:[%s14924_s13 + $0x18] sm:$0xff]  ;;  %v11361_v18 = vpack.c.bf16 %v8760_v5, %v8759_v2 }
 0x7bc   : > { %v14329_v62 = vsub.f32 %v14230_v53, %v8337_v38  ;;  %8399 = vadd.xlane.f32.xlu0 %v8398_v23  ;;  %v8315_v52 = vpop.xlane.xlu0 %8314  ;;  %v8395_v20 = vsel %vm897_vm2, %v8367_v42, 0.0  ;;  %v11345_v0 = vpack.c.bf16 %v8536_v10, %v8535_v27  ;;  %v8762_v38 = vld [vmem:[%s14926_s15 + $0x28] sm:$0xff]  ;;  %v8763_v23 = vld [vmem:[%s14926_s15 + $0x30] sm:$0xff]  ;;  %v8765_v27 = vld [vmem:[%s14926_s15 + $0x40] sm:$0xff] }
 0x7bd   : > { %v8340_v14 = vmul.f32 0.015625, %v8315_v52  ;;  %v8312_v1 = vpop.xlane.xlu1 %8311  ;;  %8396 = vadd.xlane.f32.xlu1 %v8395_v20  ;;  %v8370_v53 = vmul.f32 %v14325_v45, %v14325_v45  ;;  %v11365_v42 = vpack.c.bf16 %v8762_v38, %v8761_v46  ;;  %v8764_v52 = vld [vmem:[%s14926_s15 + $0x38] sm:$0xff]  ;;  %v8766_v10 = vld [vmem:[%s14926_s15 + $0x48] sm:$0xff] }
 0x7be   : > { %v8339_v35 = vmul.f32 0.015625, %v8312_v1  ;;  %v8369_v30 = vmul.f32 %v14329_v62, %v14329_v62  ;;  %11346 = vmatprep.subr.bf16.mxu0 %v11345_v0  ;;  %v11369_v20 = vpack.c.bf16 %v8764_v52, %v8763_v23  ;;  %v8767_v1 = vld [vmem:[%s14926_s15 + $0x50] sm:$0xff] }
 0x7bf   : > { %v14343_v21 = vsub.f32 %v14239_v11, %v8340_v14  ;;  %v8404_v39 = vsel %vm897_vm2, %v8370_v53, 0.0  ;;  %11348 = vmatpush3.bf16.msra.mxu0 %v11345_v0  ;;  %v8538_v11 = vld [vmem:[%s14924_s13 + $0x28] sm:$0xff]  ;;  %v11373_v14 = vpack.c.bf16 %v8766_v10, %v8765_v27  ;;  %v8768_v53 = vld [vmem:[%s14926_s15 + $0x58] sm:$0xff] }
 0x7c0   : > { %v14347_v16 = vsub.f32 %v14242_v8, %v8339_v35  ;;  %8405 = vadd.xlane.f32.xlu0 %v8404_v39  ;;  %v8321_v19 = vpop.xlane.xlu0 %8320  ;;  %v8401_v3 = vsel %vm897_vm2, %v8369_v30, 0.0  ;;  %v11349_v32 = vpack.c.bf16 %v8538_v11, %v8537_v4  ;;  %v11377_v0 = vpack.c.bf16 %v8768_v53, %v8767_v1  ;;  %v8769_v35 = vld [vmem:[%s14926_s15 + $0x60] sm:$0xff]  ;;  %v8770_v30 = vld [vmem:[%s14926_s15 + $0x68] sm:$0xff] }
 0x7c1   : > { %v8342_v25 = vmul.f32 0.015625, %v8321_v19  ;;  %v8318_v56 = vpop.xlane.xlu1 %8317  ;;  %8402 = vadd.xlane.f32.xlu1 %v8401_v3  ;;  %v8372_v8 = vmul.f32 %v14343_v21, %v14343_v21  ;;  %v11381_v39 = vpack.c.bf16 %v8770_v30, %v8769_v35 }
 0x7c2   : > { %v8341_v54 = vmul.f32 0.015625, %v8318_v56  ;;  %v8371_v51 = vmul.f32 %v14347_v16, %v14347_v16  ;;  %11350 = vmatprep.subr.bf16.mxu0 %v11349_v32 }
 0x7c3   : > { %v14361_v41 = vsub.f32 %v14251_v40, %v8342_v25  ;;  %v8410_v22 = vsel %vm897_vm2, %v8372_v8, 0.0  ;;  %11352 = vmatpush3.bf16.msra.mxu0 %v11349_v32 }
 0x7c4   : > { %v14365_v7 = vsub.f32 %v14254_v63, %v8341_v54  ;;  %8411 = vadd.xlane.f32.xlu0 %v8410_v22  ;;  %v8407_v24 = vsel %vm897_vm2, %v8371_v51, 0.0  ;;  %11354 = vmatprep.subr.bf16.mxu0 %v11353_v15 }
 0x7c5   : > { %8408 = vadd.xlane.f32.xlu1 %v8407_v24  ;;  %v8374_v40 = vmul.f32 %v14361_v41, %v14361_v41 }
 0x7c6   : > { %v8373_v63 = vmul.f32 %v14365_v7, %v14365_v7 }
 0x7c7   : > { %v8416_v44 = vsel %vm897_vm2, %v8374_v40, 0.0  ;;  %11356 = vmatpush3.bf16.msra.mxu0 %v11353_v15  ;;  %v14437_v40 = vld [vmem:[%s14922_s11] ss:$0 sm:$0xff] }
 0x7c8   : > { %8417 = vadd.xlane.f32.xlu0 %v8416_v44  ;;  %v8327_v13 = vpop.xlane.xlu0 %8326  ;;  %v8413_v26 = vsel %vm897_vm2, %v8373_v63, 0.0 }
 0x7c9   : > { %v8344_v17 = vmul.f32 0.015625, %v8327_v13  ;;  %v8324_v60 = vpop.xlane.xlu1 %8323  ;;  %8414 = vadd.xlane.f32.xlu1 %v8413_v26 }
 0x7ca   : > { %v8343_v47 = vmul.f32 0.015625, %v8324_v60 }
 0x7cb   : > { %v14381_v37 = vsub.f32 %v14263_v50, %v8344_v17  ;;  %v8757_v50 = vld [vmem:[%s14926_s15] sm:$0xff] }
 0x7cc   : > { %v14384_v28 = vsub.f32 %v14266_v33, %v8343_v47  ;;  %v8758_v33 = vld [vmem:[%s14926_s15 + $0x8] sm:$0xff]  ;;  %v14444_v47 = vld [vmem:[%s14923_s12] ss:$0 sm:$0xff] }
 0x7cd   : > { %v8376_v59 = vmul.f32 %v14381_v37, %v14381_v37  ;;  %v11357_v58 = vpack.c.bf16 %v8758_v33, %v8757_v50 }
 0x7ce   : > { %v8375_v34 = vmul.f32 %v14384_v28, %v14384_v28 }
 0x7cf   : > { %v8422_v48 = vsel %vm897_vm2, %v8376_v59, 0.0  ;;  %11358 = vmatprep.subr.bf16.mxu1 %v11357_v58 }
 0x7d0   : > { %8423 = vadd.xlane.f32.xlu0 %v8422_v48  ;;  %v8419_v55 = vsel %vm897_vm2, %v8375_v34, 0.0  ;;  %11360 = vmatpush3.bf16.msra.mxu1 %v11357_v58 }
 0x7d1   : > { %8420 = vadd.xlane.f32.xlu1 %v8419_v55  ;;  %11362 = vmatprep.subr.bf16.mxu1 %v11361_v18 }
 0x7d4   : > { %11364 = vmatpush3.bf16.msra.mxu1 %v11361_v18 }
 0x7d5   : > { %11366 = vmatprep.subr.bf16.mxu1 %v11365_v42 }
 0x7d8   : > { %11368 = vmatpush3.bf16.msra.mxu1 %v11365_v42 }
 0x7d9   : > { %11370 = vmatprep.subr.bf16.mxu1 %v11369_v20 }
 0x7dc   : > { %11372 = vmatpush3.bf16.msra.mxu1 %v11369_v20 }
 0x7dd   : > { %11374 = vmatprep.subr.bf16.mxu1 %v11373_v14 }
 0x7e0   : > { %11376 = vmatpush3.bf16.msra.mxu1 %v11373_v14 }
 0x7e1   : > { %11378 = vmatprep.subr.bf16.mxu1 %v11377_v0 }
 0x7e4   : > { %11380 = vmatpush3.bf16.msra.mxu1 %v11377_v0 }
 0x7e5   : > { %11382 = vmatprep.subr.bf16.mxu1 %v11381_v39 }
 0x7e8   : > { %11384 = vmatpush3.bf16.msra.mxu1 %v11381_v39 }
 0x831   : > { %v8382_v19 = vpop.xlane.xlu0 %8381 }
 0x832   : > { %v8426_v3 = vmul.f32 0.015625, %v8382_v19  ;;  %v8379_v4 = vpop.xlane.xlu1 %8378 }
 0x833   : > { %v8425_v11 = vmul.f32 0.015625, %v8379_v4 }
 0x834   : > { %v8442_v25 = vadd.f32 1e-05, %v8426_v3 }
 0x835   : > { %v8441_v56 = vadd.f32 1e-05, %v8425_v11 }
 0x836   : > { %11953 = vrsqrt.f32 %v8442_v25 }
 0x837   : > { %11955 = vrsqrt.f32 %v8441_v56 }
 0x83a   : > { %v8385_v8 = vpop.xlane.xlu1 %8384 }
 0x83b   : > { %v8427_v32 = vmul.f32 0.015625, %v8385_v8 }
 0x83d   : > { %v8443_v54 = vadd.f32 1e-05, %v8427_v32 }
 0x83e   : > { %v8388_v51 = vpop.xlane.xlu0 %8387 }
 0x83f   : > { %11957 = vrsqrt.f32 %v8443_v54  ;;  %v8428_v22 = vmul.f32 0.015625, %v8388_v51  ;;  %v8391_v24 = vpop.xlane.xlu1 %8390 }
 0x840   : > { %v11954_v49 = vpop.eup %11953  ;;  %v8429_v43 = vmul.f32 0.015625, %v8391_v24 }
 0x841   : > { %v11956_v15 = vpop.eup %11955  ;;  %v8474_v63 = vmul.f32 %v11954_v49, %v14273_v57  ;;  %v8444_v44 = vadd.f32 1e-05, %v8428_v22 }
 0x842   : > { %v8445_v13 = vadd.f32 1e-05, %v8429_v43  ;;  %v8394_v26 = vpop.xlane.xlu0 %8393  ;;  %v8473_v17 = vmul.f32 %v11956_v15, %v14276_v61 }
 0x843   : > { %11959 = vrsqrt.f32 %v8444_v44  ;;  %v8430_v60 = vmul.f32 0.015625, %v8394_v26  ;;  %v8496_v59 = vmul.f32 %v14437_v40, %v8474_v63 }
 0x844   : > { %11961 = vrsqrt.f32 %v8445_v13  ;;  %v8495_v34 = vmul.f32 %v14437_v40, %v8473_v17 }
 0x845   : > { %v8446_v48 = vadd.f32 1e-05, %v8430_v60  ;;  %v14452_v55 = vadd.f32 %v14444_v47, %v8496_v59 }
 0x846   : > { %v14449_v57 = vadd.f32 %v14444_v47, %v8495_v34 }
 0x847   : > { %11963 = vrsqrt.f32 %v8446_v48 }
 0x848   : > { %10858 = vmatprep.mubr.msk.f32.mxu0 %vm897_vm2, %v14449_v57 }
 0x849   : > { %v11958_v61 = vpop.eup %11957  ;;  %10859 = vmatmul.mubr.msk.f32.vlgmr.msra.gmra.mrb[104].mxu0 %vm897_vm2, %v14452_v55  ;;  %v8400_v50 = vpop.xlane.xlu0 %8399 }
 0x84a   : > { %v8432_v33 = vmul.f32 0.015625, %v8400_v50  ;;  %v8397_v2 = vpop.xlane.xlu1 %8396  ;;  %v8475_v58 = vmul.f32 %v11958_v61, %v14285_v36 }
 0x84b   : > { %v8431_v5 = vmul.f32 0.015625, %v8397_v2 }
 0x84c   : > { %v8448_v18 = vadd.f32 1e-05, %v8432_v33  ;;  %v8497_v46 = vmul.f32 %v14437_v40, %v8475_v58 }
 0x84d   : > { %v11960_v38 = vpop.eup %11959  ;;  %v8447_v42 = vadd.f32 1e-05, %v8431_v5  ;;  %v8406_v23 = vpop.xlane.xlu0 %8405 }
 0x84e   : > { %v11962_v52 = vpop.eup %11961  ;;  %11965 = vrsqrt.f32 %v8448_v18  ;;  %v8434_v20 = vmul.f32 0.015625, %v8406_v23  ;;  %v8403_v27 = vpop.xlane.xlu1 %8402  ;;  %v14461_v10 = vadd.f32 %v14444_v47, %v8497_v46  ;;  %v8476_v14 = vmul.f32 %v11960_v38, %v14290_v12 }
 0x84f   : > { %11967 = vrsqrt.f32 %v8447_v42  ;;  %v8433_v1 = vmul.f32 0.015625, %v8403_v27  ;;  %v8477_v36 = vmul.f32 %v11962_v52, %v14294_v6 }
 0x850   : > { %v8450_v53 = vadd.f32 1e-05, %v8434_v20  ;;  %10861 = vmatprep.mubr.msk.f32.mxu0 %vm897_vm2, %v14461_v10  ;;  %v8498_v0 = vmul.f32 %v14437_v40, %v8476_v14 }
 0x851   : > { %v11964_v35 = vpop.eup %11963  ;;  %v8449_v30 = vadd.f32 1e-05, %v8433_v1  ;;  %v8412_v39 = vpop.xlane.xlu0 %8411  ;;  %v8499_v19 = vmul.f32 %v14437_v40, %v8477_v36 }
 0x852   : > { %11969 = vrsqrt.f32 %v8450_v53  ;;  %v8436_v3 = vmul.f32 0.015625, %v8412_v39  ;;  %v8409_v4 = vpop.xlane.xlu1 %8408  ;;  %v14470_v12 = vadd.f32 %v14444_v47, %v8498_v0  ;;  %v8478_v11 = vmul.f32 %v11964_v35, %v14301_v9 }
 0x853   : > { %11971 = vrsqrt.f32 %v8449_v30  ;;  %v8435_v6 = vmul.f32 0.015625, %v8409_v4  ;;  %v14474_v25 = vadd.f32 %v14444_v47, %v8499_v19 }
 0x854   : > { %v8452_v56 = vadd.f32 1e-05, %v8436_v3  ;;  %10862 = vmatmul.mubr.msk.f32.gmra.mrb[106].mxu0 %vm897_vm2, %v14470_v12  ;;  %v8500_v8 = vmul.f32 %v14437_v40, %v8478_v11 }
 0x855   : > { %v8451_v32 = vadd.f32 1e-05, %v8435_v6  ;;  %v8418_v54 = vpop.xlane.xlu0 %8417  ;;  %10864 = vmatprep.mubr.msk.f32.mxu0 %vm897_vm2, %v14474_v25 }
 0x856   : > { %11973 = vrsqrt.f32 %v8452_v56  ;;  %v8438_v51 = vmul.f32 0.015625, %v8418_v54  ;;  %v8415_v22 = vpop.xlane.xlu1 %8414  ;;  %v14482_v9 = vadd.f32 %v14444_v47, %v8500_v8 }
 0x857   : > { %11975 = vrsqrt.f32 %v8451_v32  ;;  %v8437_v24 = vmul.f32 0.015625, %v8415_v22 }
 0x858   : > { %v11966_v49 = vpop.eup %11965  ;;  %v8454_v43 = vadd.f32 1e-05, %v8438_v51  ;;  %10865 = vmatmul.mubr.msk.f32.gmra.mrb[108].mxu0 %vm897_vm2, %v14482_v9 }
 0x859   : > { %v11968_v15 = vpop.eup %11967  ;;  %v8453_v63 = vadd.f32 1e-05, %v8437_v24  ;;  %v8480_v44 = vmul.f32 %v11966_v49, %v14309_v29 }
 0x85a   : > { %11977 = vrsqrt.f32 %v8454_v43  ;;  %v8479_v13 = vmul.f32 %v11968_v15, %v14312_v31 }
 0x85b   : > { %11979 = vrsqrt.f32 %v8453_v63  ;;  %v8502_v26 = vmul.f32 %v14437_v40, %v8480_v44 }
 0x85c   : > { %v11970_v17 = vpop.eup %11969  ;;  %v8501_v60 = vmul.f32 %v14437_v40, %v8479_v13 }
 0x85d   : > { %v11972_v59 = vpop.eup %11971  ;;  %v8424_v34 = vpop.xlane.xlu0 %8423  ;;  %v8482_v48 = vmul.f32 %v11970_v17, %v14325_v45  ;;  %v14496_v31 = vadd.f32 %v14444_v47, %v8502_v26 }
 0x85e   : > { %v8440_v61 = vmul.f32 0.015625, %v8424_v34  ;;  %v8421_v50 = vpop.xlane.xlu1 %8420  ;;  %v14492_v33 = vadd.f32 %v14444_v47, %v8501_v60  ;;  %v8481_v29 = vmul.f32 %v11972_v59, %v14329_v62 }
 0x85f   : > { %v8439_v2 = vmul.f32 0.015625, %v8421_v50  ;;  %v8504_v58 = vmul.f32 %v14437_v40, %v8482_v48 }
 0x860   : > { %v11974_v5 = vpop.eup %11973  ;;  %v8456_v18 = vadd.f32 1e-05, %v8440_v61  ;;  %10867 = vmatprep.mubr.msk.f32.mxu0 %vm897_vm2, %v14492_v33  ;;  %v8503_v45 = vmul.f32 %v14437_v40, %v8481_v29 }
 0x861   : > { %v11976_v46 = vpop.eup %11975  ;;  %v8455_v38 = vadd.f32 1e-05, %v8439_v2  ;;  %10868 = vmatmul.mubr.msk.f32.gmra.mrb[110].mxu0 %vm897_vm2, %v14496_v31  ;;  %v8484_v62 = vmul.f32 %v11974_v5, %v14343_v21  ;;  %v14510_v52 = vadd.f32 %v14444_v47, %v8504_v58 }
 0x862   : > { %11981 = vrsqrt.f32 %v8456_v18  ;;  %v14506_v42 = vadd.f32 %v14444_v47, %v8503_v45  ;;  %v8483_v23 = vmul.f32 %v11976_v46, %v14347_v16 }
 0x863   : > { %11983 = vrsqrt.f32 %v8455_v38  ;;  %v8506_v20 = vmul.f32 %v14437_v40, %v8484_v62 }
 0x864   : > { %v11978_v27 = vpop.eup %11977  ;;  %10870 = vmatprep.mubr.msk.f32.mxu0 %vm897_vm2, %v14506_v42  ;;  %v8505_v14 = vmul.f32 %v14437_v40, %v8483_v23 }
 0x865   : > { %v11980_v1 = vpop.eup %11979  ;;  %10871 = vmatmul.mubr.msk.f32.gmra.mrb[112].mxu0 %vm897_vm2, %v14510_v52  ;;  %v8486_v21 = vmul.f32 %v11978_v27, %v14361_v41  ;;  %v14524_v53 = vadd.f32 %v14444_v47, %v8506_v20 }
 0x866   : > { %v14520_v16 = vadd.f32 %v14444_v47, %v8505_v14  ;;  %v8485_v36 = vmul.f32 %v11980_v1, %v14365_v7 }
 0x867   : > { %v8508_v0 = vmul.f32 %v14437_v40, %v8486_v21 }
 0x868   : > { %10873 = vmatprep.mubr.msk.f32.mxu0 %vm897_vm2, %v14520_v16  ;;  %v8507_v35 = vmul.f32 %v14437_v40, %v8485_v36 }
 0x869   : > { %10874 = vmatmul.mubr.msk.f32.gmra.mrb[114].mxu0 %vm897_vm2, %v14524_v53  ;;  %v14536_v30 = vadd.f32 %v14444_v47, %v8508_v0 }
 0x86a   : > { %v14533_v41 = vadd.f32 %v14444_v47, %v8507_v35 }
 0x86c   : > { %v11982_v7 = vpop.eup %11981  ;;  %10876 = vmatprep.mubr.msk.f32.mxu0 %vm897_vm2, %v14533_v41 }
 0x86d   : > { %v11984_v39 = vpop.eup %11983  ;;  %10877 = vmatmul.mubr.msk.f32.gmra.mrb[116].mxu0 %vm897_vm2, %v14536_v30  ;;  %v8488_v19 = vmul.f32 %v11982_v7, %v14381_v37  ;;  %v8771_v37 = vld [vmem:[%s14926_s15 + $0x70] sm:$0xff] }
 0x86e   : > { %v8487_v3 = vmul.f32 %v11984_v39, %v14384_v28  ;;  %v8772_v28 = vld [vmem:[%s14926_s15 + $0x78] sm:$0xff] }
 0x86f   : > { %v8510_v4 = vmul.f32 %v14437_v40, %v8488_v19 }
 0x870   : > { %v8509_v11 = vmul.f32 %v14437_v40, %v8487_v3  ;;  %v11385_v40 = vpack.c.bf16 %v8772_v28, %v8771_v37 }
 0x871   : > { %v14550_v56 = vadd.f32 %v14444_v47, %v8510_v4 }
 0x872   : > { %v14547_v6 = vadd.f32 %v14444_v47, %v8509_v11  ;;  %11386 = vmatprep.subr.bf16.mxu1 %v11385_v40  ;;  %v9747_v47 = vld [vmem:[%s14925_s14] ss:$0 sm:$0xff] }
 0x873   : > { %11388 = vmatpush3.bf16.msra.mxu1 %v11385_v40 }
 0x874   : > { %10879 = vmatprep.mubr.msk.f32.mxu0 %vm897_vm2, %v14547_v6 }
 0x875   : > { %10880 = vmatmul.mubr.msk.f32.gmra.mrb[118].mxu0 %vm897_vm2, %v14550_v56 }
 0x91c   : > { %v10860_v8 = vpop.f32.mrb[104].mxu0 }
 0x91d   : > { %v8668_v32 = vadd.f32 %v10860_v8, %v9747_v47  ;;  %v8662_v54 = vpop.f32.mrb[105].mxu0 }
 0x91e   : > { %v8663_v51 = vadd.f32 %v9747_v47, %v8662_v54 }
 0x91f   : > { %v8742_v24 = vmax.f32 %v8668_v32, 0.0  ;;  %v14568_v32 = vld [vmem:[%s14927_s16] ss:$0 sm:$0xff] }
 0x920   : > { %v8741_v22 = vmax.f32 %v8663_v51, 0.0 }
 0x922   : > { %10914 = vmatprep.mubr.f32.mxu1 %v8741_v22 }
 0x923   : > { %10915 = vmatmul.mubr.f32.vlgmr.msra.gmra.mrb[104].mxu1 %v8742_v24 }
 0x927   : > { %v10863_v49 = vpop.f32.mrb[106].mxu0 }
 0x928   : > { %v8678_v43 = vadd.f32 %v10863_v49, %v9747_v47  ;;  %v8672_v15 = vpop.f32.mrb[107].mxu0 }
 0x929   : > { %v8673_v63 = vadd.f32 %v9747_v47, %v8672_v15 }
 0x92a   : > { %v8744_v26 = vmax.f32 %v8678_v43, 0.0 }
 0x92b   : > { %v8743_v44 = vmax.f32 %v8673_v63, 0.0  ;;  %v10866_v13 = vpop.f32.mrb[108].mxu0 }
 0x92c   : > { %v8688_v17 = vadd.f32 %v10866_v13, %v9747_v47  ;;  %v8682_v60 = vpop.f32.mrb[109].mxu0 }
 0x92d   : > { %v8683_v59 = vadd.f32 %v9747_v47, %v8682_v60  ;;  %10917 = vmatprep.mubr.f32.mxu1 %v8743_v44 }
 0x92e   : > { %10918 = vmatmul.mubr.f32.gmra.mrb[106].mxu1 %v8744_v26  ;;  %v8746_v48 = vmax.f32 %v8688_v17, 0.0 }
 0x92f   : > { %v8745_v34 = vmax.f32 %v8683_v59, 0.0 }
 0x931   : > { %10920 = vmatprep.mubr.f32.mxu1 %v8745_v34 }
 0x932   : > { %10921 = vmatmul.mubr.f32.gmra.mrb[108].mxu1 %v8746_v48 }
 0x934   : > { %v10869_v61 = vpop.f32.mrb[110].mxu0 }
 0x935   : > { %v8698_v50 = vadd.f32 %v10869_v61, %v9747_v47  ;;  %v8692_v29 = vpop.f32.mrb[111].mxu0 }
 0x936   : > { %v8693_v2 = vadd.f32 %v9747_v47, %v8692_v29 }
 0x937   : > { %v8748_v18 = vmax.f32 %v8698_v50, 0.0 }
 0x938   : > { %v8747_v58 = vmax.f32 %v8693_v2, 0.0  ;;  %v10872_v5 = vpop.f32.mrb[112].mxu0 }
 0x939   : > { %v8708_v45 = vadd.f32 %v10872_v5, %v9747_v47  ;;  %v8702_v46 = vpop.f32.mrb[113].mxu0 }
 0x93a   : > { %v8703_v38 = vadd.f32 %v9747_v47, %v8702_v46  ;;  %10923 = vmatprep.mubr.f32.mxu1 %v8747_v58 }
 0x93b   : > { %10924 = vmatmul.mubr.f32.gmra.mrb[110].mxu1 %v8748_v18  ;;  %v8750_v20 = vmax.f32 %v8708_v45, 0.0 }
 0x93c   : > { %v8749_v62 = vmax.f32 %v8703_v38, 0.0  ;;  %v10875_v23 = vpop.f32.mrb[114].mxu0 }
 0x93d   : > { %v8718_v27 = vadd.f32 %v10875_v23, %v9747_v47  ;;  %v8712_v14 = vpop.f32.mrb[115].mxu0 }
 0x93e   : > { %v8713_v1 = vadd.f32 %v9747_v47, %v8712_v14  ;;  %10926 = vmatprep.mubr.f32.mxu1 %v8749_v62 }
 0x93f   : > { %10927 = vmatmul.mubr.f32.gmra.mrb[112].mxu1 %v8750_v20  ;;  %v8752_v0 = vmax.f32 %v8718_v27, 0.0 }
 0x940   : > { %v8751_v21 = vmax.f32 %v8713_v1, 0.0  ;;  %v10878_v36 = vpop.f32.mrb[116].mxu0 }
 0x941   : > { %v8728_v35 = vadd.f32 %v10878_v36, %v9747_v47  ;;  %v8722_v7 = vpop.f32.mrb[117].mxu0 }
 0x942   : > { %v8723_v39 = vadd.f32 %v9747_v47, %v8722_v7  ;;  %10929 = vmatprep.mubr.f32.mxu1 %v8751_v21 }
 0x943   : > { %10930 = vmatmul.mubr.f32.gmra.mrb[114].mxu1 %v8752_v0  ;;  %v8754_v3 = vmax.f32 %v8728_v35, 0.0 }
 0x944   : > { %v8753_v19 = vmax.f32 %v8723_v39, 0.0 }
 0x946   : > { %10932 = vmatprep.mubr.f32.mxu1 %v8753_v19 }
 0x947   : > { %10933 = vmatmul.mubr.f32.gmra.mrb[116].mxu1 %v8754_v3 }
 0x948   : > { %v10881_v4 = vpop.f32.mrb[118].mxu0 }
 0x949   : > { %v8738_v11 = vadd.f32 %v10881_v4, %v9747_v47  ;;  %v8732_v37 = vpop.f32.mrb[119].mxu0 }
 0x94a   : > { %v8733_v28 = vadd.f32 %v9747_v47, %v8732_v37 }
 0x94b   : > { %v8756_v8 = vmax.f32 %v8738_v11, 0.0 }
 0x94c   : > { %v8755_v40 = vmax.f32 %v8733_v28, 0.0 }
 0x94e   : > { %10935 = vmatprep.mubr.f32.mxu1 %v8755_v40 }
 0x94f   : > { %10936 = vmatmul.mubr.f32.gmra.mrb[118].mxu1 %v8756_v8 }
 0x9f6   : > { %v10916_v54 = vpop.f32.mrb[104].mxu1 }
 0x9f7   : > { %v8852_v51 = vadd.f32 %v10916_v54, %v14568_v32  ;;  %v8846_v22 = vpop.f32.mrb[105].mxu1 }
 0x9f8   : > { %v8847_v24 = vadd.f32 %v14568_v32, %v8846_v22 }
 0x9f9   : > { %v14573_v49 = vadd.f32 %v8852_v51, %v14452_v55 }
 0x9fa   : > { %v14576_v47 = vadd.f32 %v8847_v24, %v14449_v57 }
 0x9fb   : > { %v8946_v43 = vsel %vm897_vm2, %v14573_v49, 0.0 }
 0x9fc   : > { %8947 = vadd.xlane.f32.xlu0 %v8946_v43  ;;  %v8943_v15 = vsel %vm897_vm2, %v14576_v47, 0.0 }
 0x9fd   : > { %8944 = vadd.xlane.f32.xlu1 %v8943_v15 }
 0xa01   : > { %v10919_v63 = vpop.f32.mrb[106].mxu1 }
 0xa02   : > { %v8862_v44 = vadd.f32 %v10919_v63, %v14568_v32  ;;  %v8856_v13 = vpop.f32.mrb[107].mxu1 }
 0xa03   : > { %v8857_v26 = vadd.f32 %v14568_v32, %v8856_v13 }
 0xa04   : > { %v14585_v55 = vadd.f32 %v8862_v44, %v14470_v12 }
 0xa05   : > { %v14588_v57 = vadd.f32 %v8857_v26, %v14461_v10  ;;  %v10922_v17 = vpop.f32.mrb[108].mxu1 }
 0xa06   : > { %v8872_v60 = vadd.f32 %v10922_v17, %v14568_v32  ;;  %v8866_v59 = vpop.f32.mrb[109].mxu1  ;;  %v8952_v34 = vsel %vm897_vm2, %v14585_v55, 0.0 }
 0xa07   : > { %v8867_v48 = vadd.f32 %v14568_v32, %v8866_v59  ;;  %8953 = vadd.xlane.f32.xlu0 %v8952_v34  ;;  %v8949_v61 = vsel %vm897_vm2, %v14588_v57, 0.0 }
 0xa08   : > { %v14597_v50 = vadd.f32 %v8872_v60, %v14482_v9  ;;  %8950 = vadd.xlane.f32.xlu1 %v8949_v61 }
 0xa09   : > { %v14600_v10 = vadd.f32 %v8867_v48, %v14474_v25 }
 0xa0a   : > { %v8958_v12 = vsel %vm897_vm2, %v14597_v50, 0.0 }
 0xa0b   : > { %8959 = vadd.xlane.f32.xlu0 %v8958_v12  ;;  %v8955_v29 = vsel %vm897_vm2, %v14600_v10, 0.0 }
 0xa0c   : > { %8956 = vadd.xlane.f32.xlu1 %v8955_v29 }
 0xa0e   : > { %v10925_v2 = vpop.f32.mrb[110].mxu1 }
 0xa0f   : > { %v8882_v58 = vadd.f32 %v10925_v2, %v14568_v32  ;;  %v8876_v5 = vpop.f32.mrb[111].mxu1 }
 0xa10   : > { %v8877_v18 = vadd.f32 %v14568_v32, %v8876_v5 }
 0xa11   : > { %v14609_v9 = vadd.f32 %v8882_v58, %v14496_v31 }
 0xa12   : > { %v14612_v25 = vadd.f32 %v8877_v18, %v14492_v33  ;;  %v10928_v45 = vpop.f32.mrb[112].mxu1 }
 0xa13   : > { %v8892_v46 = vadd.f32 %v10928_v45, %v14568_v32  ;;  %v8886_v38 = vpop.f32.mrb[113].mxu1  ;;  %v8964_v62 = vsel %vm897_vm2, %v14609_v9, 0.0 }
 0xa14   : > { %v8887_v23 = vadd.f32 %v14568_v32, %v8886_v38  ;;  %8965 = vadd.xlane.f32.xlu0 %v8964_v62  ;;  %v8961_v20 = vsel %vm897_vm2, %v14612_v25, 0.0 }
 0xa15   : > { %v14621_v27 = vadd.f32 %v8892_v46, %v14510_v52  ;;  %8962 = vadd.xlane.f32.xlu1 %v8961_v20 }
 0xa16   : > { %v14624_v33 = vadd.f32 %v8887_v23, %v14506_v42  ;;  %v10931_v31 = vpop.f32.mrb[114].mxu1 }
 0xa17   : > { %v8902_v14 = vadd.f32 %v10931_v31, %v14568_v32  ;;  %v8896_v1 = vpop.f32.mrb[115].mxu1  ;;  %v8970_v21 = vsel %vm897_vm2, %v14621_v27, 0.0 }
 0xa18   : > { %v8897_v36 = vadd.f32 %v14568_v32, %v8896_v1  ;;  %8971 = vadd.xlane.f32.xlu0 %v8970_v21  ;;  %v8967_v0 = vsel %vm897_vm2, %v14624_v33, 0.0 }
 0xa19   : > { %v14633_v52 = vadd.f32 %v8902_v14, %v14524_v53  ;;  %8968 = vadd.xlane.f32.xlu1 %v8967_v0 }
 0xa1a   : > { %v14636_v42 = vadd.f32 %v8897_v36, %v14520_v16  ;;  %v10934_v35 = vpop.f32.mrb[116].mxu1 }
 0xa1b   : > { %v8912_v7 = vadd.f32 %v10934_v35, %v14568_v32  ;;  %v8906_v39 = vpop.f32.mrb[117].mxu1  ;;  %v8976_v19 = vsel %vm897_vm2, %v14633_v52, 0.0 }
 0xa1c   : > { %v8907_v3 = vadd.f32 %v14568_v32, %v8906_v39  ;;  %8977 = vadd.xlane.f32.xlu0 %v8976_v19  ;;  %v8973_v4 = vsel %vm897_vm2, %v14636_v42, 0.0 }
 0xa1d   : > { %v14645_v53 = vadd.f32 %v8912_v7, %v14536_v30  ;;  %8974 = vadd.xlane.f32.xlu1 %v8973_v4 }
 0xa1e   : > { %v14648_v16 = vadd.f32 %v8907_v3, %v14533_v41 }
 0xa1f   : > { %v8982_v11 = vsel %vm897_vm2, %v14645_v53, 0.0 }
 0xa20   : > { %8983 = vadd.xlane.f32.xlu0 %v8982_v11  ;;  %v8979_v37 = vsel %vm897_vm2, %v14648_v16, 0.0 }
 0xa21   : > { %8980 = vadd.xlane.f32.xlu1 %v8979_v37 }
 0xa22   : > { %v10937_v28 = vpop.f32.mrb[118].mxu1 }
 0xa23   : > { %v8922_v40 = vadd.f32 %v10937_v28, %v14568_v32  ;;  %v8916_v8 = vpop.f32.mrb[119].mxu1 }
 0xa24   : > { %v8917_v54 = vadd.f32 %v14568_v32, %v8916_v8 }
 0xa25   : > { %v14657_v30 = vadd.f32 %v8922_v40, %v14550_v56 }
 0xa26   : > { %v14660_v41 = vadd.f32 %v8917_v54, %v14547_v6 }
 0xa27   : > { %v8988_v51 = vsel %vm897_vm2, %v14657_v30, 0.0 }
 0xa28   : > { %8989 = vadd.xlane.f32.xlu0 %v8988_v51  ;;  %v8985_v22 = vsel %vm897_vm2, %v14660_v41, 0.0 }
 0xa29   : > { %8986 = vadd.xlane.f32.xlu1 %v8985_v22 }
 0xa89   : > { %v8948_v24 = vpop.xlane.xlu0 %8947 }
 0xa8a   : > { %v8992_v43 = vmul.f32 0.015625, %v8948_v24  ;;  %v8945_v15 = vpop.xlane.xlu1 %8944 }
 0xa8b   : > { %v8991_v63 = vmul.f32 0.015625, %v8945_v15 }
 0xa8c   : > { %v14667_v32 = vsub.f32 %v14573_v49, %v8992_v43 }
 0xa8d   : > { %v14670_v56 = vsub.f32 %v14576_v47, %v8991_v63 }
 0xa8e   : > { %v9024_v6 = vmul.f32 %v14667_v32, %v14667_v32 }
 0xa8f   : > { %v9023_v44 = vmul.f32 %v14670_v56, %v14670_v56 }
 0xa90   : > { %v9042_v13 = vsel %vm897_vm2, %v9024_v6, 0.0 }
 0xa91   : > { %9043 = vadd.xlane.f32.xlu0 %v9042_v13  ;;  %v9039_v26 = vsel %vm897_vm2, %v9023_v44, 0.0 }
 0xa92   : > { %9040 = vadd.xlane.f32.xlu1 %v9039_v26 }
 0xa94   : > { %v8954_v17 = vpop.xlane.xlu0 %8953 }
 0xa95   : > { %v8994_v60 = vmul.f32 0.015625, %v8954_v17  ;;  %v8951_v59 = vpop.xlane.xlu1 %8950 }
 0xa96   : > { %v8993_v49 = vmul.f32 0.015625, %v8951_v59 }
 0xa97   : > { %v14679_v34 = vsub.f32 %v14585_v55, %v8994_v60 }
 0xa98   : > { %v14682_v47 = vsub.f32 %v14588_v57, %v8993_v49  ;;  %v8960_v48 = vpop.xlane.xlu0 %8959 }
 0xa99   : > { %v8996_v61 = vmul.f32 0.015625, %v8960_v48  ;;  %v8957_v12 = vpop.xlane.xlu1 %8956  ;;  %v9026_v29 = vmul.f32 %v14679_v34, %v14679_v34 }
 0xa9a   : > { %v8995_v2 = vmul.f32 0.015625, %v8957_v12  ;;  %v9025_v58 = vmul.f32 %v14682_v47, %v14682_v47 }
 0xa9b   : > { %v14689_v5 = vsub.f32 %v14597_v50, %v8996_v61  ;;  %v9048_v18 = vsel %vm897_vm2, %v9026_v29, 0.0 }
 0xa9c   : > { %v14693_v55 = vsub.f32 %v14600_v10, %v8995_v2  ;;  %9049 = vadd.xlane.f32.xlu0 %v9048_v18  ;;  %v9045_v57 = vsel %vm897_vm2, %v9025_v58, 0.0 }
 0xa9d   : > { %9046 = vadd.xlane.f32.xlu1 %v9045_v57  ;;  %v9028_v45 = vmul.f32 %v14689_v5, %v14689_v5  ;;  %v9278_v57 = vld [vmem:[%s14930_s19 + $0x10] sm:$0xff] }
 0xa9e   : > { %v9027_v46 = vmul.f32 %v14693_v55, %v14693_v55 }
 0xa9f   : > { %v9054_v38 = vsel %vm897_vm2, %v9028_v45, 0.0  ;;  %v9279_v45 = vld [vmem:[%s14930_s19 + $0x18] sm:$0xff] }
 0xaa0   : > { %9055 = vadd.xlane.f32.xlu0 %v9054_v38  ;;  %v9051_v50 = vsel %vm897_vm2, %v9027_v46, 0.0  ;;  %v12087_v46 = vmov 0.0|0.0   ;;  %v12089_v38 = vmov 0.0  }
 0xaa1   : > { %9052 = vadd.xlane.f32.xlu1 %v9051_v50  ;;  %v8966_v62 = vpop.xlane.xlu0 %8965  ;;  %11389 = vmatprep.subr.bf16.mxu0 %v12087_v46  ;;  %v11393_v50 = vpack.c.bf16 %v9279_v45, %v9278_v57  ;;  %v14790_v45 = vld [vmem:[%s14928_s17] ss:$0 sm:$0xff] }
 0xaa2   : > { %v8998_v23 = vmul.f32 0.015625, %v8966_v62  ;;  %v8963_v10 = vpop.xlane.xlu1 %8962  ;;  %10954 = vmatprep.mubr.msk.f32.mxu0 %vm12088_vm7, %v12089_v38  ;;  %v9280_v62 = vld [vmem:[%s14930_s19 + $0x20] sm:$0xff] }
 0xaa3   : > { %v8997_v20 = vmul.f32 0.015625, %v8963_v10 }
 0xaa4   : > { %v14703_v31 = vsub.f32 %v14609_v9, %v8998_v23  ;;  %v9281_v23 = vld [vmem:[%s14930_s19 + $0x28] sm:$0xff] }
 0xaa5   : > { %v14706_v14 = vsub.f32 %v14612_v25, %v8997_v20  ;;  %v8972_v1 = vpop.xlane.xlu0 %8971  ;;  %v11396_v10 = vpack.c.bf16 %v9281_v23, %v9280_v62  ;;  %v9282_v20 = vld [vmem:[%s14930_s19 + $0x30] sm:$0xff] }
 0xaa6   : > { %v9000_v21 = vmul.f32 0.015625, %v8972_v1  ;;  %v8969_v36 = vpop.xlane.xlu1 %8968  ;;  %v9030_v0 = vmul.f32 %v14703_v31, %v14703_v31  ;;  %v9283_v1 = vld [vmem:[%s14930_s19 + $0x38] sm:$0xff] }
 0xaa7   : > { %v8999_v35 = vmul.f32 0.015625, %v8969_v36  ;;  %v9029_v7 = vmul.f32 %v14706_v14, %v14706_v14 }
 0xaa8   : > { %v14713_v39 = vsub.f32 %v14621_v27, %v9000_v21  ;;  %v9060_v19 = vsel %vm897_vm2, %v9030_v0, 0.0  ;;  %v11399_v21 = vpack.c.bf16 %v9283_v1, %v9282_v20 }
 0xaa9   : > { %v14717_v9 = vsub.f32 %v14624_v33, %v8999_v35  ;;  %9061 = vadd.xlane.f32.xlu0 %v9060_v19  ;;  %v8978_v25 = vpop.xlane.xlu0 %8977  ;;  %v9057_v3 = vsel %vm897_vm2, %v9029_v7, 0.0 }
 0xaaa   : > { %v9002_v4 = vmul.f32 0.015625, %v8978_v25  ;;  %v8975_v11 = vpop.xlane.xlu1 %8974  ;;  %9058 = vadd.xlane.f32.xlu1 %v9057_v3  ;;  %v9032_v37 = vmul.f32 %v14713_v39, %v14713_v39 }
 0xaab   : > { %v9001_v28 = vmul.f32 0.015625, %v8975_v11  ;;  %v9031_v27 = vmul.f32 %v14717_v9, %v14717_v9 }
 0xaac   : > { %v14725_v40 = vsub.f32 %v14633_v52, %v9002_v4  ;;  %v9066_v33 = vsel %vm897_vm2, %v9032_v37, 0.0 }
 0xaad   : > { %v14729_v8 = vsub.f32 %v14636_v42, %v9001_v28  ;;  %9067 = vadd.xlane.f32.xlu0 %v9066_v33  ;;  %v8984_v54 = vpop.xlane.xlu0 %8983  ;;  %v9063_v51 = vsel %vm897_vm2, %v9031_v27, 0.0 }
 0xaae   : > { %v9004_v22 = vmul.f32 0.015625, %v8984_v54  ;;  %v8981_v24 = vpop.xlane.xlu1 %8980  ;;  %9064 = vadd.xlane.f32.xlu1 %v9063_v51  ;;  %v9034_v43 = vmul.f32 %v14725_v40, %v14725_v40 }
 0xaaf   : > { %v9003_v15 = vmul.f32 0.015625, %v8981_v24  ;;  %v9033_v52 = vmul.f32 %v14729_v8, %v14729_v8 }
 0xab0   : > { %v14737_v63 = vsub.f32 %v14645_v53, %v9004_v22  ;;  %v9072_v42 = vsel %vm897_vm2, %v9034_v43, 0.0 }
 0xab1   : > { %v14741_v6 = vsub.f32 %v14648_v16, %v9003_v15  ;;  %9073 = vadd.xlane.f32.xlu0 %v9072_v42  ;;  %v9069_v44 = vsel %vm897_vm2, %v9033_v52, 0.0 }
 0xab2   : > { %9070 = vadd.xlane.f32.xlu1 %v9069_v44  ;;  %v9036_v13 = vmul.f32 %v14737_v63, %v14737_v63 }
 0xab3   : > { %v9035_v26 = vmul.f32 %v14741_v6, %v14741_v6 }
 0xab4   : > { %v9078_v17 = vsel %vm897_vm2, %v9036_v13, 0.0 }
 0xab5   : > { %9079 = vadd.xlane.f32.xlu0 %v9078_v17  ;;  %v8990_v53 = vpop.xlane.xlu0 %8989  ;;  %v9075_v60 = vsel %vm897_vm2, %v9035_v26, 0.0 }
 0xab6   : > { %v9006_v59 = vmul.f32 0.015625, %v8990_v53  ;;  %9076 = vadd.xlane.f32.xlu1 %v9075_v60  ;;  %v8987_v16 = vpop.xlane.xlu1 %8986 }
 0xab7   : > { %v9005_v49 = vmul.f32 0.015625, %v8987_v16 }
 0xab8   : > { %v14751_v48 = vsub.f32 %v14657_v30, %v9006_v59  ;;  %v9276_v30 = vld [vmem:[%s14930_s19] sm:$0xff] }
 0xab9   : > { %v14754_v61 = vsub.f32 %v14660_v41, %v9005_v49  ;;  %v9277_v41 = vld [vmem:[%s14930_s19 + $0x8] sm:$0xff] }
 0xaba   : > { %v9038_v12 = vmul.f32 %v14751_v48, %v14751_v48  ;;  %v11390_v18 = vpack.c.bf16 %v9277_v41, %v9276_v30 }
 0xabb   : > { %v9037_v29 = vmul.f32 %v14754_v61, %v14754_v61 }
 0xabc   : > { %v9084_v2 = vsel %vm897_vm2, %v9038_v12, 0.0  ;;  %11391 = vmatpush3.bf16.msra.mxu0 %v11390_v18 }
 0xabd   : > { %9085 = vadd.xlane.f32.xlu0 %v9084_v2  ;;  %v9081_v58 = vsel %vm897_vm2, %v9037_v29, 0.0  ;;  %11392 = vmatprep.subr.bf16.mxu0 %v12087_v46 }
 0xabe   : > { %9082 = vadd.xlane.f32.xlu1 %v9081_v58 }
 0xac0   : > { %11394 = vmatpush3.bf16.msra.mxu0 %v11393_v50 }
 0xac1   : > { %11395 = vmatprep.subr.bf16.mxu0 %v12087_v46 }
 0xac4   : > { %11397 = vmatpush3.bf16.msra.mxu0 %v11396_v10 }
 0xac5   : > { %11398 = vmatprep.subr.bf16.mxu0 %v12087_v46 }
 0xac8   : > { %11400 = vmatpush3.bf16.msra.mxu0 %v11399_v21 }
 0xb1e   : > { %v9044_v36 = vpop.xlane.xlu0 %9043 }
 0xb1f   : > { %v9041_v0 = vpop.xlane.xlu1 %9040  ;;  %v9088_v35 = vmul.f32 0.015625, %v9044_v36 }
 0xb20   : > { %v9087_v7 = vmul.f32 0.015625, %v9041_v0 }
 0xb21   : > { %v9104_v4 = vadd.f32 1e-05, %v9088_v35 }
 0xb22   : > { %v9103_v37 = vadd.f32 1e-05, %v9087_v7 }
 0xb23   : > { %11985 = vrsqrt.f32 %v9104_v4 }
 0xb24   : > { %11987 = vrsqrt.f32 %v9103_v37 }
 0xb29   : > { %v9050_v19 = vpop.xlane.xlu0 %9049 }
 0xb2a   : > { %v9090_v25 = vmul.f32 0.015625, %v9050_v19  ;;  %v9047_v3 = vpop.xlane.xlu1 %9046 }
 0xb2b   : > { %v9089_v11 = vmul.f32 0.015625, %v9047_v3 }
 0xb2c   : > { %v9106_v28 = vadd.f32 1e-05, %v9090_v25 }
 0xb2d   : > { %v9056_v27 = vpop.xlane.xlu0 %9055  ;;  %v9105_v33 = vadd.f32 1e-05, %v9089_v11  ;;  %v11986_v13 = vpop.eup %11985 }
 0xb2e   : > { %v9092_v54 = vmul.f32 0.015625, %v9056_v27  ;;  %v9053_v51 = vpop.xlane.xlu1 %9052  ;;  %11989 = vrsqrt.f32 %v9106_v28  ;;  %v11988_v17 = vpop.eup %11987  ;;  %v9136_v41 = vmul.f32 %v11986_v13, %v14667_v32 }
 0xb2f   : > { %v9091_v22 = vmul.f32 0.015625, %v9053_v51  ;;  %11991 = vrsqrt.f32 %v9105_v33  ;;  %v9135_v46 = vmul.f32 %v11988_v17, %v14670_v56  ;;  %v14801_v56 = vld [vmem:[%s14929_s18] ss:$0 sm:$0xff] }
 0xb30   : > { %v9108_v24 = vadd.f32 1e-05, %v9092_v54  ;;  %v9158_v21 = vmul.f32 %v14790_v45, %v9136_v41 }
 0xb31   : > { %v9107_v43 = vadd.f32 1e-05, %v9091_v22 }
 0xb32   : > { %11993 = vrsqrt.f32 %v9108_v24  ;;  %v9180_v11 = vadd.f32 %v14801_v56, %v9158_v21 }
 0xb33   : > { %11995 = vrsqrt.f32 %v9107_v43 }
 0xb36   : > { %v9062_v15 = vpop.xlane.xlu0 %9061 }
 0xb37   : > { %v9094_v52 = vmul.f32 0.015625, %v9062_v15  ;;  %v9059_v42 = vpop.xlane.xlu1 %9058 }
 0xb38   : > { %v9093_v44 = vmul.f32 0.015625, %v9059_v42  ;;  %v11990_v59 = vpop.eup %11989 }
 0xb39   : > { %v9110_v26 = vadd.f32 1e-05, %v9094_v52  ;;  %v11992_v12 = vpop.eup %11991  ;;  %v9138_v38 = vmul.f32 %v11990_v59, %v14679_v34  ;;  %v9157_v34 = vmul.f32 %v14790_v45, %v9135_v46 }
 0xb3a   : > { %v9109_v53 = vadd.f32 1e-05, %v9093_v44  ;;  %v9068_v60 = vpop.xlane.xlu0 %9067  ;;  %v9137_v23 = vmul.f32 %v11992_v12, %v14682_v47  ;;  %v9196_v44 = vsel %vm897_vm2, %v9180_v11, 0.0 }
 0xb3b   : > { %11997 = vrsqrt.f32 %v9110_v26  ;;  %v9096_v16 = vmul.f32 0.015625, %v9068_v60  ;;  %v9065_v49 = vpop.xlane.xlu1 %9064  ;;  %v9160_v0 = vmul.f32 %v14790_v45, %v9138_v38  ;;  %v9179_v33 = vadd.f32 %v14801_v56, %v9157_v34 }
 0xb3c   : > { %11999 = vrsqrt.f32 %v9109_v53  ;;  %v9095_v29 = vmul.f32 0.015625, %v9065_v49  ;;  %v11994_v2 = vpop.eup %11993 }
 0xb3d   : > { %v9112_v58 = vadd.f32 1e-05, %v9096_v16  ;;  %v11996_v30 = vpop.eup %11995  ;;  %v9140_v10 = vmul.f32 %v11994_v2, %v14689_v5  ;;  %v9159_v5 = vmul.f32 %v14790_v45, %v9137_v23  ;;  %v9182_v54 = vadd.f32 %v14801_v56, %v9160_v0 }
 0xb3e   : > { %v9111_v18 = vadd.f32 1e-05, %v9095_v29  ;;  %v9074_v57 = vpop.xlane.xlu0 %9073  ;;  %v9139_v32 = vmul.f32 %v11996_v30, %v14693_v55  ;;  %v9195_v17 = vsel %vm897_vm2, %v9179_v33, 0.0 }
 0xb3f   : > { %12001 = vrsqrt.f32 %v9112_v58  ;;  %v9098_v50 = vmul.f32 0.015625, %v9074_v57  ;;  %v9071_v62 = vpop.xlane.xlu1 %9070  ;;  %v9162_v25 = vmul.f32 %v14790_v45, %v9140_v10  ;;  %v9181_v22 = vadd.f32 %v14801_v56, %v9159_v5 }
 0xb40   : > { %12003 = vrsqrt.f32 %v9111_v18  ;;  %v9097_v1 = vmul.f32 0.015625, %v9071_v62  ;;  %v9161_v3 = vmul.f32 %v14790_v45, %v9139_v32  ;;  %v9205_v53 = vsel %vm897_vm2, %v9182_v54, 0.0 }
 0xb41   : > { %v9114_v20 = vadd.f32 1e-05, %v9098_v50  ;;  %v9184_v15 = vadd.f32 %v14801_v56, %v9162_v25  ;;  %v9204_v49 = vsel %vm897_vm2, %v9181_v22, 0.0  ;;  %v9197_v62 = vadd.f32 %v9196_v44, %v9195_v17 }
 0xb42   : > { %v9080_v36 = vpop.xlane.xlu0 %9079  ;;  %v9113_v47 = vadd.f32 1e-05, %v9097_v1  ;;  %v9183_v52 = vadd.f32 %v14801_v56, %v9161_v3  ;;  %v9206_v23 = vadd.f32 %v9205_v53, %v9204_v49 }
 0xb43   : > { %12005 = vrsqrt.f32 %v9114_v20  ;;  %v9077_v35 = vpop.xlane.xlu1 %9076  ;;  %v9100_v55 = vmul.f32 0.015625, %v9080_v36  ;;  %v9214_v30 = vsel %vm897_vm2, %v9184_v15, 0.0  ;;  %v9198_v25 = vrot.slane %v9197_v62, 4 }
 0xb44   : > { %v9099_v7 = vmul.f32 0.015625, %v9077_v35  ;;  %12007 = vrsqrt.f32 %v9113_v47 }
 0xb45   : > { %v11998_v19 = vpop.eup %11997  ;;  %v9116_v28 = vadd.f32 1e-05, %v9100_v55 }
 0xb46   : > { %v12000_v4 = vpop.eup %11999  ;;  %v9142_v37 = vmul.f32 %v11998_v19, %v14703_v31  ;;  %v9115_v27 = vadd.f32 1e-05, %v9099_v7  ;;  %v9207_v7 = vrot.slane %v9206_v23, 4 }
 0xb47   : > { %v9141_v51 = vmul.f32 %v12000_v4, %v14706_v14  ;;  %12009 = vrsqrt.f32 %v9116_v28 }
 0xb48   : > { %v9164_v24 = vmul.f32 %v14790_v45, %v9142_v37  ;;  %12011 = vrsqrt.f32 %v9115_v27  ;;  %v9208_v54 = vadd.f32 %v9207_v7, %v9206_v23 }
 0xb49   : > { %v12002_v43 = vpop.eup %12001  ;;  %v9163_v31 = vmul.f32 %v14790_v45, %v9141_v51 }
 0xb4a   : > { %v12004_v42 = vpop.eup %12003  ;;  %v9186_v13 = vadd.f32 %v14801_v56, %v9164_v24  ;;  %v9144_v14 = vmul.f32 %v12002_v43, %v14713_v39  ;;  %v9086_v26 = vpop.xlane.xlu0 %9085  ;;  %v9213_v39 = vsel %vm897_vm2, %v9183_v52, 0.0  ;;  %v9199_v24 = vadd.f32 %v9198_v25, %v9197_v62 }
 0xb4b   : > { %v9185_v60 = vadd.f32 %v14801_v56, %v9163_v31  ;;  %v9143_v59 = vmul.f32 %v12004_v42, %v14717_v9  ;;  %v9083_v16 = vpop.xlane.xlu1 %9082  ;;  %v9102_v29 = vmul.f32 0.015625, %v9086_v26  ;;  %v9215_v20 = vadd.f32 %v9214_v30, %v9213_v39 }
 0xb4c   : > { %v9166_v12 = vmul.f32 %v14790_v45, %v9144_v14  ;;  %v9101_v2 = vmul.f32 0.015625, %v9083_v16  ;;  %v9223_v41 = vsel %vm897_vm2, %v9186_v13, 0.0  ;;  %v9200_v16 = vrot.slane %v9199_v24, 2 }
 0xb4d   : > { %v12006_v58 = vpop.eup %12005  ;;  %v9165_v18 = vmul.f32 %v14790_v45, %v9143_v59  ;;  %v9222_v57 = vsel %vm897_vm2, %v9185_v60, 0.0  ;;  %v9118_v38 = vadd.f32 1e-05, %v9102_v29  ;;  %v9216_v3 = vrot.slane %v9215_v20, 4 }
 0xb4e   : > { %v9188_v9 = vadd.f32 %v14801_v56, %v9166_v12  ;;  %v9146_v46 = vmul.f32 %v12006_v58, %v14725_v40  ;;  %v12008_v50 = vpop.eup %12007  ;;  %v9117_v32 = vadd.f32 1e-05, %v9101_v2  ;;  %v9224_v34 = vadd.f32 %v9223_v41, %v9222_v57 }
 0xb4f   : > { %v9187_v10 = vadd.f32 %v14801_v56, %v9165_v18  ;;  %v9145_v36 = vmul.f32 %v12008_v50, %v14729_v8  ;;  %12013 = vrsqrt.f32 %v9118_v38  ;;  %v9217_v43 = vadd.f32 %v9216_v3, %v9215_v20 }
 0xb50   : > { %v9232_v1 = vsel %vm897_vm2, %v9188_v9, 0.0  ;;  %v9168_v21 = vmul.f32 %v14790_v45, %v9146_v46  ;;  %12015 = vrsqrt.f32 %v9117_v32  ;;  %v9225_v11 = vrot.slane %v9224_v34, 4 }
 0xb51   : > { %v9231_v0 = vsel %vm897_vm2, %v9187_v10, 0.0  ;;  %v12010_v47 = vpop.eup %12009  ;;  %v9167_v5 = vmul.f32 %v14790_v45, %v9145_v36  ;;  %v9218_v17 = vrot.slane %v9217_v43, 2  ;;  %v9201_v46 = vadd.f32 %v9200_v16, %v9199_v24 }
 0xb52   : > { %v9233_v40 = vadd.f32 %v9232_v1, %v9231_v0  ;;  %v9190_v35 = vadd.f32 %v14801_v56, %v9168_v21  ;;  %v12012_v55 = vpop.eup %12011  ;;  %v9148_v19 = vmul.f32 %v12010_v47, %v14737_v63  ;;  %v9226_v15 = vadd.f32 %v9225_v11, %v9224_v34 }
 0xb53   : > { %v9189_v8 = vadd.f32 %v14801_v56, %v9167_v5  ;;  %v9147_v28 = vmul.f32 %v12012_v55, %v14741_v6  ;;  %v9209_v6 = vrot.slane %v9208_v54, 2  ;;  %v9219_v41 = vadd.f32 %v9218_v17, %v9217_v43 }
 0xb54   : > { %v9241_v4 = vsel %vm897_vm2, %v9190_v35, 0.0  ;;  %v9170_v37 = vmul.f32 %v14790_v45, %v9148_v19  ;;  %v9234_v27 = vrot.slane %v9233_v40, 4  ;;  %v9227_v49 = vrot.slane %v9226_v15, 2 }
 0xb55   : > { %v9240_v33 = vsel %vm897_vm2, %v9189_v8, 0.0  ;;  %v9169_v63 = vmul.f32 %v14790_v45, %v9147_v28  ;;  %v9210_v30 = vadd.f32 %v9209_v6, %v9208_v54  ;;  %v9220_v20 = vrot.slane %v9219_v41, 1  ;;  %v9767_v6 = vld [vmem:[%s15152_s28] ss:$0 sm:$0xff] }
 0xb56   : > { %v9242_v51 = vadd.f32 %v9241_v4, %v9240_v33  ;;  %v9192_v22 = vadd.f32 %v14801_v56, %v9170_v37  ;;  %v9235_v44 = vadd.f32 %v9234_v27, %v9233_v40  ;;  %v9228_v38 = vadd.f32 %v9227_v49, %v9226_v15 }
 0xb57   : > { %v9191_v42 = vadd.f32 %v14801_v56, %v9169_v63  ;;  %v9211_v10 = vrot.slane %v9210_v30, 1  ;;  %v9202_v21 = vrot.slane %v9201_v46, 1  ;;  %v9221_v35 = vadd.f32 %v9220_v20, %v9219_v41 }
 0xb58   : > { %v9243_v52 = vrot.slane %v9242_v51, 4  ;;  %v9250_v31 = vsel %vm897_vm2, %v9192_v22, 0.0  ;;  %v9236_v12 = vrot.slane %v9235_v44, 2  ;;  %v9229_v34 = vrot.slane %v9228_v38, 1 }
 0xb59   : > { %v12014_v13 = vpop.eup %12013  ;;  %v9249_v26 = vsel %vm897_vm2, %v9191_v42, 0.0  ;;  %v9203_v55 = vadd.f32 %v9202_v21, %v9201_v46  ;;  %v9270_v11 = vmul.f32 0.0625, %v9221_v35 }
 0xb5a   : > { %v9244_v14 = vadd.f32 %v9243_v52, %v9242_v51  ;;  %v9251_v53 = vadd.f32 %v9250_v31, %v9249_v26  ;;  %v9150_v60 = vmul.f32 %v12014_v13, %v14751_v48  ;;  %v12016_v59 = vpop.eup %12015  ;;  %v9237_v62 = vadd.f32 %v9236_v12, %v9235_v44 }
 0xb5b   : > { %v9149_v58 = vmul.f32 %v12016_v59, %v14754_v61  ;;  %v9230_v7 = vadd.f32 %v9229_v34, %v9228_v38  ;;  %v9268_v37 = vmul.f32 0.0625, %v9203_v55 }
 0xb5c   : > { %v9252_v29 = vrot.slane %v9251_v53, 4  ;;  %v9172_v2 = vmul.f32 %v14790_v45, %v9150_v60  ;;  %v9245_v39 = vrot.slane %v9244_v14, 2  ;;  %v9238_v0 = vrot.slane %v9237_v62, 1 }
 0xb5d   : > { %v9171_v57 = vmul.f32 %v14790_v45, %v9149_v58  ;;  %v9212_v45 = vadd.f32 %v9211_v10, %v9210_v30  ;;  %v9271_v27 = vmul.f32 0.0625, %v9230_v7 }
 0xb5e   : > { %v9194_v18 = vadd.f32 %v14801_v56, %v9172_v2  ;;  %v9253_v9 = vadd.f32 %v9252_v29, %v9251_v53  ;;  %v9246_v32 = vadd.f32 %v9245_v39, %v9244_v14  ;;  %v9239_v19 = vadd.f32 %v9238_v0, %v9237_v62 }
 0xb5f   : > { %v9193_v50 = vadd.f32 %v14801_v56, %v9171_v57  ;;  %v9269_v25 = vmul.f32 0.0625, %v9212_v45 }
 0xb60   : > { %v9259_v48 = vsel %vm897_vm2, %v9194_v18, 0.0  ;;  %v9254_v23 = vrot.slane %v9253_v9, 2  ;;  %v9247_v47 = vrot.slane %v9246_v32, 1  ;;  %v9272_v33 = vmul.f32 0.0625, %v9239_v19 }
 0xb61   : > { %v9258_v61 = vsel %vm897_vm2, %v9193_v50, 0.0  ;;  %v9300_v22 = vsel %vm9299_vm8, %v9269_v25, %v9268_v37 }
 0xb62   : > { %v9255_v1 = vadd.f32 %v9254_v23, %v9253_v9  ;;  %v9260_v36 = vadd.f32 %v9259_v48, %v9258_v61  ;;  %v9248_v3 = vadd.f32 %v9247_v47, %v9246_v32  ;;  %v9302_v24 = vsel %vm9301_vm9, %v9270_v11, %v9300_v22 }
 0xb63   : > { %v9304_v15 = vsel %vm9303_vm10, %v9271_v27, %v9302_v24 }
 0xb64   : > { %v9261_v40 = vrot.slane %v9260_v36, 4  ;;  %v9256_v5 = vrot.slane %v9255_v1, 1  ;;  %v9273_v51 = vmul.f32 0.0625, %v9248_v3  ;;  %v9306_v52 = vsel %vm9305_vm11, %v9272_v33, %v9304_v15 }
 0xb66   : > { %v9262_v56 = vadd.f32 %v9261_v40, %v9260_v36  ;;  %v9257_v8 = vadd.f32 %v9256_v5, %v9255_v1  ;;  %v9308_v42 = vsel %vm9307_vm12, %v9273_v51, %v9306_v52 }
 0xb68   : > { %v9263_v4 = vrot.slane %v9262_v56, 2  ;;  %v9274_v63 = vmul.f32 0.0625, %v9257_v8 }
 0xb6a   : > { %v9264_v28 = vadd.f32 %v9263_v4, %v9262_v56  ;;  %v9310_v44 = vsel %vm9309_vm13, %v9274_v63, %v9308_v42 }
 0xb6c   : > { %v9265_v54 = vrot.slane %v9264_v28, 1 }
 0xb6e   : > { %v9266_v43 = vadd.f32 %v9265_v54, %v9264_v28 }
 0xb70   : > { %v9275_v31 = vmul.f32 0.0625, %v9266_v43 }
 0xb72   : > { %v9312_v13 = vsel %vm9311_vm14, %v9275_v31, %v9310_v44 }
 0xb73   : > { %10955 = vmatmul.mubr.msk.f32.vlgmr.msra.gmra.mrb[120].mxu0 %vm897_vm2, %v9312_v13 }
 0xc46   : > { %v9381_v14 = vpop.f32.mrb[120].mxu0 }
 0xc47   : > { %v9382_v26 = vadd.f32 %v9767_v6, %v9381_v14  ;;  %v10956_v17 = vpop.f32.mrb[121].mxu0 }
 0xc49   : > { %9385 = vst [vmem:[%s652_s1] sm:$0xff] %v9382_v26 }
 0xc4a   : > { %12030 = shalt.err (!%p12027_p3)
}
 0xc4b   : > { %s12031_s24 = scalar_lea.hbm %s14869_s23, 128  ;;  %s12035_s1 = scalar_lea.hbm %s15153_s20, 256 }
 0xc4c   : > { %p12032_p4 = scmp.ne.s32.totalorder %s14869_s23, %s12031_s24  ;;  %p12036_p9 = scmp.lt.u32.totalorder %s14869_s23, %s15153_s20 }
 0xc4d   : > { %p12037_p10 = scmp.lt.u32.totalorder %s12035_s1, %s12031_s24  ;;  %p12039_p12 = scmp.lt.u32.totalorder %s12031_s24, %s14869_s23 }
 0xc4e   : > { %p12033_p7 = pnand %p12032_p4, %p12239_p5 }
 0xc4f   : > { %p12038_p11 = por %p12037_p10, %p12036_p9 }
 0xc50   : > { %p12034_p8 = pneg %p12033_p7 }
 0xc51   : > { %p12040_p13 = por %p12039_p12, %p12038_p11 }
 0xc53   : > { %p12041_p0 = pnand %p12040_p13, %p12034_p8 }
 0xc55   : > { %12044 = shalt.err (!%p12041_p0)
}
 0xc56   : > { %11409 = dma.vmem_to_hbm [thread:$0]  (%p12239_p5), %s14871_s2, 128, %s14869_s23, %s9387_s6  }
 0xc57 PF: > { %s15154_s4 = sld [smem:[#allocation7_spill]]  ;;  %s15155_s3 = sld [smem:[#allocation5_spill]] }
 0xc5d   : > { %p11415_p1 = scmp.ge.s32.totalorder %s15154_s4, 2  ;;  %s9412_s26 = sand.u32 1, %s15155_s3  }
 0xc5e   : > { %s9413_s28 = scalar_lea.sflag [#allocation3], %s9412_s26 }
 0xc5f   : > { %p11412_p2 = pnand %p11415_p1, %p12243_p6 }
 0xc61   : > { %12062 = dma.done.wait (!%p11412_p2), %s9413_s28, 128  }
 0xc62   : > { %12064 = vsyncadd (!%p11412_p2), %s9413_s28, 4294967168  ;;  %s15157_s27 = sld [smem:[#allocation8_spill]]  ;;  %s15158_s24 = sld [smem:[#allocation6_spill]] }
 0xc63   : > { %s15159_s26 = sld [smem:[#allocation9_spill]]  ;;  %s15160_s2 = smov %s12071_s25 }
 0xc68   : > { %p31_p3 = scmp.ge.s32.totalorder %s15157_s27, 4   ;;  %s15161_s25 = smov %s15158_s24 }
 0xc6a   :  { %33 = sbr.rel (!%p31_p3) target bundleno = 13 (0xd), region = 139 }
 0xc71   :  { %9418 = vsyncpa [#allocation3], 1 }
 0xc72   :  { %9420 = vsyncpa [#allocation3 + $0x1], 1 }

</bundles_post_ra>
